<compile_context>
chip_gen: v6e
topology: v6e:2x2x1
jax: 0.10.0
libtpu: 0.0.40
codegen_flags: <defaults>
</compile_context>

<pallas_src>
import functools

import jax
import jax.numpy as jnp
from jax.experimental import pallas as pl
from jax.experimental.pallas import tpu as pltpu

BN_EPS = 1e-5


# ----------------------------------------------------------------------------
# Fused kernel: conv1(3x3, stride) + BN1 + ReLU + conv2(3x3, 1) + BN2 + skip.
# One grid step == one batch image.  All taps are contiguous static slices
# (stride handled by the wrapper's phase decomposition).
# ----------------------------------------------------------------------------
def _res_layer_kernel(xph_ref, w1_ref, shift1_ref, w2_ref, shift2_ref, out_ref,
                      acc_ref, y1p_ref, *, stride, ho, wo, cin, cout):
    s = stride
    taps = [(dy, dx) for dy in range(3) for dx in range(3)]

    # Lazily load each (Hp, Wp, Cin) phase plane exactly once.
    planes = {}

    def phase(p, q):
        if (p, q) not in planes:
            planes[(p, q)] = xph_ref[0, p * s + q]            # bf16 (Hp, Wp, Cin)
        return planes[(p, q)]

    # ---- conv1: 9 shifted MXU matmuls, f32 accumulation in VMEM scratch ----
    acc_ref[...] = jnp.zeros_like(acc_ref)
    for k, (dy, dx) in enumerate(taps):
        py, ay = dy % s, dy // s
        px, ax = dx % s, dx // s
        xs = phase(py, px)[ay:ay + ho, ax:ax + wo, :]          # (ho, wo, cin) bf16
        acc_ref[...] += jnp.dot(xs.reshape(ho * wo, cin), w1_ref[k],
                                preferred_element_type=jnp.float32)

    # BN1 is folded into (w1, shift1); apply shift + ReLU in f32.
    y1 = jnp.maximum(acc_ref[...] + shift1_ref[...], 0.0)

    # Stage y1 in a zero-padded bf16 VMEM scratch (halo for the second 3x3).
    y1p_ref[...] = jnp.zeros_like(y1p_ref)
    y1p_ref[1:ho + 1, 1:wo + 1, :] = (
        y1.reshape(ho, wo, cout).astype(y1p_ref.dtype))

    # ---- conv2 (stride 1): 9 shifted matmuls from the padded scratch -------
    acc_ref[...] = jnp.zeros_like(acc_ref)
    for k, (dy, dx) in enumerate(taps):
        xs = y1p_ref[dy:dy + ho, dx:dx + wo, :]                # (ho, wo, cout) bf16
        acc_ref[...] += jnp.dot(xs.reshape(ho * wo, cout), w2_ref[k],
                                preferred_element_type=jnp.float32)

    # Residual skip (AvgPool2d(1, stride) == strided subsample) added in-kernel
    # into the first `cin` output channels (no zero-padded skip copy in HBM).
    off, p = 1 // s, 1 % s
    skip = phase(p, p)[off:off + ho, off:off + wo, :]          # (ho, wo, cin)
    acc_ref[:, 0:cin] += skip.reshape(ho * wo, cin).astype(jnp.float32)

    # BN2 folded shift; single f32 store of the whole tile.
    out_ref[0] = acc_ref[...] + shift2_ref[...]


# ----------------------------------------------------------------------------
# Wrapper glue: BN folding, phase split, pallas_call, NCHW<->NHWC at the edges
# ----------------------------------------------------------------------------
def _fold_bn(w_hwio, bias, gamma, beta, mean, var):
    """Fold inference-mode BatchNorm into conv weight + per-channel shift."""
    scale = gamma * jax.lax.rsqrt(var + BN_EPS)                # (1, Cout)
    w_folded = w_hwio * scale.reshape(1, 1, 1, -1)
    shift = (bias - mean) * scale + beta                       # (1, Cout)
    return w_folded, shift


def _phase_split(x_nhwc, stride):
    """Zero-pad H/W by 1 and split into stride*stride phase planes so that all
    in-kernel 3x3 taps are contiguous slices (no strided VMEM access).  Extra
    HBM traffic ~1x the input (vs. 9x for a materialized im2col)."""
    n, h, w, c = x_nhwc.shape
    s = stride
    ho, wo = (h - 1) // s + 1, (w - 1) // s + 1
    hp, wp = 2 // s + ho, 2 // s + wo
    xp = jnp.pad(x_nhwc, ((0, 0), (1, 1), (1, 1), (0, 0)))
    planes = []
    for py in range(s):
        for px in range(s):
            pln = xp[:, py::s, px::s, :]
            pad_h = max(hp - pln.shape[1], 0)
            pad_w = max(wp - pln.shape[2], 0)
            if pad_h or pad_w:
                pln = jnp.pad(pln, ((0, 0), (0, pad_h), (0, pad_w), (0, 0)))
            planes.append(pln[:, :hp, :wp, :])
    return jnp.stack(planes, axis=1), (ho, wo, hp, wp)         # (N, s*s, hp, wp, C)


def res_layer_forward(x_nchw, params, stride):
    """Pallas implementation of ResLayer.forward.  Input/output are NCHW."""
    s = int(stride)
    x = jnp.transpose(x_nchw, (0, 2, 3, 1)).astype(jnp.float32)   # -> NHWC
    n, h, w, cin = x.shape
    cout = params["w1"].shape[-1]
    if cout < cin:
        raise ValueError("ResLayer requires out_channels >= in_channels")

    # Fold BN (inference) into conv weights / shifts; bf16 for the MXU.
    w1f, shift1 = _fold_bn(params["w1"], params["b1"], params["g1"],
                           params["beta1"], params["mu1"], params["var1"])
    w2f, shift2 = _fold_bn(params["w2"], params["b2"], params["g2"],
                           params["beta2"], params["mu2"], params["var2"])
    w1_taps = w1f.reshape(9, cin, cout).astype(jnp.bfloat16)
    w2_taps = w2f.reshape(9, cout, cout).astype(jnp.bfloat16)
    shift1 = shift1.astype(jnp.float32)
    shift2 = shift2.astype(jnp.float32)

    phases, (ho, wo, hp, wp) = _phase_split(x, s)
    phases = phases.astype(jnp.bfloat16)

    kernel = functools.partial(_res_layer_kernel, stride=s, ho=ho, wo=wo,
                               cin=cin, cout=cout)

    # Conservative VMEM budget: double-buffered streams + resident weights +
    # scratches (v7x has only 64 MiB physical VMEM / ~32 MiB scoped default).
    stream = s * s * hp * wp * cin * 2 + ho * wo * cout * 4
    resident = 9 * cin * cout * 2 + 9 * cout * cout * 2 + 2 * cout * 4 * 2
    scratch = ho * wo * cout * 4 + (ho + 2) * (wo + 2) * cout * 2
    vmem_limit = int(min(max(4 * (2 * stream + resident + scratch), 4 << 20),
                         32 << 20))

    out_flat = pl.pallas_call(
        kernel,
        out_shape=jax.ShapeDtypeStruct((n, ho * wo, cout), jnp.float32),
        grid_spec=pltpu.PrefetchScalarGridSpec(
            num_scalar_prefetch=0,
            grid=(n,),
            in_specs=[
                # streamed per grid step (one image's phase planes)
                pl.BlockSpec((1, s * s, hp, wp, cin),
                             lambda i: (i, 0, 0, 0, 0)),
                # resident across the grid
                pl.BlockSpec((9, cin, cout), lambda i: (0, 0, 0)),
                pl.BlockSpec((1, cout), lambda i: (0, 0)),
                pl.BlockSpec((9, cout, cout), lambda i: (0, 0, 0)),
                pl.BlockSpec((1, cout), lambda i: (0, 0)),
            ],
            out_specs=pl.BlockSpec((1, ho * wo, cout), lambda i: (i, 0, 0)),
            scratch_shapes=[
                pltpu.VMEM((ho * wo, cout), jnp.float32),          # f32 accumulator
                pltpu.VMEM((ho + 2, wo + 2, cout), jnp.bfloat16),  # padded y1
            ],
        ),
        compiler_params=pltpu.CompilerParams(
            dimension_semantics=("parallel",),
            vmem_limit_bytes=vmem_limit),
    )(phases, w1_taps, shift1, w2_taps, shift2)

    out = out_flat.reshape(n, ho, wo, cout)
    # NOTE: at toy widths (cout=8) the store is lane-sparse; at real ResNet
    # channel counts (>=128) the same layout is lane-dense automatically.
    return jnp.transpose(out, (0, 3, 1, 2))                        # -> NCHW


# ----------------------------------------------------------------------------
# Deterministic parameter init (kaiming-like conv, BN gamma~N(1,.002), synthetic
# running statistics for inference-mode BN)
# ----------------------------------------------------------------------------
def init_params(key, cin, cout):
    ks = jax.random.split(key, 8)
    fan_in1 = 9 * cin
    fan_in2 = 9 * cout
    w1 = jax.random.normal(ks[0], (3, 3, cin, cout), jnp.float32) * jnp.sqrt(2.0 / fan_in1)
    w2 = jax.random.normal(ks[1], (3, 3, cout, cout), jnp.float32) * jnp.sqrt(2.0 / fan_in2)
    g1 = 1.0 + 0.002 * jax.random.normal(ks[2], (1, cout), jnp.float32)
    g2 = 1.0 + 0.002 * jax.random.normal(ks[3], (1, cout), jnp.float32)
    mu1 = 0.1 * jax.random.normal(ks[4], (1, cout), jnp.float32)
    mu2 = 0.1 * jax.random.normal(ks[5], (1, cout), jnp.float32)
    var1 = 0.5 + jax.nn.softplus(jax.random.normal(ks[6], (1, cout), jnp.float32))
    var2 = 0.5 + jax.nn.softplus(jax.random.normal(ks[7], (1, cout), jnp.float32))
    zeros = jnp.zeros((1, cout), jnp.float32)
    return dict(w1=w1, b1=zeros, g1=g1, beta1=zeros, mu1=mu1, var1=var1,
                w2=w2, b2=zeros, g2=g2, beta2=zeros, mu2=mu2, var2=var2)


# ----------------------------------------------------------------------------
# Pure-JAX f32 reference (lax.conv) for correctness check
# ----------------------------------------------------------------------------
def _reference(x_nchw, params, stride):
    x = jnp.transpose(x_nchw, (0, 2, 3, 1)).astype(jnp.float32)
    cin = x.shape[-1]
    cout = params["w1"].shape[-1]

    def conv(x, w, b, s):
        y = jax.lax.conv_general_dilated(
            x, w, (s, s), ((1, 1), (1, 1)),
            dimension_numbers=("NHWC", "HWIO", "NHWC"))
        return y + b

    def bn(y, g, beta, mu, var):
        return g * (y - mu) * jax.lax.rsqrt(var + BN_EPS) + beta

    skip = x
    if stride > 1:
        skip = skip[:, ::stride, ::stride, :]
    if cout > cin:
        skip = jnp.pad(skip, ((0, 0), (0, 0), (0, 0), (0, cout - cin)))

    y = conv(x, params["w1"], params["b1"], stride)
    y = jnp.maximum(bn(y, params["g1"], params["beta1"], params["mu1"], params["var1"]), 0.0)
    y = conv(y, params["w2"], params["b2"], 1)
    y = bn(y, params["g2"], params["beta2"], params["mu2"], params["var2"])
    return jnp.transpose(skip + y, (0, 3, 1, 2))


if __name__ == "__main__":
    key = jax.random.PRNGKey(0)
    kx, kp = jax.random.split(key)

    N, C_IN, C_OUT, H, W, STRIDE = 2, 4, 8, 16, 16, 2
    x = jax.random.normal(kx, (N, C_IN, H, W), jnp.float32)      # NCHW, PyTorch-style
    params = init_params(kp, C_IN, C_OUT)

    fwd = jax.jit(functools.partial(res_layer_forward, stride=STRIDE))
    out = jax.block_until_ready(fwd(x, params))

    ref = jax.block_until_ready(_reference(x, params, STRIDE))
    assert out.shape == (N, C_OUT, H // STRIDE, W // STRIDE), out.shape
    # bf16 MXU inputs vs. pure-f32 reference -> loose but meaningful tolerance
    # (a wrong tap / BN fold / missing skip produces O(0.3+) errors).
    max_err = float(jnp.max(jnp.abs(out - ref)))
    assert max_err < 8e-2, max_err

    print("KERNEL_OK")
</pallas_src>

<mosaic_0001>
module attributes {stable_mosaic.version = 11 : i64} {
  func.func @_res_layer_kernel(%arg0: i32, %arg1: memref<1x4x9x9x4xbf16, #tpu.memory_space<vmem>>, %arg2: memref<9x4x8xbf16, #tpu.memory_space<vmem>>, %arg3: memref<1x8xf32, #tpu.memory_space<vmem>>, %arg4: memref<9x8x8xbf16, #tpu.memory_space<vmem>>, %arg5: memref<1x8xf32, #tpu.memory_space<vmem>>, %arg6: memref<1x64x8xf32, #tpu.memory_space<vmem>>, %arg7: memref<64x8xf32, #tpu.memory_space<vmem>>, %arg8: memref<10x10x8xbf16, #tpu.memory_space<vmem>>) attributes {dimension_semantics = [#tpu.dimension_semantics<parallel>], iteration_bounds = array<i64: 2>, scalar_prefetch = 0 : i64, scratch_operands = 2 : i64, tpu.core_type = #tpu.core_type<tc>, window_params = [{transform_indices = @transform_0, window_bounds = array<i64: 1, 4, 9, 9, 4>}, {pipeline_mode = #tpu.pipeline_mode<synchronous>, transform_indices = @transform_1, window_bounds = array<i64: 9, 4, 8>}, {pipeline_mode = #tpu.pipeline_mode<synchronous>, transform_indices = @transform_2, window_bounds = array<i64: 1, 8>}, {pipeline_mode = #tpu.pipeline_mode<synchronous>, transform_indices = @transform_3, window_bounds = array<i64: 9, 8, 8>}, {pipeline_mode = #tpu.pipeline_mode<synchronous>, transform_indices = @transform_4, window_bounds = array<i64: 1, 8>}, {transform_indices = @transform_5, window_bounds = array<i64: 1, 64, 8>}]} {
    %cst = arith.constant 0.000000e+00 : f32
    %0 = vector.broadcast %cst : f32 to vector<64x8xf32>
    %c0 = arith.constant 0 : index
    %c0_0 = arith.constant 0 : index
    %1 = vector.load %arg7[%c0, %c0_0] : memref<64x8xf32, #tpu.memory_space<vmem>>, vector<64x8xf32>
    tpu.vector_store %arg7[%c0, %c0_0], %0 {strides = array<i32>} : memref<64x8xf32, #tpu.memory_space<vmem>>, vector<64x8xf32>,
    %c0_1 = arith.constant 0 : index
    %c0_2 = arith.constant 0 : index
    %c0_3 = arith.constant 0 : index
    %c0_4 = arith.constant 0 : index
    %c0_5 = arith.constant 0 : index
    %2 = vector.load %arg1[%c0_1, %c0_2, %c0_3, %c0_4, %c0_5] : memref<1x4x9x9x4xbf16, #tpu.memory_space<vmem>>, vector<1x1x9x9x4xbf16>
    %3 = vector.shape_cast %2 : vector<1x1x9x9x4xbf16> to vector<9x9x4xbf16>
    %4 = vector.extract_strided_slice %3 {offsets = [0, 0, 0], sizes = [8, 8, 4], strides = [1, 1, 1]} : vector<9x9x4xbf16> to vector<8x8x4xbf16>
    %c0_6 = arith.constant 0 : index
    %c0_7 = arith.constant 0 : index
    %5 = vector.load %arg7[%c0_6, %c0_7] : memref<64x8xf32, #tpu.memory_space<vmem>>, vector<64x8xf32>
    %6 = vector.shape_cast %4 : vector<8x8x4xbf16> to vector<64x4xbf16>
    %c0_8 = arith.constant 0 : index
    %c0_9 = arith.constant 0 : index
    %c0_10 = arith.constant 0 : index
    %7 = vector.load %arg2[%c0_8, %c0_9, %c0_10] : memref<9x4x8xbf16, #tpu.memory_space<vmem>>, vector<1x4x8xbf16>
    %8 = vector.shape_cast %7 : vector<1x4x8xbf16> to vector<4x8xbf16>
    %cst_11 = arith.constant dense<0.000000e+00> : vector<64x8xf32>
    %9 = tpu.matmul %6, %8, %cst_11 {dimension_numbers = #tpu.dot_dimension_numbers<[1], [0], [0], [1], [0, 0, 1, 1], [], []>} : vector<64x4xbf16>, vector<4x8xbf16>, vector<64x8xf32> -> vector<64x8xf32>
    %10 = arith.addf %5, %9 : vector<64x8xf32>
    %c0_12 = arith.constant 0 : index
    %c0_13 = arith.constant 0 : index
    %11 = vector.load %arg7[%c0_12, %c0_13] : memref<64x8xf32, #tpu.memory_space<vmem>>, vector<64x8xf32>
    tpu.vector_store %arg7[%c0_12, %c0_13], %10 {strides = array<i32>} : memref<64x8xf32, #tpu.memory_space<vmem>>, vector<64x8xf32>,
    %c0_14 = arith.constant 0 : index
    %c1 = arith.constant 1 : index
    %c0_15 = arith.constant 0 : index
    %c0_16 = arith.constant 0 : index
    %c0_17 = arith.constant 0 : index
    %12 = vector.load %arg1[%c0_14, %c1, %c0_15, %c0_16, %c0_17] : memref<1x4x9x9x4xbf16, #tpu.memory_space<vmem>>, vector<1x1x9x9x4xbf16>
    %13 = vector.shape_cast %12 : vector<1x1x9x9x4xbf16> to vector<9x9x4xbf16>
    %14 = vector.extract_strided_slice %13 {offsets = [0, 0, 0], sizes = [8, 8, 4], strides = [1, 1, 1]} : vector<9x9x4xbf16> to vector<8x8x4xbf16>
    %c0_18 = arith.constant 0 : index
    %c0_19 = arith.constant 0 : index
    %15 = vector.load %arg7[%c0_18, %c0_19] : memref<64x8xf32, #tpu.memory_space<vmem>>, vector<64x8xf32>
    %16 = vector.shape_cast %14 : vector<8x8x4xbf16> to vector<64x4xbf16>
    %c1_20 = arith.constant 1 : index
    %c0_21 = arith.constant 0 : index
    %c0_22 = arith.constant 0 : index
    %17 = vector.load %arg2[%c1_20, %c0_21, %c0_22] : memref<9x4x8xbf16, #tpu.memory_space<vmem>>, vector<1x4x8xbf16>
    %18 = vector.shape_cast %17 : vector<1x4x8xbf16> to vector<4x8xbf16>
    %cst_23 = arith.constant dense<0.000000e+00> : vector<64x8xf32>
    %19 = tpu.matmul %16, %18, %cst_23 {dimension_numbers = #tpu.dot_dimension_numbers<[1], [0], [0], [1], [0, 0, 1, 1], [], []>} : vector<64x4xbf16>, vector<4x8xbf16>, vector<64x8xf32> -> vector<64x8xf32>
    %20 = arith.addf %15, %19 : vector<64x8xf32>
    %c0_24 = arith.constant 0 : index
    %c0_25 = arith.constant 0 : index
    %21 = vector.load %arg7[%c0_24, %c0_25] : memref<64x8xf32, #tpu.memory_space<vmem>>, vector<64x8xf32>
    tpu.vector_store %arg7[%c0_24, %c0_25], %20 {strides = array<i32>} : memref<64x8xf32, #tpu.memory_space<vmem>>, vector<64x8xf32>,
    %22 = vector.extract_strided_slice %3 {offsets = [0, 1, 0], sizes = [8, 8, 4], strides = [1, 1, 1]} : vector<9x9x4xbf16> to vector<8x8x4xbf16>
    %c0_26 = arith.constant 0 : index
    %c0_27 = arith.constant 0 : index
    %23 = vector.load %arg7[%c0_26, %c0_27] : memref<64x8xf32, #tpu.memory_space<vmem>>, vector<64x8xf32>
    %24 = vector.shape_cast %22 : vector<8x8x4xbf16> to vector<64x4xbf16>
    %c2 = arith.constant 2 : index
    %c0_28 = arith.constant 0 : index
    %c0_29 = arith.constant 0 : index
    %25 = vector.load %arg2[%c2, %c0_28, %c0_29] : memref<9x4x8xbf16, #tpu.memory_space<vmem>>, vector<1x4x8xbf16>
    %26 = vector.shape_cast %25 : vector<1x4x8xbf16> to vector<4x8xbf16>
    %cst_30 = arith.constant dense<0.000000e+00> : vector<64x8xf32>
    %27 = tpu.matmul %24, %26, %cst_30 {dimension_numbers = #tpu.dot_dimension_numbers<[1], [0], [0], [1], [0, 0, 1, 1], [], []>} : vector<64x4xbf16>, vector<4x8xbf16>, vector<64x8xf32> -> vector<64x8xf32>
    %28 = arith.addf %23, %27 : vector<64x8xf32>
    %c0_31 = arith.constant 0 : index
    %c0_32 = arith.constant 0 : index
    %29 = vector.load %arg7[%c0_31, %c0_32] : memref<64x8xf32, #tpu.memory_space<vmem>>, vector<64x8xf32>
    tpu.vector_store %arg7[%c0_31, %c0_32], %28 {strides = array<i32>} : memref<64x8xf32, #tpu.memory_space<vmem>>, vector<64x8xf32>,
    %c0_33 = arith.constant 0 : index
    %c2_34 = arith.constant 2 : index
    %c0_35 = arith.constant 0 : index
    %c0_36 = arith.constant 0 : index
    %c0_37 = arith.constant 0 : index
    %30 = vector.load %arg1[%c0_33, %c2_34, %c0_35, %c0_36, %c0_37] : memref<1x4x9x9x4xbf16, #tpu.memory_space<vmem>>, vector<1x1x9x9x4xbf16>
    %31 = vector.shape_cast %30 : vector<1x1x9x9x4xbf16> to vector<9x9x4xbf16>
    %32 = vector.extract_strided_slice %31 {offsets = [0, 0, 0], sizes = [8, 8, 4], strides = [1, 1, 1]} : vector<9x9x4xbf16> to vector<8x8x4xbf16>
    %c0_38 = arith.constant 0 : index
    %c0_39 = arith.constant 0 : index
    %33 = vector.load %arg7[%c0_38, %c0_39] : memref<64x8xf32, #tpu.memory_space<vmem>>, vector<64x8xf32>
    %34 = vector.shape_cast %32 : vector<8x8x4xbf16> to vector<64x4xbf16>
    %c3 = arith.constant 3 : index
    %c0_40 = arith.constant 0 : index
    %c0_41 = arith.constant 0 : index
    %35 = vector.load %arg2[%c3, %c0_40, %c0_41] : memref<9x4x8xbf16, #tpu.memory_space<vmem>>, vector<1x4x8xbf16>
    %36 = vector.shape_cast %35 : vector<1x4x8xbf16> to vector<4x8xbf16>
    %cst_42 = arith.constant dense<0.000000e+00> : vector<64x8xf32>
    %37 = tpu.matmul %34, %36, %cst_42 {dimension_numbers = #tpu.dot_dimension_numbers<[1], [0], [0], [1], [0, 0, 1, 1], [], []>} : vector<64x4xbf16>, vector<4x8xbf16>, vector<64x8xf32> -> vector<64x8xf32>
    %38 = arith.addf %33, %37 : vector<64x8xf32>
    %c0_43 = arith.constant 0 : index
    %c0_44 = arith.constant 0 : index
    %39 = vector.load %arg7[%c0_43, %c0_44] : memref<64x8xf32, #tpu.memory_space<vmem>>, vector<64x8xf32>
    tpu.vector_store %arg7[%c0_43, %c0_44], %38 {strides = array<i32>} : memref<64x8xf32, #tpu.memory_space<vmem>>, vector<64x8xf32>,
    %c0_45 = arith.constant 0 : index
    %c3_46 = arith.constant 3 : index
    %c0_47 = arith.constant 0 : index
    %c0_48 = arith.constant 0 : index
    %c0_49 = arith.constant 0 : index
    %40 = vector.load %arg1[%c0_45, %c3_46, %c0_47, %c0_48, %c0_49] : memref<1x4x9x9x4xbf16, #tpu.memory_space<vmem>>, vector<1x1x9x9x4xbf16>
    %41 = vector.shape_cast %40 : vector<1x1x9x9x4xbf16> to vector<9x9x4xbf16>
    %42 = vector.extract_strided_slice %41 {offsets = [0, 0, 0], sizes = [8, 8, 4], strides = [1, 1, 1]} : vector<9x9x4xbf16> to vector<8x8x4xbf16>
    %c0_50 = arith.constant 0 : index
    %c0_51 = arith.constant 0 : index
    %43 = vector.load %arg7[%c0_50, %c0_51] : memref<64x8xf32, #tpu.memory_space<vmem>>, vector<64x8xf32>
    %44 = vector.shape_cast %42 : vector<8x8x4xbf16> to vector<64x4xbf16>
    %c4 = arith.constant 4 : index
    %c0_52 = arith.constant 0 : index
    %c0_53 = arith.constant 0 : index
    %45 = vector.load %arg2[%c4, %c0_52, %c0_53] : memref<9x4x8xbf16, #tpu.memory_space<vmem>>, vector<1x4x8xbf16>
    %46 = vector.shape_cast %45 : vector<1x4x8xbf16> to vector<4x8xbf16>
    %cst_54 = arith.constant dense<0.000000e+00> : vector<64x8xf32>
    %47 = tpu.matmul %44, %46, %cst_54 {dimension_numbers = #tpu.dot_dimension_numbers<[1], [0], [0], [1], [0, 0, 1, 1], [], []>} : vector<64x4xbf16>, vector<4x8xbf16>, vector<64x8xf32> -> vector<64x8xf32>
    %48 = arith.addf %43, %47 : vector<64x8xf32>
    %c0_55 = arith.constant 0 : index
    %c0_56 = arith.constant 0 : index
    %49 = vector.load %arg7[%c0_55, %c0_56] : memref<64x8xf32, #tpu.memory_space<vmem>>, vector<64x8xf32>
    tpu.vector_store %arg7[%c0_55, %c0_56], %48 {strides = array<i32>} : memref<64x8xf32, #tpu.memory_space<vmem>>, vector<64x8xf32>,
    %50 = vector.extract_strided_slice %31 {offsets = [0, 1, 0], sizes = [8, 8, 4], strides = [1, 1, 1]} : vector<9x9x4xbf16> to vector<8x8x4xbf16>
    %c0_57 = arith.constant 0 : index
    %c0_58 = arith.constant 0 : index
    %51 = vector.load %arg7[%c0_57, %c0_58] : memref<64x8xf32, #tpu.memory_space<vmem>>, vector<64x8xf32>
    %52 = vector.shape_cast %50 : vector<8x8x4xbf16> to vector<64x4xbf16>
    %c5 = arith.constant 5 : index
    %c0_59 = arith.constant 0 : index
    %c0_60 = arith.constant 0 : index
    %53 = vector.load %arg2[%c5, %c0_59, %c0_60] : memref<9x4x8xbf16, #tpu.memory_space<vmem>>, vector<1x4x8xbf16>
    %54 = vector.shape_cast %53 : vector<1x4x8xbf16> to vector<4x8xbf16>
    %cst_61 = arith.constant dense<0.000000e+00> : vector<64x8xf32>
    %55 = tpu.matmul %52, %54, %cst_61 {dimension_numbers = #tpu.dot_dimension_numbers<[1], [0], [0], [1], [0, 0, 1, 1], [], []>} : vector<64x4xbf16>, vector<4x8xbf16>, vector<64x8xf32> -> vector<64x8xf32>
    %56 = arith.addf %51, %55 : vector<64x8xf32>
    %c0_62 = arith.constant 0 : index
    %c0_63 = arith.constant 0 : index
    %57 = vector.load %arg7[%c0_62, %c0_63] : memref<64x8xf32, #tpu.memory_space<vmem>>, vector<64x8xf32>
    tpu.vector_store %arg7[%c0_62, %c0_63], %56 {strides = array<i32>} : memref<64x8xf32, #tpu.memory_space<vmem>>, vector<64x8xf32>,
    %58 = vector.extract_strided_slice %3 {offsets = [1, 0, 0], sizes = [8, 8, 4], strides = [1, 1, 1]} : vector<9x9x4xbf16> to vector<8x8x4xbf16>
    %c0_64 = arith.constant 0 : index
    %c0_65 = arith.constant 0 : index
    %59 = vector.load %arg7[%c0_64, %c0_65] : memref<64x8xf32, #tpu.memory_space<vmem>>, vector<64x8xf32>
    %60 = vector.shape_cast %58 : vector<8x8x4xbf16> to vector<64x4xbf16>
    %c6 = arith.constant 6 : index
    %c0_66 = arith.constant 0 : index
    %c0_67 = arith.constant 0 : index
    %61 = vector.load %arg2[%c6, %c0_66, %c0_67] : memref<9x4x8xbf16, #tpu.memory_space<vmem>>, vector<1x4x8xbf16>
    %62 = vector.shape_cast %61 : vector<1x4x8xbf16> to vector<4x8xbf16>
    %cst_68 = arith.constant dense<0.000000e+00> : vector<64x8xf32>
    %63 = tpu.matmul %60, %62, %cst_68 {dimension_numbers = #tpu.dot_dimension_numbers<[1], [0], [0], [1], [0, 0, 1, 1], [], []>} : vector<64x4xbf16>, vector<4x8xbf16>, vector<64x8xf32> -> vector<64x8xf32>
    %64 = arith.addf %59, %63 : vector<64x8xf32>
    %c0_69 = arith.constant 0 : index
    %c0_70 = arith.constant 0 : index
    %65 = vector.load %arg7[%c0_69, %c0_70] : memref<64x8xf32, #tpu.memory_space<vmem>>, vector<64x8xf32>
    tpu.vector_store %arg7[%c0_69, %c0_70], %64 {strides = array<i32>} : memref<64x8xf32, #tpu.memory_space<vmem>>, vector<64x8xf32>,
    %66 = vector.extract_strided_slice %13 {offsets = [1, 0, 0], sizes = [8, 8, 4], strides = [1, 1, 1]} : vector<9x9x4xbf16> to vector<8x8x4xbf16>
    %c0_71 = arith.constant 0 : index
    %c0_72 = arith.constant 0 : index
    %67 = vector.load %arg7[%c0_71, %c0_72] : memref<64x8xf32, #tpu.memory_space<vmem>>, vector<64x8xf32>
    %68 = vector.shape_cast %66 : vector<8x8x4xbf16> to vector<64x4xbf16>
    %c7 = arith.constant 7 : index
    %c0_73 = arith.constant 0 : index
    %c0_74 = arith.constant 0 : index
    %69 = vector.load %arg2[%c7, %c0_73, %c0_74] : memref<9x4x8xbf16, #tpu.memory_space<vmem>>, vector<1x4x8xbf16>
    %70 = vector.shape_cast %69 : vector<1x4x8xbf16> to vector<4x8xbf16>
    %cst_75 = arith.constant dense<0.000000e+00> : vector<64x8xf32>
    %71 = tpu.matmul %68, %70, %cst_75 {dimension_numbers = #tpu.dot_dimension_numbers<[1], [0], [0], [1], [0, 0, 1, 1], [], []>} : vector<64x4xbf16>, vector<4x8xbf16>, vector<64x8xf32> -> vector<64x8xf32>
    %72 = arith.addf %67, %71 : vector<64x8xf32>
    %c0_76 = arith.constant 0 : index
    %c0_77 = arith.constant 0 : index
    %73 = vector.load %arg7[%c0_76, %c0_77] : memref<64x8xf32, #tpu.memory_space<vmem>>, vector<64x8xf32>
    tpu.vector_store %arg7[%c0_76, %c0_77], %72 {strides = array<i32>} : memref<64x8xf32, #tpu.memory_space<vmem>>, vector<64x8xf32>,
    %74 = vector.extract_strided_slice %3 {offsets = [1, 1, 0], sizes = [8, 8, 4], strides = [1, 1, 1]} : vector<9x9x4xbf16> to vector<8x8x4xbf16>
    %c0_78 = arith.constant 0 : index
    %c0_79 = arith.constant 0 : index
    %75 = vector.load %arg7[%c0_78, %c0_79] : memref<64x8xf32, #tpu.memory_space<vmem>>, vector<64x8xf32>
    %76 = vector.shape_cast %74 : vector<8x8x4xbf16> to vector<64x4xbf16>
    %c8 = arith.constant 8 : index
    %c0_80 = arith.constant 0 : index
    %c0_81 = arith.constant 0 : index
    %77 = vector.load %arg2[%c8, %c0_80, %c0_81] : memref<9x4x8xbf16, #tpu.memory_space<vmem>>, vector<1x4x8xbf16>
    %78 = vector.shape_cast %77 : vector<1x4x8xbf16> to vector<4x8xbf16>
    %cst_82 = arith.constant dense<0.000000e+00> : vector<64x8xf32>
    %79 = tpu.matmul %76, %78, %cst_82 {dimension_numbers = #tpu.dot_dimension_numbers<[1], [0], [0], [1], [0, 0, 1, 1], [], []>} : vector<64x4xbf16>, vector<4x8xbf16>, vector<64x8xf32> -> vector<64x8xf32>
    %80 = arith.addf %75, %79 : vector<64x8xf32>
    %c0_83 = arith.constant 0 : index
    %c0_84 = arith.constant 0 : index
    %81 = vector.load %arg7[%c0_83, %c0_84] : memref<64x8xf32, #tpu.memory_space<vmem>>, vector<64x8xf32>
    tpu.vector_store %arg7[%c0_83, %c0_84], %80 {strides = array<i32>} : memref<64x8xf32, #tpu.memory_space<vmem>>, vector<64x8xf32>,
    %c0_85 = arith.constant 0 : index
    %c0_86 = arith.constant 0 : index
    %82 = vector.load %arg7[%c0_85, %c0_86] : memref<64x8xf32, #tpu.memory_space<vmem>>, vector<64x8xf32>
    %c0_87 = arith.constant 0 : index
    %c0_88 = arith.constant 0 : index
    %83 = vector.load %arg3[%c0_87, %c0_88] : memref<1x8xf32, #tpu.memory_space<vmem>>, vector<1x8xf32>
    %84 = vector.broadcast %83 : vector<1x8xf32> to vector<64x8xf32>
    %85 = arith.addf %82, %84 : vector<64x8xf32>
    %cst_89 = arith.constant 0.000000e+00 : f32
    %86 = vector.broadcast %cst_89 : f32 to vector<64x8xf32>
    %87 = arith.maximumf %85, %86 : vector<64x8xf32>
    %cst_90 = arith.constant 0.000000e+00 : bf16
    %88 = vector.broadcast %cst_90 : bf16 to vector<10x10x8xbf16>
    %c0_91 = arith.constant 0 : index
    %c0_92 = arith.constant 0 : index
    %c0_93 = arith.constant 0 : index
    %89 = vector.load %arg8[%c0_91, %c0_92, %c0_93] : memref<10x10x8xbf16, #tpu.memory_space<vmem>>, vector<10x10x8xbf16>
    tpu.vector_store %arg8[%c0_91, %c0_92, %c0_93], %88 {strides = array<i32>} : memref<10x10x8xbf16, #tpu.memory_space<vmem>>, vector<10x10x8xbf16>,
    %90 = vector.shape_cast %87 : vector<64x8xf32> to vector<8x8x8xf32>
    %91 = arith.truncf %90 : vector<8x8x8xf32> to vector<8x8x8xbf16>
    %c1_94 = arith.constant 1 : index
    %c1_95 = arith.constant 1 : index
    %c0_96 = arith.constant 0 : index
    %92 = vector.load %arg8[%c1_94, %c1_95, %c0_96] : memref<10x10x8xbf16, #tpu.memory_space<vmem>>, vector<8x8x8xbf16>
    tpu.vector_store %arg8[%c1_94, %c1_95, %c0_96], %91 {strides = array<i32>} : memref<10x10x8xbf16, #tpu.memory_space<vmem>>, vector<8x8x8xbf16>,
    %cst_97 = arith.constant 0.000000e+00 : f32
    %93 = vector.broadcast %cst_97 : f32 to vector<64x8xf32>
    %c0_98 = arith.constant 0 : index
    %c0_99 = arith.constant 0 : index
    %94 = vector.load %arg7[%c0_98, %c0_99] : memref<64x8xf32, #tpu.memory_space<vmem>>, vector<64x8xf32>
    tpu.vector_store %arg7[%c0_98, %c0_99], %93 {strides = array<i32>} : memref<64x8xf32, #tpu.memory_space<vmem>>, vector<64x8xf32>,
    %c0_100 = arith.constant 0 : index
    %c0_101 = arith.constant 0 : index
    %c0_102 = arith.constant 0 : index
    %95 = vector.load %arg8[%c0_100, %c0_101, %c0_102] : memref<10x10x8xbf16, #tpu.memory_space<vmem>>, vector<8x8x8xbf16>
    %c0_103 = arith.constant 0 : index
    %c0_104 = arith.constant 0 : index
    %96 = vector.load %arg7[%c0_103, %c0_104] : memref<64x8xf32, #tpu.memory_space<vmem>>, vector<64x8xf32>
    %97 = vector.shape_cast %95 : vector<8x8x8xbf16> to vector<64x8xbf16>
    %c0_105 = arith.constant 0 : index
    %c0_106 = arith.constant 0 : index
    %c0_107 = arith.constant 0 : index
    %98 = vector.load %arg4[%c0_105, %c0_106, %c0_107] : memref<9x8x8xbf16, #tpu.memory_space<vmem>>, vector<1x8x8xbf16>
    %99 = vector.shape_cast %98 : vector<1x8x8xbf16> to vector<8x8xbf16>
    %cst_108 = arith.constant dense<0.000000e+00> : vector<64x8xf32>
    %100 = tpu.matmul %97, %99, %cst_108 {dimension_numbers = #tpu.dot_dimension_numbers<[1], [0], [0], [1], [0, 0, 1, 1], [], []>} : vector<64x8xbf16>, vector<8x8xbf16>, vector<64x8xf32> -> vector<64x8xf32>
    %101 = arith.addf %96, %100 : vector<64x8xf32>
    %c0_109 = arith.constant 0 : index
    %c0_110 = arith.constant 0 : index
    %102 = vector.load %arg7[%c0_109, %c0_110] : memref<64x8xf32, #tpu.memory_space<vmem>>, vector<64x8xf32>
    tpu.vector_store %arg7[%c0_109, %c0_110], %101 {strides = array<i32>} : memref<64x8xf32, #tpu.memory_space<vmem>>, vector<64x8xf32>,
    %c0_111 = arith.constant 0 : index
    %c1_112 = arith.constant 1 : index
    %c0_113 = arith.constant 0 : index
    %103 = vector.load %arg8[%c0_111, %c1_112, %c0_113] : memref<10x10x8xbf16, #tpu.memory_space<vmem>>, vector<8x8x8xbf16>
    %c0_114 = arith.constant 0 : index
    %c0_115 = arith.constant 0 : index
    %104 = vector.load %arg7[%c0_114, %c0_115] : memref<64x8xf32, #tpu.memory_space<vmem>>, vector<64x8xf32>
    %105 = vector.shape_cast %103 : vector<8x8x8xbf16> to vector<64x8xbf16>
    %c1_116 = arith.constant 1 : index
    %c0_117 = arith.constant 0 : index
    %c0_118 = arith.constant 0 : index
    %106 = vector.load %arg4[%c1_116, %c0_117, %c0_118] : memref<9x8x8xbf16, #tpu.memory_space<vmem>>, vector<1x8x8xbf16>
    %107 = vector.shape_cast %106 : vector<1x8x8xbf16> to vector<8x8xbf16>
    %cst_119 = arith.constant dense<0.000000e+00> : vector<64x8xf32>
    %108 = tpu.matmul %105, %107, %cst_119 {dimension_numbers = #tpu.dot_dimension_numbers<[1], [0], [0], [1], [0, 0, 1, 1], [], []>} : vector<64x8xbf16>, vector<8x8xbf16>, vector<64x8xf32> -> vector<64x8xf32>
    %109 = arith.addf %104, %108 : vector<64x8xf32>
    %c0_120 = arith.constant 0 : index
    %c0_121 = arith.constant 0 : index
    %110 = vector.load %arg7[%c0_120, %c0_121] : memref<64x8xf32, #tpu.memory_space<vmem>>, vector<64x8xf32>
    tpu.vector_store %arg7[%c0_120, %c0_121], %109 {strides = array<i32>} : memref<64x8xf32, #tpu.memory_space<vmem>>, vector<64x8xf32>,
    %c0_122 = arith.constant 0 : index
    %c2_123 = arith.constant 2 : index
    %c0_124 = arith.constant 0 : index
    %111 = vector.load %arg8[%c0_122, %c2_123, %c0_124] : memref<10x10x8xbf16, #tpu.memory_space<vmem>>, vector<8x8x8xbf16>
    %c0_125 = arith.constant 0 : index
    %c0_126 = arith.constant 0 : index
    %112 = vector.load %arg7[%c0_125, %c0_126] : memref<64x8xf32, #tpu.memory_space<vmem>>, vector<64x8xf32>
    %113 = vector.shape_cast %111 : vector<8x8x8xbf16> to vector<64x8xbf16>
    %c2_127 = arith.constant 2 : index
    %c0_128 = arith.constant 0 : index
    %c0_129 = arith.constant 0 : index
    %114 = vector.load %arg4[%c2_127, %c0_128, %c0_129] : memref<9x8x8xbf16, #tpu.memory_space<vmem>>, vector<1x8x8xbf16>
    %115 = vector.shape_cast %114 : vector<1x8x8xbf16> to vector<8x8xbf16>
    %cst_130 = arith.constant dense<0.000000e+00> : vector<64x8xf32>
    %116 = tpu.matmul %113, %115, %cst_130 {dimension_numbers = #tpu.dot_dimension_numbers<[1], [0], [0], [1], [0, 0, 1, 1], [], []>} : vector<64x8xbf16>, vector<8x8xbf16>, vector<64x8xf32> -> vector<64x8xf32>
    %117 = arith.addf %112, %116 : vector<64x8xf32>
    %c0_131 = arith.constant 0 : index
    %c0_132 = arith.constant 0 : index
    %118 = vector.load %arg7[%c0_131, %c0_132] : memref<64x8xf32, #tpu.memory_space<vmem>>, vector<64x8xf32>
    tpu.vector_store %arg7[%c0_131, %c0_132], %117 {strides = array<i32>} : memref<64x8xf32, #tpu.memory_space<vmem>>, vector<64x8xf32>,
    %c1_133 = arith.constant 1 : index
    %c0_134 = arith.constant 0 : index
    %c0_135 = arith.constant 0 : index
    %119 = vector.load %arg8[%c1_133, %c0_134, %c0_135] : memref<10x10x8xbf16, #tpu.memory_space<vmem>>, vector<8x8x8xbf16>
    %c0_136 = arith.constant 0 : index
    %c0_137 = arith.constant 0 : index
    %120 = vector.load %arg7[%c0_136, %c0_137] : memref<64x8xf32, #tpu.memory_space<vmem>>, vector<64x8xf32>
    %121 = vector.shape_cast %119 : vector<8x8x8xbf16> to vector<64x8xbf16>
    %c3_138 = arith.constant 3 : index
    %c0_139 = arith.constant 0 : index
    %c0_140 = arith.constant 0 : index
    %122 = vector.load %arg4[%c3_138, %c0_139, %c0_140] : memref<9x8x8xbf16, #tpu.memory_space<vmem>>, vector<1x8x8xbf16>
    %123 = vector.shape_cast %122 : vector<1x8x8xbf16> to vector<8x8xbf16>
    %cst_141 = arith.constant dense<0.000000e+00> : vector<64x8xf32>
    %124 = tpu.matmul %121, %123, %cst_141 {dimension_numbers = #tpu.dot_dimension_numbers<[1], [0], [0], [1], [0, 0, 1, 1], [], []>} : vector<64x8xbf16>, vector<8x8xbf16>, vector<64x8xf32> -> vector<64x8xf32>
    %125 = arith.addf %120, %124 : vector<64x8xf32>
    %c0_142 = arith.constant 0 : index
    %c0_143 = arith.constant 0 : index
    %126 = vector.load %arg7[%c0_142, %c0_143] : memref<64x8xf32, #tpu.memory_space<vmem>>, vector<64x8xf32>
    tpu.vector_store %arg7[%c0_142, %c0_143], %125 {strides = array<i32>} : memref<64x8xf32, #tpu.memory_space<vmem>>, vector<64x8xf32>,
    %c1_144 = arith.constant 1 : index
    %c1_145 = arith.constant 1 : index
    %c0_146 = arith.constant 0 : index
    %127 = vector.load %arg8[%c1_144, %c1_145, %c0_146] : memref<10x10x8xbf16, #tpu.memory_space<vmem>>, vector<8x8x8xbf16>
    %c0_147 = arith.constant 0 : index
    %c0_148 = arith.constant 0 : index
    %128 = vector.load %arg7[%c0_147, %c0_148] : memref<64x8xf32, #tpu.memory_space<vmem>>, vector<64x8xf32>
    %129 = vector.shape_cast %127 : vector<8x8x8xbf16> to vector<64x8xbf16>
    %c4_149 = arith.constant 4 : index
    %c0_150 = arith.constant 0 : index
    %c0_151 = arith.constant 0 : index
    %130 = vector.load %arg4[%c4_149, %c0_150, %c0_151] : memref<9x8x8xbf16, #tpu.memory_space<vmem>>, vector<1x8x8xbf16>
    %131 = vector.shape_cast %130 : vector<1x8x8xbf16> to vector<8x8xbf16>
    %cst_152 = arith.constant dense<0.000000e+00> : vector<64x8xf32>
    %132 = tpu.matmul %129, %131, %cst_152 {dimension_numbers = #tpu.dot_dimension_numbers<[1], [0], [0], [1], [0, 0, 1, 1], [], []>} : vector<64x8xbf16>, vector<8x8xbf16>, vector<64x8xf32> -> vector<64x8xf32>
    %133 = arith.addf %128, %132 : vector<64x8xf32>
    %c0_153 = arith.constant 0 : index
    %c0_154 = arith.constant 0 : index
    %134 = vector.load %arg7[%c0_153, %c0_154] : memref<64x8xf32, #tpu.memory_space<vmem>>, vector<64x8xf32>
    tpu.vector_store %arg7[%c0_153, %c0_154], %133 {strides = array<i32>} : memref<64x8xf32, #tpu.memory_space<vmem>>, vector<64x8xf32>,
    %c1_155 = arith.constant 1 : index
    %c2_156 = arith.constant 2 : index
    %c0_157 = arith.constant 0 : index
    %135 = vector.load %arg8[%c1_155, %c2_156, %c0_157] : memref<10x10x8xbf16, #tpu.memory_space<vmem>>, vector<8x8x8xbf16>
    %c0_158 = arith.constant 0 : index
    %c0_159 = arith.constant 0 : index
    %136 = vector.load %arg7[%c0_158, %c0_159] : memref<64x8xf32, #tpu.memory_space<vmem>>, vector<64x8xf32>
    %137 = vector.shape_cast %135 : vector<8x8x8xbf16> to vector<64x8xbf16>
    %c5_160 = arith.constant 5 : index
    %c0_161 = arith.constant 0 : index
    %c0_162 = arith.constant 0 : index
    %138 = vector.load %arg4[%c5_160, %c0_161, %c0_162] : memref<9x8x8xbf16, #tpu.memory_space<vmem>>, vector<1x8x8xbf16>
    %139 = vector.shape_cast %138 : vector<1x8x8xbf16> to vector<8x8xbf16>
    %cst_163 = arith.constant dense<0.000000e+00> : vector<64x8xf32>
    %140 = tpu.matmul %137, %139, %cst_163 {dimension_numbers = #tpu.dot_dimension_numbers<[1], [0], [0], [1], [0, 0, 1, 1], [], []>} : vector<64x8xbf16>, vector<8x8xbf16>, vector<64x8xf32> -> vector<64x8xf32>
    %141 = arith.addf %136, %140 : vector<64x8xf32>
    %c0_164 = arith.constant 0 : index
    %c0_165 = arith.constant 0 : index
    %142 = vector.load %arg7[%c0_164, %c0_165] : memref<64x8xf32, #tpu.memory_space<vmem>>, vector<64x8xf32>
    tpu.vector_store %arg7[%c0_164, %c0_165], %141 {strides = array<i32>} : memref<64x8xf32, #tpu.memory_space<vmem>>, vector<64x8xf32>,
    %c2_166 = arith.constant 2 : index
    %c0_167 = arith.constant 0 : index
    %c0_168 = arith.constant 0 : index
    %143 = vector.load %arg8[%c2_166, %c0_167, %c0_168] : memref<10x10x8xbf16, #tpu.memory_space<vmem>>, vector<8x8x8xbf16>
    %c0_169 = arith.constant 0 : index
    %c0_170 = arith.constant 0 : index
    %144 = vector.load %arg7[%c0_169, %c0_170] : memref<64x8xf32, #tpu.memory_space<vmem>>, vector<64x8xf32>
    %145 = vector.shape_cast %143 : vector<8x8x8xbf16> to vector<64x8xbf16>
    %c6_171 = arith.constant 6 : index
    %c0_172 = arith.constant 0 : index
    %c0_173 = arith.constant 0 : index
    %146 = vector.load %arg4[%c6_171, %c0_172, %c0_173] : memref<9x8x8xbf16, #tpu.memory_space<vmem>>, vector<1x8x8xbf16>
    %147 = vector.shape_cast %146 : vector<1x8x8xbf16> to vector<8x8xbf16>
    %cst_174 = arith.constant dense<0.000000e+00> : vector<64x8xf32>
    %148 = tpu.matmul %145, %147, %cst_174 {dimension_numbers = #tpu.dot_dimension_numbers<[1], [0], [0], [1], [0, 0, 1, 1], [], []>} : vector<64x8xbf16>, vector<8x8xbf16>, vector<64x8xf32> -> vector<64x8xf32>
    %149 = arith.addf %144, %148 : vector<64x8xf32>
    %c0_175 = arith.constant 0 : index
    %c0_176 = arith.constant 0 : index
    %150 = vector.load %arg7[%c0_175, %c0_176] : memref<64x8xf32, #tpu.memory_space<vmem>>, vector<64x8xf32>
    tpu.vector_store %arg7[%c0_175, %c0_176], %149 {strides = array<i32>} : memref<64x8xf32, #tpu.memory_space<vmem>>, vector<64x8xf32>,
    %c2_177 = arith.constant 2 : index
    %c1_178 = arith.constant 1 : index
    %c0_179 = arith.constant 0 : index
    %151 = vector.load %arg8[%c2_177, %c1_178, %c0_179] : memref<10x10x8xbf16, #tpu.memory_space<vmem>>, vector<8x8x8xbf16>
    %c0_180 = arith.constant 0 : index
    %c0_181 = arith.constant 0 : index
    %152 = vector.load %arg7[%c0_180, %c0_181] : memref<64x8xf32, #tpu.memory_space<vmem>>, vector<64x8xf32>
    %153 = vector.shape_cast %151 : vector<8x8x8xbf16> to vector<64x8xbf16>
    %c7_182 = arith.constant 7 : index
    %c0_183 = arith.constant 0 : index
    %c0_184 = arith.constant 0 : index
    %154 = vector.load %arg4[%c7_182, %c0_183, %c0_184] : memref<9x8x8xbf16, #tpu.memory_space<vmem>>, vector<1x8x8xbf16>
    %155 = vector.shape_cast %154 : vector<1x8x8xbf16> to vector<8x8xbf16>
    %cst_185 = arith.constant dense<0.000000e+00> : vector<64x8xf32>
    %156 = tpu.matmul %153, %155, %cst_185 {dimension_numbers = #tpu.dot_dimension_numbers<[1], [0], [0], [1], [0, 0, 1, 1], [], []>} : vector<64x8xbf16>, vector<8x8xbf16>, vector<64x8xf32> -> vector<64x8xf32>
    %157 = arith.addf %152, %156 : vector<64x8xf32>
    %c0_186 = arith.constant 0 : index
    %c0_187 = arith.constant 0 : index
    %158 = vector.load %arg7[%c0_186, %c0_187] : memref<64x8xf32, #tpu.memory_space<vmem>>, vector<64x8xf32>
    tpu.vector_store %arg7[%c0_186, %c0_187], %157 {strides = array<i32>} : memref<64x8xf32, #tpu.memory_space<vmem>>, vector<64x8xf32>,
    %c2_188 = arith.constant 2 : index
    %c2_189 = arith.constant 2 : index
    %c0_190 = arith.constant 0 : index
    %159 = vector.load %arg8[%c2_188, %c2_189, %c0_190] : memref<10x10x8xbf16, #tpu.memory_space<vmem>>, vector<8x8x8xbf16>
    %c0_191 = arith.constant 0 : index
    %c0_192 = arith.constant 0 : index
    %160 = vector.load %arg7[%c0_191, %c0_192] : memref<64x8xf32, #tpu.memory_space<vmem>>, vector<64x8xf32>
    %161 = vector.shape_cast %159 : vector<8x8x8xbf16> to vector<64x8xbf16>
    %c8_193 = arith.constant 8 : index
    %c0_194 = arith.constant 0 : index
    %c0_195 = arith.constant 0 : index
    %162 = vector.load %arg4[%c8_193, %c0_194, %c0_195] : memref<9x8x8xbf16, #tpu.memory_space<vmem>>, vector<1x8x8xbf16>
    %163 = vector.shape_cast %162 : vector<1x8x8xbf16> to vector<8x8xbf16>
    %cst_196 = arith.constant dense<0.000000e+00> : vector<64x8xf32>
    %164 = tpu.matmul %161, %163, %cst_196 {dimension_numbers = #tpu.dot_dimension_numbers<[1], [0], [0], [1], [0, 0, 1, 1], [], []>} : vector<64x8xbf16>, vector<8x8xbf16>, vector<64x8xf32> -> vector<64x8xf32>
    %165 = arith.addf %160, %164 : vector<64x8xf32>
    %c0_197 = arith.constant 0 : index
    %c0_198 = arith.constant 0 : index
    %166 = vector.load %arg7[%c0_197, %c0_198] : memref<64x8xf32, #tpu.memory_space<vmem>>, vector<64x8xf32>
    tpu.vector_store %arg7[%c0_197, %c0_198], %165 {strides = array<i32>} : memref<64x8xf32, #tpu.memory_space<vmem>>, vector<64x8xf32>,
    %167 = vector.extract_strided_slice %41 {offsets = [0, 0, 0], sizes = [8, 8, 4], strides = [1, 1, 1]} : vector<9x9x4xbf16> to vector<8x8x4xbf16>
    %c0_199 = arith.constant 0 : index
    %c0_200 = arith.constant 0 : index
    %168 = vector.load %arg7[%c0_199, %c0_200] : memref<64x8xf32, #tpu.memory_space<vmem>>, vector<64x4xf32>
    %169 = vector.shape_cast %167 : vector<8x8x4xbf16> to vector<64x4xbf16>
    %170 = arith.extf %169 : vector<64x4xbf16> to vector<64x4xf32>
    %171 = arith.addf %168, %170 : vector<64x4xf32>
    %c0_201 = arith.constant 0 : index
    %c0_202 = arith.constant 0 : index
    %172 = vector.load %arg7[%c0_201, %c0_202] : memref<64x8xf32, #tpu.memory_space<vmem>>, vector<64x4xf32>
    tpu.vector_store %arg7[%c0_201, %c0_202], %171 {strides = array<i32>} : memref<64x8xf32, #tpu.memory_space<vmem>>, vector<64x4xf32>,
    %c0_203 = arith.constant 0 : index
    %c0_204 = arith.constant 0 : index
    %173 = vector.load %arg7[%c0_203, %c0_204] : memref<64x8xf32, #tpu.memory_space<vmem>>, vector<64x8xf32>
    %c0_205 = arith.constant 0 : index
    %c0_206 = arith.constant 0 : index
    %174 = vector.load %arg5[%c0_205, %c0_206] : memref<1x8xf32, #tpu.memory_space<vmem>>, vector<1x8xf32>
    %175 = vector.broadcast %174 : vector<1x8xf32> to vector<64x8xf32>
    %176 = arith.addf %173, %175 : vector<64x8xf32>
    %c0_207 = arith.constant 0 : index
    %c0_208 = arith.constant 0 : index
    %c0_209 = arith.constant 0 : index
    %177 = vector.load %arg6[%c0_207, %c0_208, %c0_209] : memref<1x64x8xf32, #tpu.memory_space<vmem>>, vector<1x64x8xf32>
    %178 = vector.shape_cast %177 : vector<1x64x8xf32> to vector<64x8xf32>
    %179 = vector.shape_cast %176 : vector<64x8xf32> to vector<1x64x8xf32>
    tpu.vector_store %arg6[%c0_207, %c0_208, %c0_209], %179 {strides = array<i32>} : memref<1x64x8xf32, #tpu.memory_space<vmem>>, vector<1x64x8xf32>,
    return
  }
  func.func @transform_0(%arg0: i32) -> (i32, i32, i32, i32, i32) {
    %c0_i32 = arith.constant 0 : i32
    %c0_i32_0 = arith.constant 0 : i32
    %c0_i32_1 = arith.constant 0 : i32
    %c0_i32_2 = arith.constant 0 : i32
    %c0_i32_3 = arith.constant 0 : i32
    return %arg0, %c0_i32, %c0_i32_0, %c0_i32_1, %c0_i32_2 : i32, i32, i32, i32, i32
  }
  func.func @transform_1(%arg0: i32) -> (i32, i32, i32) {
    %c0_i32 = arith.constant 0 : i32
    %c0_i32_0 = arith.constant 0 : i32
    %c0_i32_1 = arith.constant 0 : i32
    %c0_i32_2 = arith.constant 0 : i32
    return %c0_i32, %c0_i32_0, %c0_i32_1 : i32, i32, i32
  }
  func.func @transform_2(%arg0: i32) -> (i32, i32) {
    %c0_i32 = arith.constant 0 : i32
    %c0_i32_0 = arith.constant 0 : i32
    %c0_i32_1 = arith.constant 0 : i32
    return %c0_i32, %c0_i32_0 : i32, i32
  }
  func.func @transform_3(%arg0: i32) -> (i32, i32, i32) {
    %c0_i32 = arith.constant 0 : i32
    %c0_i32_0 = arith.constant 0 : i32
    %c0_i32_1 = arith.constant 0 : i32
    %c0_i32_2 = arith.constant 0 : i32
    return %c0_i32, %c0_i32_0, %c0_i32_1 : i32, i32, i32
  }
  func.func @transform_4(%arg0: i32) -> (i32, i32) {
    %c0_i32 = arith.constant 0 : i32
    %c0_i32_0 = arith.constant 0 : i32
    %c0_i32_1 = arith.constant 0 : i32
    return %c0_i32, %c0_i32_0 : i32, i32
  }
  func.func @transform_5(%arg0: i32) -> (i32, i32, i32) {
    %c0_i32 = arith.constant 0 : i32
    %c0_i32_0 = arith.constant 0 : i32
    %c0_i32_1 = arith.constant 0 : i32
    return %arg0, %c0_i32, %c0_i32_0 : i32, i32, i32
  }
}

</mosaic_0001>

<bundles_post_ra>
// kernel: res_layer_forward.1
= control target key start
LH: loop header
LB: loop body
LE: loop exit
PB: predicated region body
PF: predicated region fallthrough
CT: control target
= control target key end

     0   :  { %s4271_s18 = smov 0   ;;  %s5159_s0 = inlined_call_operand.vmem [shape: bf16[2,4,9,9,4], index: 0, kind: input, shape index: {}]   ;;  %s5160_s1 = inlined_call_operand.vmem [shape: bf16[9,4,8], index: 1, kind: input, shape index: {}]   ;;  %s5161_s2 = inlined_call_operand.vmem [shape: f32[1,8], index: 2, kind: input, shape index: {}]   ;;  %s5162_s3 = inlined_call_operand.vmem [shape: bf16[9,8,8], index: 3, kind: input, shape index: {}]   ;;  %s5163_s4 = inlined_call_operand.vmem [shape: f32[1,8], index: 4, kind: input, shape index: {}]   ;;  %s5164_s5 = inlined_call_operand.vmem [shape: f32[2,64,8], index: 5, kind: output, shape index: {}]  }
   0x1 LB: > { %s3642_s19 = sadd.s32 4294967295, %s4237_s18   ;;  %p3646_p0 = scmp.ge.s32.totalorder %s4237_s18, 1  ;;  %s4237_s18 = sphi %s4271_s18, %s15_s18  }
   0x2   : > { %p187_p1 = scmp.lt.s32.totalorder %s4237_s18, 3 }
   0x4   : > { %p188_p2 = pnand %p3646_p0, %p187_p1 }
   0x5   : > { %p215_p3 = scmp.lt.s32.totalorder (!%p188_p2), %s3642_s19, 1 }
   0x6   : > { %191 = sbr.rel (%p188_p2) target bundleno = 652 (0x28c), region = 40 }
   0xb   : > { %v261_v0 = vld [vmem:[%s5160_s1] sm:$0x3]  ;;  %vm295_vm0 = vcmask 1041408   ;;  %vm226_vm1 = vcmask 64512   ;;  %v3667_v2 = vld [vmem:[%s5160_s1 + $0x2] sm:$0x3] }
   0xc   : > { %4158 = vmatprep.subr.msk.bf16.mxu0 %vm295_vm0, %v261_v0  ;;  %v297_v1 = vsel %vm295_vm0, %v261_v0, 0  ;;  %v3676_v3 = vld [vmem:[%s5160_s1 + $0x4] sm:$0x3]  ;;  %s5174_s19 = smov (!%p215_p3, %s3642_s19), 1  ;;  %4159 = vmatprep.subr.msk.bf16.mxu1 %vm295_vm0, %v3667_v2  ;;  %v433_v4 = vsel %vm295_vm0, %v3667_v2, 0  ;;  %v4239_v6 = vmov 0.0  }
   0xd   : > { %3979 = vmatpush3.bf16.msra.mxu0 %v297_v1  ;;  %v3701_v5 = vld [vmem:[%s5160_s1 + $0x6] sm:$0x3]  ;;  %229 = vst.msk [vmem:[#allocation2 + $0x10] sm:$0xff] %vm226_vm1, %v4239_v6  ;;  %227 = vst.msk [vmem:[#allocation2] sm:$0xff] %vm226_vm1, %v4239_v6  ;;  %3989 = vmatpush3.bf16.msra.mxu1 %v433_v4  ;;  %s4176_s28 = smul.u32 288, %s5174_s19  ;;  %vm282_vm2 = vcmask 31744  }
   0xe   : > { %228 = vst.msk [vmem:[#allocation2 + $0x8] sm:$0xff] %vm226_vm1, %v4239_v6  ;;  %230 = vst.msk [vmem:[#allocation2 + $0x18] sm:$0xff] %vm226_vm1, %v4239_v6  ;;  %4160 = vmatprep.subr.msk.bf16.mxu0 %vm295_vm0, %v3676_v3  ;;  %4161 = vmatprep.subr.msk.bf16.mxu1 %vm295_vm0, %v3701_v5  ;;  %v666_v7 = vsel %vm295_vm0, %v3676_v3, 0  ;;  %v809_v8 = vsel %vm295_vm0, %v3701_v5, 0  ;;  %v3718_v12 = vld [vmem:[%s5160_s1 + $0x8] sm:$0x3] }
   0xf   : > { %231 = vst.msk [vmem:[#allocation2 + $0x20] sm:$0xff] %vm226_vm1, %v4239_v6  ;;  %232 = vst.msk [vmem:[#allocation2 + $0x28] sm:$0xff] %vm226_vm1, %v4239_v6  ;;  %s4319_s6 = scalar_lea.vmem %s5159_s0, %s4176_s28  ;;  %vm524_vm3 = vsmask.f32 3328  ;;  %vm525_vm4 = vsmask.f32 7440 }
  0x10   : > { %233 = vst.msk [vmem:[#allocation2 + $0x30] sm:$0xff] %vm226_vm1, %v4239_v6  ;;  %234 = vst.msk [vmem:[#allocation2 + $0x38] sm:$0xff] %vm226_vm1, %v4239_v6  ;;  %v235_v9 = vld [vmem:[%s4319_s6] sm:$0xf]  ;;  %v4325_v10 = vld [vmem:[%s4319_s6 + $0x8] sm:$0xf] }
  0x11   : > { %v4328_v11 = vld [vmem:[%s4319_s6 + $0x10] sm:$0xf]  ;;  %v3650_v13 = vcombine.low %v235_v9, %v4325_v10  ;;  %v528_v14 = vshrl.u32 %v235_v9, 16  ;;  %v531_v15 = vshll.u32 %v235_v9, 16  ;;  %v542_v16 = vshrl.u32 %v4325_v10, 16  ;;  %vm4418_vm5 = vmor %vm524_vm3, %vm525_vm4  ;;  %s3879_s15 = sshll.u32 %s5174_s19, 6 }
  0x12   : > { %v4336_v17 = vld [vmem:[%s4319_s6 + $0x18] sm:$0xf]  ;;  %v545_v18 = vshll.u32 %v4325_v10, 16  ;;  %v556_v20 = vshrl.u32 %v4328_v11, 16  ;;  %v559_v21 = vshll.u32 %v4328_v11, 16  ;;  %v4359_v37 = vsel %vm295_vm0, %v3718_v12, 0  ;;  %s5130_s21 = scalar_lea.vmem %s5164_s5, %s3879_s15 }
  0x13   : > { %v3651_v19 = vcombine.low %v4328_v11, %v4336_v17  ;;  %v3658_v22 = vld [vmem:[%s4319_s6 + $0x48] sm:$0xf]  ;;  %3980 = vmatprep.mubr.msk.bf16.mxu0 %vm282_vm2, %v3650_v13  ;;  %v530_v23 = vrot.slane %v528_v14, 4  ;;  %v533_v24 = vrot.slane %v531_v15, 5  ;;  %v544_v25 = vrot.slane %v542_v16, 4 }
  0x14   : > { %v570_v26 = vshrl.u32 %v4336_v17, 16  ;;  %v4347_v27 = vld [vmem:[%s4319_s6 + $0x50] sm:$0xf]  ;;  %v547_v28 = vrot.slane %v545_v18, 5  ;;  %v558_v29 = vrot.slane %v556_v20, 4  ;;  %v561_v30 = vrot.slane %v559_v21, 5 }
  0x15   : > { %3981 = vmatmul.mubr.msk.bf16.vlgmr.msra.gmra.mxu0 %vm282_vm2, %v3651_v19  ;;  %v573_v31 = vshll.u32 %v4336_v17, 16  ;;  %v4352_v32 = vld [vmem:[%s4319_s6 + $0x58] sm:$0xf]  ;;  %v534_v33 = vor.u32 %v533_v24, %v530_v23  ;;  %v4355_v35 = vld [vmem:[%s4319_s6 + $0x60] sm:$0xf]  ;;  %v3668_v36 = vcombine.low %v3658_v22, %v4347_v27  ;;  %vm1637_vm6 = vcmask 60416  }
  0x16   : > { %v572_v34 = vrot.slane %v570_v26, 4  ;;  %3999 = vmatpush3.bf16.msra.mxu0 %v666_v7  ;;  %v4364_v38 = vld [vmem:[%s5160_s1 + $0xa] sm:$0x3]  ;;  %v548_v39 = vor.u32 %v547_v28, %v544_v25  ;;  %v562_v40 = vor.u32 %v561_v30, %v558_v29  ;;  %v3669_v42 = vcombine.low %v4352_v32, %v4355_v35  ;;  %v4369_v43 = vld [vmem:[%s4319_s6 + $0x20] sm:$0xf] }
  0x17   : > { %v575_v41 = vrot.slane %v573_v31, 5  ;;  %v4372_v44 = vld [vmem:[%s4319_s6 + $0x28] sm:$0xf]  ;;  %4162 = vmatprep.subr.msk.bf16.mxu0 %vm295_vm0, %v3718_v12  ;;  %3990 = vmatprep.mubr.msk.bf16.mxu1 %vm282_vm2, %v3668_v36  ;;  %v4382_v47 = vld [vmem:[%s4319_s6 + $0x30] sm:$0xf]  ;;  %v535_v49 = vrot.slane %v534_v33, 4 }
  0x18   : > { %v4376_v45 = vld [vmem:[%s4319_s6 + $0x68] sm:$0xf]  ;;  %v3652_v46 = vcombine.low %v4369_v43, %v4372_v44  ;;  %v4385_v48 = vld [vmem:[%s4319_s6 + $0x38] sm:$0xf]  ;;  %v549_v50 = vrot.slane %v548_v39, 4  ;;  %3991 = vmatmul.mubr.msk.bf16.vlgmr.msra.gmra.mxu1 %vm282_vm2, %v3669_v42  ;;  %v584_v52 = vshrl.u32 %v4369_v43, 16 }
  0x19   : > { %v576_v51 = vor.u32 %v575_v41, %v572_v34  ;;  %v4390_v53 = vld [vmem:[%s4319_s6 + $0x70] sm:$0xf]  ;;  %v563_v54 = vrot.slane %v562_v40, 4  ;;  %v587_v55 = vshll.u32 %v4369_v43, 16  ;;  %v3653_v56 = vcombine.low %v4382_v47, %v4385_v48  ;;  %v4397_v57 = vld [vmem:[%s4319_s6 + $0x78] sm:$0xf]  ;;  %4009 = vmatpush3.bf16.msra.mxu1 %v809_v8 }
  0x1a   : > { %3984 = vmatprep.mubr.msk.bf16.mxu0 %vm282_vm2, %v3652_v46  ;;  %v4400_v58 = vld [vmem:[%s4319_s6 + $0x80] sm:$0xf]  ;;  %v598_v60 = vshrl.u32 %v4372_v44, 16  ;;  %v601_v61 = vshll.u32 %v4372_v44, 16  ;;  %v612_v62 = vshrl.u32 %v4382_v47, 16  ;;  %4163 = vmatprep.subr.msk.bf16.mxu1 %vm295_vm0, %v4364_v38  ;;  %v615_v0 = vshll.u32 %v4382_v47, 16 }
  0x1b   : > { %v577_v59 = vrot.slane %v576_v51, 4  ;;  %v236_v63 = vld [vmem:[%s4319_s6 + $0x4] sm:$0x1]  ;;  %v3670_v1 = vcombine.low %v4376_v45, %v4390_v53  ;;  %v238_v2 = vld [vmem:[%s4319_s6 + $0xc] sm:$0x1]  ;;  %v3671_v5 = vcombine.low %v4397_v57, %v4400_v58  ;;  %v586_v18 = vrot.slane %v584_v52, 4 }
  0x1c   : > { %v537_v3 = vshll.u32 %v236_v63, 16  ;;  %v240_v4 = vld [vmem:[%s4319_s6 + $0x14] sm:$0x1]  ;;  %v551_v8 = vshll.u32 %v238_v2, 16  ;;  %v242_v9 = vld [vmem:[%s4319_s6 + $0x1c] sm:$0x1] }
  0x1d   : > { %3985 = vmatmul.mubr.msk.bf16.gmra.mxu0 %vm282_vm2, %v3653_v56  ;;  %v565_v12 = vshll.u32 %v240_v4, 16  ;;  %v244_v13 = vld [vmem:[%s4319_s6 + $0x24] sm:$0x1]  ;;  %3994 = vmatprep.mubr.msk.bf16.mxu1 %vm282_vm2, %v3670_v1  ;;  %v579_v15 = vshll.u32 %v242_v9, 16  ;;  %v246_v16 = vld [vmem:[%s4319_s6 + $0x2c] sm:$0x1] }
  0x1e   : > { %v539_v14 = vrot.slane %v537_v3, 5  ;;  %v589_v19 = vrot.slane %v587_v55, 5  ;;  %v553_v20 = vrot.slane %v551_v8, 5  ;;  %v593_v22 = vshll.u32 %v244_v13, 16  ;;  %v3685_v29 = vld [vmem:[%s4319_s6 + $0x90] sm:$0xf] }
  0x1f   : > { %v567_v21 = vrot.slane %v565_v12, 5  ;;  %v600_v23 = vrot.slane %v598_v60, 4  ;;  %v581_v25 = vrot.slane %v579_v15, 5  ;;  %v603_v28 = vrot.slane %v601_v61, 5  ;;  %v3687_v30 = vld [vmem:[%s4319_s6 + $0x98] sm:$0xf] }
  0x20   : > { %v540_v24 = vsel %vm4418_vm5, %v535_v49, %v539_v14  ;;  %v590_v26 = vor.u32 %v589_v19, %v586_v18  ;;  %3995 = vmatmul.mubr.msk.bf16.gmra.mxu1 %vm282_vm2, %v3671_v5  ;;  %v4433_v31 = vsel %vm4418_vm5, %v549_v50, %v553_v20  ;;  %v595_v34 = vrot.slane %v593_v22, 5  ;;  %v248_v52 = vld [vmem:[%s4319_s6 + $0x34] sm:$0x1]  ;;  %v250_v60 = vld [vmem:[%s4319_s6 + $0x3c] sm:$0x1] }
  0x21   : > { %v4437_v33 = vsel %vm4418_vm5, %v563_v54, %v567_v21  ;;  %v607_v36 = vshll.u32 %v246_v16, 16  ;;  %v3677_v39 = vcombine.low %v540_v24, %v4433_v31  ;;  %v4442_v40 = vsel %vm4418_vm5, %v577_v59, %v581_v25  ;;  %v3736_v54 = vld [vmem:[%s5160_s1 + $0xc] sm:$0x3]  ;;  %v3689_v61 = vld [vmem:[%s4319_s6 + $0xa0] sm:$0xf] }
  0x22   : > { %v591_v41 = vrot.slane %v590_v26, 4  ;;  %v604_v42 = vor.u32 %v603_v28, %v600_v23  ;;  %v626_v46 = vshrl.u32 %v4385_v48, 16  ;;  %v3678_v49 = vcombine.low %v4437_v33, %v4442_v40  ;;  %v3691_v3 = vld [vmem:[%s4319_s6 + $0xa8] sm:$0xf]  ;;  %v3693_v19 = vld [vmem:[%s4319_s6 + $0xb0] sm:$0xf] }
  0x23   : > { %v609_v50 = vrot.slane %v607_v36, 5  ;;  %v3702_v51 = vcombine.low %v3685_v29, %v3687_v30  ;;  %v629_v55 = vshll.u32 %v4385_v48, 16  ;;  %4000 = vmatprep.mubr.msk.bf16.mxu0 %vm282_vm2, %v3677_v39  ;;  %v1036_v63 = vshrl.u32 %v3685_v29, 16  ;;  %v3695_v20 = vld [vmem:[%s4319_s6 + $0xb8] sm:$0xf] }
  0x24   : > { %v4455_v56 = vsel %vm4418_vm5, %v591_v41, %v595_v34  ;;  %v605_v59 = vrot.slane %v604_v42, 4  ;;  %v1039_v1 = vshll.u32 %v3685_v29, 16  ;;  %v614_v2 = vrot.slane %v612_v62, 4  ;;  %v3745_v62 = vld [vmem:[%s5160_s1 + $0xe] sm:$0x3] }
  0x25   : > { %4001 = vmatmul.mubr.msk.bf16.vlgmr.msra.gmra.mxu0 %vm282_vm2, %v3678_v49  ;;  %4010 = vmatprep.mubr.msk.bf16.mxu1 %vm282_vm2, %v3702_v51  ;;  %v1174_v4 = vsel %vm295_vm0, %v4364_v38, 0  ;;  %v1050_v8 = vshrl.u32 %v3687_v30, 16  ;;  %v617_v9 = vrot.slane %v615_v0, 5  ;;  %v4470_v12 = vsel %vm295_vm0, %v3736_v54, 0  ;;  %v3699_v42 = vld [vmem:[%s4319_s6 + $0xc8] sm:$0xf] }
  0x26   : > { %v4466_v5 = vsel %vm4418_vm5, %v605_v59, %v609_v50  ;;  %4019 = vmatpush3.bf16.msra.mxu0 %v4359_v37  ;;  %v1053_v13 = vshll.u32 %v3687_v30, 16  ;;  %v621_v14 = vshll.u32 %v248_v52, 16  ;;  %v628_v15 = vrot.slane %v626_v46, 4  ;;  %v3697_v30 = vld [vmem:[%s4319_s6 + $0xc0] sm:$0xf] }
  0x27   : > { %v3679_v38 = vcombine.low %v4455_v56, %v4466_v5  ;;  %4164 = vmatprep.subr.msk.bf16.mxu0 %vm295_vm0, %v3736_v54  ;;  %v618_v16 = vor.u32 %v617_v9, %v614_v2  ;;  %v631_v0 = vrot.slane %v629_v55, 5  ;;  %v635_v18 = vshll.u32 %v250_v60, 16  ;;  %v3710_v52 = vld [vmem:[%s4319_s6 + $0xd8] sm:$0xf] }
  0x28   : > { %v3703_v37 = vcombine.low %v3689_v61, %v3691_v3  ;;  %v4481_v21 = vrot.slane %v1036_v63, 4  ;;  %v4483_v22 = vrot.slane %v1039_v1, 5  ;;  %v623_v23 = vrot.slane %v621_v14, 5  ;;  %v3715_v14 = vld [vmem:[%s4319_s6 + $0x100] sm:$0xf] }
  0x29   : > { %4004 = vmatprep.mubr.msk.bf16.mxu0 %vm282_vm2, %v3679_v38  ;;  %v4486_v24 = vsel %vm295_vm0, %v3745_v62, 0  ;;  %v4488_v25 = vrot.slane %v1050_v8, 4  ;;  %v619_v26 = vrot.slane %v618_v16, 4  ;;  %v632_v28 = vor.u32 %v631_v0, %v628_v15  ;;  %v3713_v8 = vld [vmem:[%s4319_s6 + $0xf0] sm:$0xf] }
  0x2a   : > { %v637_v29 = vrot.slane %v635_v18, 5  ;;  %4011 = vmatmul.mubr.msk.bf16.vlgmr.msra.gmra.mxu1 %vm282_vm2, %v3703_v37  ;;  %v1055_v34 = vrot.slane %v1053_v13, 5  ;;  %v1064_v36 = vshrl.u32 %v3689_v61, 16  ;;  %v1067_v39 = vshll.u32 %v3689_v61, 16  ;;  %v3711_v61 = vld [vmem:[%s4319_s6 + $0xe0] sm:$0xf] }
  0x2b   : > { %v3704_v41 = vcombine.low %v3693_v19, %v3695_v20  ;;  %4029 = vmatpush3.bf16.msra.mxu1 %v1174_v4  ;;  %v4495_v46 = vsel %vm4418_vm5, %v619_v26, %v623_v23  ;;  %v633_v49 = vrot.slane %v632_v28, 4  ;;  %v1078_v50 = vshrl.u32 %v3691_v3, 16  ;;  %v3712_v4 = vld [vmem:[%s4319_s6 + $0xe8] sm:$0xf]  ;;  %v3714_v13 = vld [vmem:[%s4319_s6 + $0xf8] sm:$0xf] }
  0x2c   : > { %v1081_v51 = vshll.u32 %v3691_v3, 16  ;;  %4165 = vmatprep.subr.msk.bf16.mxu1 %vm295_vm0, %v3745_v62  ;;  %v1092_v54 = vshrl.u32 %v3693_v19, 16  ;;  %v1095_v55 = vshll.u32 %v3693_v19, 16  ;;  %v1106_v59 = vshrl.u32 %v3695_v20, 16  ;;  %v3686_v37 = vld [vmem:[%s4319_s6 + $0x94] sm:$0x1] }
  0x2d   : > { %4014 = vmatprep.mubr.msk.bf16.mxu1 %vm282_vm2, %v3704_v41  ;;  %v1109_v60 = vshll.u32 %v3695_v20, 16  ;;  %v4503_v63 = vsel %vm4418_vm5, %v633_v49, %v637_v29  ;;  %v3705_v1 = vcombine.low %v3697_v30, %v3699_v42  ;;  %v1120_v2 = vshrl.u32 %v3697_v30, 16  ;;  %v3688_v26 = vld [vmem:[%s4319_s6 + $0x9c] sm:$0x1]  ;;  %v3690_v28 = vld [vmem:[%s4319_s6 + $0xa4] sm:$0x1] }
  0x2e   : > { %v1123_v3 = vshll.u32 %v3697_v30, 16  ;;  %v3680_v9 = vcombine.low %v4495_v46, %v4503_v63  ;;  %v1066_v62 = vrot.slane %v1064_v36, 4  ;;  %v1069_v38 = vrot.slane %v1067_v39, 5  ;;  %v3692_v41 = vld [vmem:[%s4319_s6 + $0xac] sm:$0x1] }
  0x2f   : > { %v1080_v15 = vrot.slane %v1078_v50, 4  ;;  %v1083_v16 = vrot.slane %v1081_v51, 5  ;;  %v1134_v0 = vshrl.u32 %v3699_v42, 16  ;;  %v1137_v18 = vshll.u32 %v3699_v42, 16 }
  0x30   : > { %4005 = vmatmul.mubr.msk.bf16.gmra.mxu0 %vm282_vm2, %v3680_v9  ;;  %v1094_v19 = vrot.slane %v1092_v54, 4  ;;  %v1097_v20 = vrot.slane %v1095_v55, 5  ;;  %v3719_v23 = vcombine.low %v3710_v52, %v3711_v61  ;;  %v1108_v29 = vrot.slane %v1106_v59, 4 }
  0x31   : > { %v1111_v30 = vrot.slane %v1109_v60, 5  ;;  %v1122_v36 = vrot.slane %v1120_v2, 4  ;;  %v1125_v39 = vrot.slane %v1123_v3, 5  ;;  %v1136_v49 = vrot.slane %v1134_v0, 4  ;;  %v3694_v3 = vld [vmem:[%s4319_s6 + $0xb4] sm:$0x1] }
  0x32   : > { %4015 = vmatmul.mubr.msk.bf16.gmra.mxu1 %vm282_vm2, %v3705_v1  ;;  %v1139_v50 = vrot.slane %v1137_v18, 5  ;;  %4020 = vmatprep.mubr.msk.bf16.mxu0 %vm282_vm2, %v3719_v23  ;;  %v3720_v42 = vcombine.low %v3712_v4, %v3713_v8  ;;  %v3721_v51 = vcombine.low %v3714_v13, %v3715_v14  ;;  %v1042_v54 = vor.u32 %v4483_v22, %v4481_v21  ;;  %v3696_v14 = vld [vmem:[%s4319_s6 + $0xbc] sm:$0x1] }
  0x33   : > { %v1045_v52 = vshll.u32 %v3686_v37, 16  ;;  %v1056_v55 = vor.u32 %v1055_v34, %v4488_v25  ;;  %v1059_v59 = vshll.u32 %v3688_v26, 16  ;;  %v1070_v60 = vor.u32 %v1069_v38, %v1066_v62  ;;  %v3716_v37 = vld [vmem:[%s4319_s6 + $0x108] sm:$0xf] }
  0x34   : > { %v1073_v61 = vshll.u32 %v3690_v28, 16  ;;  %v1084_v1 = vor.u32 %v1083_v16, %v1080_v15  ;;  %v1087_v2 = vshll.u32 %v3692_v41, 16  ;;  %v1043_v9 = vrot.slane %v1042_v54, 4  ;;  %v3698_v15 = vld [vmem:[%s4319_s6 + $0xc4] sm:$0x1] }
  0x35   : > { %v1047_v0 = vrot.slane %v1045_v52, 5  ;;  %v1057_v18 = vrot.slane %v1056_v55, 4  ;;  %v1061_v4 = vrot.slane %v1059_v59, 5  ;;  %v1071_v8 = vrot.slane %v1070_v60, 4  ;;  %v3754_v16 = vld [vmem:[%s5160_s1 + $0x10] sm:$0x3] }
  0x36   : > { %v1075_v13 = vrot.slane %v1073_v61, 5  ;;  %v1085_v21 = vrot.slane %v1084_v1, 4  ;;  %v1089_v22 = vrot.slane %v1087_v2, 5  ;;  %v1098_v62 = vor.u32 %v1097_v20, %v1094_v19  ;;  %v3700_v54 = vld [vmem:[%s4319_s6 + $0xcc] sm:$0x1] }
  0x37   : > { %v1048_v25 = vsel %vm4418_vm5, %v1043_v9, %v1047_v0  ;;  %v1062_v34 = vsel %vm4418_vm5, %v1057_v18, %v1061_v4  ;;  %v1101_v38 = vshll.u32 %v3694_v3, 16  ;;  %v1112_v41 = vor.u32 %v1111_v30, %v1108_v29  ;;  %v3717_v19 = vld [vmem:[%s4319_s6 + $0x110] sm:$0xf] }
  0x38   : > { %4021 = vmatmul.mubr.msk.bf16.vlgmr.msra.gmra.mxu0 %vm282_vm2, %v3720_v42  ;;  %v3728_v23 = vcombine.low %v1048_v25, %v1062_v34  ;;  %v1076_v26 = vsel %vm4418_vm5, %v1071_v8, %v1075_v13  ;;  %v1090_v28 = vsel %vm4418_vm5, %v1085_v21, %v1089_v22  ;;  %v1099_v52 = vrot.slane %v1098_v62, 4  ;;  %v251_v8 = vld [vmem:[%s4319_s6 + $0x40] sm:$0xf]  ;;  %v252_v22 = vld [vmem:[%s4319_s6 + $0x44] sm:$0x1] }
  0x39   : > { %4024 = vmatprep.mubr.msk.bf16.mxu0 %vm282_vm2, %v3721_v51  ;;  %v3729_v20 = vcombine.low %v1076_v26, %v1090_v28  ;;  %4039 = vmatpush3.bf16.msra.mxu0 %v4470_v12  ;;  %v1103_v55 = vrot.slane %v1101_v38, 5  ;;  %v1115_v59 = vshll.u32 %v3696_v14, 16  ;;  %v1113_v42 = vrot.slane %v1112_v41, 4  ;;  %v255_v38 = vld [vmem:[#allocation2 + $0x10] sm:$0xff]  ;;  %v256_v26 = vld [vmem:[#allocation2 + $0x18] sm:$0xff] }
  0x3a   : > { %4030 = vmatprep.mubr.msk.bf16.mxu1 %vm282_vm2, %v3728_v23  ;;  %v1126_v60 = vor.u32 %v1125_v39, %v1122_v36  ;;  %v1129_v61 = vshll.u32 %v3698_v15, 16  ;;  %v1140_v1 = vor.u32 %v1139_v50, %v1136_v49  ;;  %4166 = vmatprep.subr.msk.bf16.mxu0 %vm295_vm0, %v3754_v16  ;;  %v1143_v51 = vshll.u32 %v3700_v54, 16 }
  0x3b   : > { %4031 = vmatmul.mubr.msk.bf16.vlgmr.msra.gmra.mxu1 %vm282_vm2, %v3729_v20  ;;  %v1104_v29 = vsel %vm4418_vm5, %v1099_v52, %v1103_v55  ;;  %v1117_v30 = vrot.slane %v1115_v59, 5  ;;  %v3722_v2 = vcombine.low %v3716_v37, %v3717_v19  ;;  %v3737_v49 = vcombine.low %v4325_v10, %v4328_v11  ;;  %v254_v19 = vld [vmem:[#allocation2 + $0x8] sm:$0xff]  ;;  %v259_v59 = vld [vmem:[#allocation2 + $0x30] sm:$0xff] }
  0x3c   : > { %v1127_v12 = vrot.slane %v1126_v60, 4  ;;  %v1131_v3 = vrot.slane %v1129_v61, 5  ;;  %v1141_v9 = vrot.slane %v1140_v1, 4  ;;  %4049 = vmatpush3.bf16.msra.mxu1 %v4486_v24  ;;  %v1145_v39 = vrot.slane %v1143_v51, 5  ;;  %v257_v1 = vld [vmem:[#allocation2 + $0x20] sm:$0xff] }
  0x3d   : > { %v1118_v36 = vsel %vm4418_vm5, %v1113_v42, %v1117_v30  ;;  %v3746_v4 = vcombine.low %v4347_v27, %v4352_v32  ;;  %v3738_v10 = vcombine.low %v4336_v17, %v4369_v43  ;;  %v3739_v11 = vcombine.low %v4372_v44, %v4382_v47  ;;  %v3666_v47 = vld [vmem:[%s4319_s6 + $0x88] sm:$0xf]  ;;  %v4639_v30 = vld [vmem:[%s5162_s3 + $0xc] sm:$0xf] }
  0x3e   : > { %v3730_v50 = vcombine.low %v1104_v29, %v1118_v36  ;;  %v1132_v0 = vsel %vm4418_vm5, %v1127_v12, %v1131_v3  ;;  %v1146_v18 = vsel %vm4418_vm5, %v1141_v9, %v1145_v39  ;;  %v1523_v27 = vsel %vm295_vm0, %v3754_v16, 0  ;;  %v253_v16 = vld [vmem:[#allocation2] sm:$0xff]  ;;  %v260_v3 = vld [vmem:[#allocation2 + $0x38] sm:$0xff] }
  0x3f   : > { %v3731_v24 = vcombine.low %v1132_v0, %v1146_v18  ;;  %v3747_v32 = vcombine.low %v4355_v35, %v4376_v45  ;;  %v3748_v13 = vcombine.low %v4390_v53, %v4397_v57  ;;  %v1490_v17 = vshrl.u32 %v251_v8, 16  ;;  %v258_v0 = vld [vmem:[#allocation2 + $0x28] sm:$0xff] }
  0x40   : > { %4025 = vmatmul.mubr.msk.bf16.gmra.mxu0 %vm282_vm2, %v3722_v2  ;;  %4034 = vmatprep.mubr.msk.bf16.mxu1 %vm282_vm2, %v3730_v50  ;;  %v1493_v43 = vshll.u32 %v251_v8, 16  ;;  %v3740_v44 = vcombine.low %v4385_v48, %v251_v8  ;;  %v3755_v45 = vcombine.low %v4433_v31, %v4437_v33  ;;  %v3749_v53 = vcombine.low %v4400_v58, %v3666_v47 }
  0x41   : > { %4040 = vmatprep.mubr.msk.bf16.mxu0 %vm282_vm2, %v3737_v49  ;;  %v1492_v21 = vrot.slane %v1490_v17, 4  ;;  %v1499_v14 = vshll.u32 %v252_v22, 16  ;;  %v3756_v48 = vcombine.low %v4442_v40, %v4455_v56  ;;  %v3757_v25 = vcombine.low %v4466_v5, %v4495_v46  ;;  %v1850_v40 = vld [vmem:[%s5162_s3] sm:$0xf]  ;;  %v3780_v56 = vld [vmem:[%s5162_s3 + $0x4] sm:$0xf] }
  0x42   : > { %v1495_v35 = vrot.slane %v1493_v43, 5  ;;  %vm1639_vm7 = vcmask 57344   ;;  %v4240_v33 = vmov 0   ;;  %vm1883_vm8 = vcmask 1043456  }
  0x43   : > { %4035 = vmatmul.mubr.msk.bf16.gmra.mxu1 %vm282_vm2, %v3731_v24  ;;  %v1501_v62 = vrot.slane %v1499_v14, 5  ;;  %1645 = vst.msk [vmem:[#allocation3 + $0x18] sm:$0xf] %vm1637_vm6, %v4240_v33  ;;  %1638 = vst.msk [vmem:[#allocation3] sm:$0xf] %vm1637_vm6, %v4240_v33  ;;  %4167 = vmatprep.subr.msk.bf16.mxu1 %vm1883_vm8, %v1850_v40  ;;  %v1885_v5 = vsel %vm1883_vm8, %v1850_v40, 0 }
  0x44   : > { %4050 = vmatprep.mubr.msk.bf16.mxu1 %vm282_vm2, %v3746_v4  ;;  %v1496_v57 = vor.u32 %v1495_v35, %v1492_v21  ;;  %1646 = vst.msk [vmem:[#allocation3 + $0x1c] sm:$0x1] %vm1639_vm7, %v4240_v33  ;;  %1640 = vst.msk [vmem:[#allocation3 + $0x4] sm:$0x1] %vm1639_vm7, %v4240_v33  ;;  %v2131_v46 = vsel %vm1883_vm8, %v3780_v56, 0  ;;  %vm2254_vm13 = vcmask 1042432  }
  0x45   : > { %1641 = vst.msk [vmem:[#allocation3 + $0x8] sm:$0xf] %vm1637_vm6, %v4240_v33  ;;  %1643 = vst.msk [vmem:[#allocation3 + $0x10] sm:$0xf] %vm1637_vm6, %v4240_v33  ;;  %vm1773_vm9 = vsmask.f32 7938 }
  0x46   : > { %v1497_v34 = vrot.slane %v1496_v57, 4  ;;  %1642 = vst.msk [vmem:[#allocation3 + $0xc] sm:$0x1] %vm1639_vm7, %v4240_v33  ;;  %1644 = vst.msk [vmem:[#allocation3 + $0x14] sm:$0x1] %vm1639_vm7, %v4240_v33  ;;  %vm2255_vm14 = vcmask 1046532  }
  0x47   : > { %1647 = vst.msk [vmem:[#allocation3 + $0x20] sm:$0xf] %vm1637_vm6, %v4240_v33  ;;  %1649 = vst.msk [vmem:[#allocation3 + $0x28] sm:$0xf] %vm1637_vm6, %v4240_v33  ;;  %vm1779_vm10 = vsmask.f32 256 }
  0x48   : > { %4041 = vmatmul.mubr.msk.bf16.vlgmr.msra.gmra.mxu0 %vm282_vm2, %v3738_v10  ;;  %v1502_v58 = vsel %vm4418_vm5, %v1497_v34, %v1501_v62  ;;  %1648 = vst.msk [vmem:[#allocation3 + $0x24] sm:$0x1] %vm1639_vm7, %v4240_v33  ;;  %1650 = vst.msk [vmem:[#allocation3 + $0x2c] sm:$0x1] %vm1639_vm7, %v4240_v33 }
  0x49   : > { %4044 = vmatprep.mubr.msk.bf16.mxu0 %vm282_vm2, %v3739_v11  ;;  %4059 = vmatpush3.bf16.msra.mxu0 %v1523_v27  ;;  %v3758_v31 = vcombine.low %v4503_v63, %v1502_v58  ;;  %1651 = vst.msk [vmem:[#allocation3 + $0x30] sm:$0xf] %vm1637_vm6, %v4240_v33  ;;  %1653 = vst.msk [vmem:[#allocation3 + $0x38] sm:$0xf] %vm1637_vm6, %v4240_v33  ;;  %v4628_v63 = vld [vmem:[%s5162_s3 + $0x8] sm:$0xf] }
  0x4a   : > { %1652 = vst.msk [vmem:[#allocation3 + $0x34] sm:$0x1] %vm1639_vm7, %v4240_v33  ;;  %1654 = vst.msk [vmem:[#allocation3 + $0x3c] sm:$0x1] %vm1639_vm7, %v4240_v33  ;;  %4168 = vmatprep.subr.msk.bf16.mxu0 %vm1883_vm8, %v3780_v56 }
  0x4b   : > { %4051 = vmatmul.mubr.msk.bf16.vlgmr.msra.gmra.mxu1 %vm282_vm2, %v3747_v32  ;;  %1655 = vst.msk [vmem:[#allocation3 + $0x40] sm:$0xf] %vm1637_vm6, %v4240_v33  ;;  %1657 = vst.msk [vmem:[#allocation3 + $0x48] sm:$0xf] %vm1637_vm6, %v4240_v33 }
  0x4c   : > { %4054 = vmatprep.mubr.msk.bf16.mxu1 %vm282_vm2, %v3748_v13  ;;  %1656 = vst.msk [vmem:[#allocation3 + $0x44] sm:$0x1] %vm1639_vm7, %v4240_v33  ;;  %1658 = vst.msk [vmem:[#allocation3 + $0x4c] sm:$0x1] %vm1639_vm7, %v4240_v33  ;;  %4069 = vmatpush3.bf16.msra.mxu1 %v1885_v5 }
  0x4d   : > { %4169 = vmatprep.subr.msk.bf16.mxu1 %vm1883_vm8, %v4628_v63  ;;  %vm4797_vm11 = vmand %vm1637_vm6, %vm1773_vm9 }
  0x4e   : > { %vm4805_vm12 = vmand %vm1639_vm7, %vm1779_vm10 }
  0x4f   : > { %vm4875_vm15 = vmor %vm2254_vm13, %vm2255_vm14 }
  0x50   : > { %4045 = vmatmul.mubr.msk.bf16.gmra.mxu0 %vm282_vm2, %v3740_v44 }
  0x51   : > { %4060 = vmatprep.mubr.msk.bf16.mxu0 %vm282_vm2, %v3755_v45 }
  0x53   : > { %4055 = vmatmul.mubr.msk.bf16.gmra.mxu1 %vm282_vm2, %v3749_v53 }
  0x58   : > { %4061 = vmatmul.mubr.msk.bf16.vlgmr.msra.gmra.mxu0 %vm282_vm2, %v3756_v48 }
  0x59   : > { %4064 = vmatprep.mubr.msk.bf16.mxu0 %vm282_vm2, %v3757_v25  ;;  %4079 = vmatpush3.bf16.msra.mxu0 %v2131_v46 }
  0x5a   : > { %4170 = vmatprep.subr.msk.bf16.mxu0 %vm1883_vm8, %v4639_v30 }
  0x60   : > { %4065 = vmatmul.mubr.msk.bf16.gmra.mxu0 %vm282_vm2, %v3758_v31 }
  0xd5   : > { %v3982_v15 = vpop.f32.mrf.mxu0 }
  0xd6   : > { %v366_v37 = vadd.f32 %v3982_v15, %v255_v38 }
  0xd7   : > { %v333_v23 = vpop.f32.mrf.mxu0 }
  0xd8   : > { %374 = vst.msk [vmem:[#allocation2 + $0x10] sm:$0xff] %vm226_vm1, %v366_v37  ;;  %v364_v28 = vadd.f32 %v333_v23, %v253_v16  ;;  %v3992_v54 = vpop.f32.mrf.mxu1 }
  0xd9   : > { %v3983_v41 = vpop.f32.mrf.mxu0 }
  0xda   : > { %372 = vst.msk [vmem:[#allocation2] sm:$0xff] %vm226_vm1, %v364_v28  ;;  %v367_v20 = vadd.f32 %v3983_v41, %v256_v26  ;;  %v469_v55 = vpop.f32.mrf.mxu1 }
  0xdb   : > { %v336_v52 = vpop.f32.mrf.mxu0 }
  0xdc   : > { %375 = vst.msk [vmem:[#allocation2 + $0x18] sm:$0xff] %vm226_vm1, %v367_v20  ;;  %v365_v42 = vadd.f32 %v336_v52, %v254_v19  ;;  %v3993_v61 = vpop.f32.mrf.mxu1 }
  0xdd   : > { %v3986_v60 = vpop.f32.mrf.mxu0 }
  0xde   : > { %373 = vst.msk [vmem:[#allocation2 + $0x8] sm:$0xff] %vm226_vm1, %v365_v42  ;;  %v370_v29 = vadd.f32 %v3986_v60, %v259_v59  ;;  %v472_v12 = vpop.f32.mrf.mxu1 }
  0xdf   : > { %v392_v51 = vld [vmem:[#allocation2 + $0x10] sm:$0xff]  ;;  %v349_v2 = vpop.f32.mrf.mxu0 }
  0xe0   : > { %v502_v9 = vadd.f32 %v3992_v54, %v392_v51  ;;  %378 = vst.msk [vmem:[#allocation2 + $0x30] sm:$0xff] %vm226_vm1, %v370_v29  ;;  %v368_v36 = vadd.f32 %v349_v2, %v257_v1  ;;  %v3996_v50 = vpop.f32.mrf.mxu1 }
  0xe1   : > { %v390_v39 = vld [vmem:[#allocation2] sm:$0xff]  ;;  %v3987_v49 = vpop.f32.mrf.mxu0 }
  0xe2   : > { %510 = vst.msk [vmem:[#allocation2 + $0x10] sm:$0xff] %vm226_vm1, %v502_v9  ;;  %v500_v18 = vadd.f32 %v469_v55, %v390_v39  ;;  %376 = vst.msk [vmem:[#allocation2 + $0x20] sm:$0xff] %vm226_vm1, %v368_v36  ;;  %v371_v4 = vadd.f32 %v3987_v49, %v260_v3  ;;  %v485_v11 = vpop.f32.mrf.mxu1 }
  0xe3   : > { %v393_v24 = vld [vmem:[#allocation2 + $0x18] sm:$0xff]  ;;  %v352_v10 = vpop.f32.mrf.mxu0 }
  0xe4   : > { %508 = vst.msk [vmem:[#allocation2] sm:$0xff] %vm226_vm1, %v500_v18  ;;  %v503_v27 = vadd.f32 %v3993_v61, %v393_v24  ;;  %379 = vst.msk [vmem:[#allocation2 + $0x38] sm:$0xff] %vm226_vm1, %v371_v4  ;;  %v369_v32 = vadd.f32 %v352_v10, %v258_v0  ;;  %v3997_v13 = vpop.f32.mrf.mxu1 }
  0xe5   : > { %v391_v8 = vld [vmem:[#allocation2 + $0x8] sm:$0xff]  ;;  %v4002_v17 = vpop.f32.mrf.mxu0 }
  0xe6   : > { %511 = vst.msk [vmem:[#allocation2 + $0x18] sm:$0xff] %vm226_vm1, %v503_v27  ;;  %v501_v43 = vadd.f32 %v472_v12, %v391_v8  ;;  %377 = vst.msk [vmem:[#allocation2 + $0x28] sm:$0xff] %vm226_vm1, %v369_v32  ;;  %v488_v35 = vpop.f32.mrf.mxu1 }
  0xe7   : > { %v396_v44 = vld [vmem:[#allocation2 + $0x30] sm:$0xff]  ;;  %v702_v47 = vpop.f32.mrf.mxu0 }
  0xe8   : > { %509 = vst.msk [vmem:[#allocation2 + $0x8] sm:$0xff] %vm226_vm1, %v501_v43  ;;  %v506_v21 = vadd.f32 %v3996_v50, %v396_v44 }
  0xe9   : > { %v394_v45 = vld [vmem:[#allocation2 + $0x20] sm:$0xff]  ;;  %v518_v22 = vld [vmem:[#allocation2 + $0x10] sm:$0xff]  ;;  %v4003_v53 = vpop.f32.mrf.mxu0 }
  0xea   : > { %514 = vst.msk [vmem:[#allocation2 + $0x30] sm:$0xff] %vm226_vm1, %v506_v21  ;;  %v504_v57 = vadd.f32 %v485_v11, %v394_v45  ;;  %v735_v14 = vadd.f32 %v4002_v17, %v518_v22  ;;  %v4012_v48 = vpop.f32.mrf.mxu1 }
  0xeb   : > { %v397_v25 = vld [vmem:[#allocation2 + $0x38] sm:$0xff]  ;;  %v516_v34 = vld [vmem:[#allocation2] sm:$0xff]  ;;  %v705_v56 = vpop.f32.mrf.mxu0 }
  0xec   : > { %512 = vst.msk [vmem:[#allocation2 + $0x20] sm:$0xff] %vm226_vm1, %v504_v57  ;;  %v507_v62 = vadd.f32 %v3997_v13, %v397_v25  ;;  %743 = vst.msk [vmem:[#allocation2 + $0x10] sm:$0xff] %vm226_vm1, %v735_v14  ;;  %v733_v58 = vadd.f32 %v702_v47, %v516_v34  ;;  %v845_v31 = vpop.f32.mrf.mxu1 }
  0xed   : > { %v395_v33 = vld [vmem:[#allocation2 + $0x28] sm:$0xff]  ;;  %v519_v40 = vld [vmem:[#allocation2 + $0x18] sm:$0xff] }
  0xee   : > { %515 = vst.msk [vmem:[#allocation2 + $0x38] sm:$0xff] %vm226_vm1, %v507_v62  ;;  %v505_v5 = vadd.f32 %v488_v35, %v395_v33  ;;  %741 = vst.msk [vmem:[#allocation2] sm:$0xff] %vm226_vm1, %v733_v58  ;;  %v736_v46 = vadd.f32 %v4003_v53, %v519_v40  ;;  %v4013_v38 = vpop.f32.mrf.mxu1 }
  0xef   : > { %v517_v15 = vld [vmem:[#allocation2 + $0x8] sm:$0xff] }
  0xf0   : > { %513 = vst.msk [vmem:[#allocation2 + $0x28] sm:$0xff] %vm226_vm1, %v505_v5  ;;  %744 = vst.msk [vmem:[#allocation2 + $0x18] sm:$0xff] %vm226_vm1, %v736_v46  ;;  %v734_v16 = vadd.f32 %v705_v56, %v517_v15  ;;  %v848_v37 = vpop.f32.mrf.mxu1  ;;  %v4006_v26 = vpop.f32.mrf.mxu0 }
  0xf1   : > { %v522_v23 = vld [vmem:[#allocation2 + $0x30] sm:$0xff] }
  0xf2   : > { %742 = vst.msk [vmem:[#allocation2 + $0x8] sm:$0xff] %vm226_vm1, %v734_v16  ;;  %v739_v28 = vadd.f32 %v4006_v26, %v522_v23  ;;  %v4016_v41 = vpop.f32.mrf.mxu1  ;;  %v718_v20 = vpop.f32.mrf.mxu0 }
  0xf3   : > { %v768_v54 = vld [vmem:[#allocation2 + $0x10] sm:$0xff]  ;;  %v520_v19 = vld [vmem:[#allocation2 + $0x20] sm:$0xff] }
  0xf4   : > { %747 = vst.msk [vmem:[#allocation2 + $0x30] sm:$0xff] %vm226_vm1, %v739_v28  ;;  %v878_v52 = vadd.f32 %v4012_v48, %v768_v54  ;;  %v737_v55 = vadd.f32 %v718_v20, %v520_v19  ;;  %v861_v59 = vpop.f32.mrf.mxu1  ;;  %v4007_v61 = vpop.f32.mrf.mxu0 }
  0xf5   : > { %v766_v42 = vld [vmem:[#allocation2] sm:$0xff]  ;;  %v523_v60 = vld [vmem:[#allocation2 + $0x38] sm:$0xff] }
  0xf6   : > { %886 = vst.msk [vmem:[#allocation2 + $0x10] sm:$0xff] %vm226_vm1, %v878_v52  ;;  %745 = vst.msk [vmem:[#allocation2 + $0x20] sm:$0xff] %vm226_vm1, %v737_v55  ;;  %v876_v1 = vadd.f32 %v845_v31, %v766_v42  ;;  %v740_v29 = vadd.f32 %v4007_v61, %v523_v60  ;;  %v4017_v51 = vpop.f32.mrf.mxu1  ;;  %v721_v3 = vpop.f32.mrf.mxu0 }
  0xf7   : > { %v769_v2 = vld [vmem:[#allocation2 + $0x18] sm:$0xff]  ;;  %v521_v12 = vld [vmem:[#allocation2 + $0x28] sm:$0xff] }
  0xf8   : > { %884 = vst.msk [vmem:[#allocation2] sm:$0xff] %vm226_vm1, %v876_v1  ;;  %748 = vst.msk [vmem:[#allocation2 + $0x38] sm:$0xff] %vm226_vm1, %v740_v29  ;;  %v879_v9 = vadd.f32 %v4013_v38, %v769_v2  ;;  %v738_v36 = vadd.f32 %v721_v3, %v521_v12  ;;  %v4022_v49 = vpop.f32.mrf.mxu0  ;;  %v864_v0 = vpop.f32.mrf.mxu1 }
  0xf9   : > { %v767_v39 = vld [vmem:[#allocation2 + $0x8] sm:$0xff] }
  0xfa   : > { %887 = vst.msk [vmem:[#allocation2 + $0x18] sm:$0xff] %vm226_vm1, %v879_v9  ;;  %746 = vst.msk [vmem:[#allocation2 + $0x28] sm:$0xff] %vm226_vm1, %v738_v36  ;;  %v877_v50 = vadd.f32 %v848_v37, %v767_v39  ;;  %v980_v4 = vpop.f32.mrf.mxu0 }
  0xfb   : > { %v772_v18 = vld [vmem:[#allocation2 + $0x30] sm:$0xff]  ;;  %v4032_v10 = vpop.f32.mrf.mxu1 }
  0xfc   : > { %885 = vst.msk [vmem:[#allocation2 + $0x8] sm:$0xff] %vm226_vm1, %v877_v50  ;;  %v882_v24 = vadd.f32 %v4016_v41, %v772_v18  ;;  %v4023_v32 = vpop.f32.mrf.mxu0 }
  0xfd   : > { %v770_v11 = vld [vmem:[#allocation2 + $0x20] sm:$0xff]  ;;  %v903_v27 = vld [vmem:[#allocation2 + $0x10] sm:$0xff]  ;;  %v1210_v17 = vpop.f32.mrf.mxu1 }
  0xfe   : > { %890 = vst.msk [vmem:[#allocation2 + $0x30] sm:$0xff] %vm226_vm1, %v882_v24  ;;  %v880_v8 = vadd.f32 %v861_v59, %v770_v11  ;;  %v1013_v13 = vadd.f32 %v4022_v49, %v903_v27  ;;  %v983_v47 = vpop.f32.mrf.mxu0 }
  0xff   : > { %v773_v43 = vld [vmem:[#allocation2 + $0x38] sm:$0xff]  ;;  %v901_v44 = vld [vmem:[#allocation2] sm:$0xff]  ;;  %v4033_v45 = vpop.f32.mrf.mxu1 }
 0x100   : > { %888 = vst.msk [vmem:[#allocation2 + $0x20] sm:$0xff] %vm226_vm1, %v880_v8  ;;  %1021 = vst.msk [vmem:[#allocation2 + $0x10] sm:$0xff] %vm226_vm1, %v1013_v13  ;;  %v883_v21 = vadd.f32 %v4017_v51, %v773_v43  ;;  %v1011_v35 = vadd.f32 %v980_v4, %v901_v44  ;;  %v4026_v57 = vpop.f32.mrf.mxu0 }
 0x101   : > { %v771_v22 = vld [vmem:[#allocation2 + $0x28] sm:$0xff]  ;;  %v904_v53 = vld [vmem:[#allocation2 + $0x18] sm:$0xff]  ;;  %v1213_v25 = vpop.f32.mrf.mxu1 }
 0x102   : > { %891 = vst.msk [vmem:[#allocation2 + $0x38] sm:$0xff] %vm226_vm1, %v883_v21  ;;  %1019 = vst.msk [vmem:[#allocation2] sm:$0xff] %vm226_vm1, %v1011_v35  ;;  %v881_v14 = vadd.f32 %v864_v0, %v771_v22  ;;  %v1014_v48 = vadd.f32 %v4023_v32, %v904_v53  ;;  %v996_v62 = vpop.f32.mrf.mxu0 }
 0x103   : > { %v902_v34 = vld [vmem:[#allocation2 + $0x8] sm:$0xff]  ;;  %v4036_v31 = vpop.f32.mrf.mxu1 }
 0x104   : > { %889 = vst.msk [vmem:[#allocation2 + $0x28] sm:$0xff] %vm226_vm1, %v881_v14  ;;  %1022 = vst.msk [vmem:[#allocation2 + $0x18] sm:$0xff] %vm226_vm1, %v1014_v48  ;;  %v1012_v58 = vadd.f32 %v983_v47, %v902_v34  ;;  %v4027_v40 = vpop.f32.mrf.mxu0 }
 0x105   : > { %v907_v33 = vld [vmem:[#allocation2 + $0x30] sm:$0xff]  ;;  %v1226_v5 = vpop.f32.mrf.mxu1 }
 0x106   : > { %1020 = vst.msk [vmem:[#allocation2 + $0x8] sm:$0xff] %vm226_vm1, %v1012_v58  ;;  %v1017_v56 = vadd.f32 %v4026_v57, %v907_v33  ;;  %v999_v15 = vpop.f32.mrf.mxu0 }
 0x107   : > { %v905_v46 = vld [vmem:[#allocation2 + $0x20] sm:$0xff]  ;;  %v1029_v38 = vld [vmem:[#allocation2 + $0x10] sm:$0xff]  ;;  %v4037_v23 = vpop.f32.mrf.mxu1 }
 0x108   : > { %1025 = vst.msk [vmem:[#allocation2 + $0x30] sm:$0xff] %vm226_vm1, %v1017_v56  ;;  %v1015_v16 = vadd.f32 %v996_v62, %v905_v46  ;;  %v1243_v37 = vadd.f32 %v4032_v10, %v1029_v38  ;;  %v4042_v41 = vpop.f32.mrf.mxu0 }
 0x109   : > { %v908_v26 = vld [vmem:[#allocation2 + $0x38] sm:$0xff]  ;;  %v1027_v28 = vld [vmem:[#allocation2] sm:$0xff]  ;;  %v1229_v59 = vpop.f32.mrf.mxu1 }
 0x10a   : > { %1023 = vst.msk [vmem:[#allocation2 + $0x20] sm:$0xff] %vm226_vm1, %v1015_v16  ;;  %1251 = vst.msk [vmem:[#allocation2 + $0x10] sm:$0xff] %vm226_vm1, %v1243_v37  ;;  %v1018_v54 = vadd.f32 %v4027_v40, %v908_v26  ;;  %v1241_v19 = vadd.f32 %v1210_v17, %v1027_v28  ;;  %v1322_v55 = vpop.f32.mrf.mxu0 }
 0x10b   : > { %v906_v20 = vld [vmem:[#allocation2 + $0x28] sm:$0xff]  ;;  %v1030_v52 = vld [vmem:[#allocation2 + $0x18] sm:$0xff]  ;;  %v4052_v29 = vpop.f32.mrf.mxu1 }
 0x10c   : > { %1026 = vst.msk [vmem:[#allocation2 + $0x38] sm:$0xff] %vm226_vm1, %v1018_v54  ;;  %1249 = vst.msk [vmem:[#allocation2] sm:$0xff] %vm226_vm1, %v1241_v19  ;;  %v1016_v42 = vadd.f32 %v999_v15, %v906_v20  ;;  %v1244_v60 = vadd.f32 %v4033_v45, %v1030_v52  ;;  %v4043_v1 = vpop.f32.mrf.mxu0  ;;  %v1968_v54 = vld [vmem:[#allocation3] sm:$0xf] }
 0x10d   : > { %v1028_v61 = vld [vmem:[#allocation2 + $0x8] sm:$0xff]  ;;  %v1434_v49 = vpop.f32.mrf.mxu1 }
 0x10e   : > { %1024 = vst.msk [vmem:[#allocation2 + $0x28] sm:$0xff] %vm226_vm1, %v1016_v42  ;;  %1252 = vst.msk [vmem:[#allocation2 + $0x18] sm:$0xff] %vm226_vm1, %v1244_v60  ;;  %v1242_v51 = vadd.f32 %v1213_v25, %v1028_v61  ;;  %v1325_v12 = vpop.f32.mrf.mxu0 }
 0x10f   : > { %v1033_v2 = vld [vmem:[#allocation2 + $0x30] sm:$0xff]  ;;  %v4053_v13 = vpop.f32.mrf.mxu1 }
 0x110   : > { %1250 = vst.msk [vmem:[#allocation2 + $0x8] sm:$0xff] %vm226_vm1, %v1242_v51  ;;  %v1247_v3 = vadd.f32 %v4036_v31, %v1033_v2  ;;  %v4046_v39 = vpop.f32.mrf.mxu0 }
 0x111   : > { %v1031_v9 = vld [vmem:[#allocation2 + $0x20] sm:$0xff]  ;;  %v1259_v36 = vld [vmem:[#allocation2 + $0x10] sm:$0xff]  ;;  %v1437_v45 = vpop.f32.mrf.mxu1 }
 0x112   : > { %1255 = vst.msk [vmem:[#allocation2 + $0x30] sm:$0xff] %vm226_vm1, %v1247_v3  ;;  %v1245_v50 = vadd.f32 %v1226_v5, %v1031_v9  ;;  %v1355_v0 = vadd.f32 %v4042_v41, %v1259_v36  ;;  %v1338_v24 = vpop.f32.mrf.mxu0 }
 0x113   : > { %v1034_v18 = vld [vmem:[#allocation2 + $0x38] sm:$0xff]  ;;  %v1257_v4 = vld [vmem:[#allocation2] sm:$0xff]  ;;  %v4056_v31 = vpop.f32.mrf.mxu1 }
 0x114   : > { %1253 = vst.msk [vmem:[#allocation2 + $0x20] sm:$0xff] %vm226_vm1, %v1245_v50  ;;  %1363 = vst.msk [vmem:[#allocation2 + $0x10] sm:$0xff] %vm226_vm1, %v1355_v0  ;;  %v1248_v10 = vadd.f32 %v4037_v23, %v1034_v18  ;;  %v1353_v11 = vadd.f32 %v1322_v55, %v1257_v4  ;;  %v4047_v8 = vpop.f32.mrf.mxu0 }
 0x115   : > { %v1032_v27 = vld [vmem:[#allocation2 + $0x28] sm:$0xff]  ;;  %v1260_v32 = vld [vmem:[#allocation2 + $0x18] sm:$0xff]  ;;  %v1450_v37 = vpop.f32.mrf.mxu1 }
 0x116   : > { %1256 = vst.msk [vmem:[#allocation2 + $0x38] sm:$0xff] %vm226_vm1, %v1248_v10  ;;  %1361 = vst.msk [vmem:[#allocation2] sm:$0xff] %vm226_vm1, %v1353_v11  ;;  %v1246_v17 = vadd.f32 %v1229_v59, %v1032_v27  ;;  %v1356_v43 = vadd.f32 %v4043_v1, %v1260_v32  ;;  %v1341_v47 = vpop.f32.mrf.mxu0  ;;  %v1993_v1 = vshrl.u32 %v1968_v54, 16  ;;  %v4709_v10 = vld [vmem:[%s5161_s2] ss:$0 sm:$0xff] }
 0x117   : > { %v1258_v44 = vld [vmem:[#allocation2 + $0x8] sm:$0xff]  ;;  %v4057_v52 = vpop.f32.mrf.mxu1  ;;  %v4712_v32 = vld [vmem:[#allocation3] sm:$0xe] }
 0x118   : > { %1254 = vst.msk [vmem:[#allocation2 + $0x28] sm:$0xff] %vm226_vm1, %v1246_v17  ;;  %1364 = vst.msk [vmem:[#allocation2 + $0x18] sm:$0xff] %vm226_vm1, %v1356_v43  ;;  %v1354_v21 = vadd.f32 %v1325_v12, %v1258_v44  ;;  %v4062_v22 = vpop.f32.mrf.mxu0  ;;  %v1995_v0 = vrot.slane %v1993_v1, 4 }
 0x119   : > { %v1263_v35 = vld [vmem:[#allocation2 + $0x30] sm:$0xff]  ;;  %v1453_v3 = vpop.f32.mrf.mxu1 }
 0x11a   : > { %1362 = vst.msk [vmem:[#allocation2 + $0x8] sm:$0xff] %vm226_vm1, %v1354_v21  ;;  %v1359_v53 = vadd.f32 %v4046_v39, %v1263_v35  ;;  %v1559_v48 = vpop.f32.mrf.mxu0 }
 0x11b   : > { %v1261_v57 = vld [vmem:[#allocation2 + $0x20] sm:$0xff]  ;;  %v1371_v14 = vld [vmem:[#allocation2 + $0x10] sm:$0xff] }
 0x11c   : > { %1367 = vst.msk [vmem:[#allocation2 + $0x30] sm:$0xff] %vm226_vm1, %v1359_v53  ;;  %v1357_v25 = vadd.f32 %v1338_v24, %v1261_v57  ;;  %v1467_v34 = vadd.f32 %v4052_v29, %v1371_v14  ;;  %v4063_v46 = vpop.f32.mrf.mxu0  ;;  %v1996_v29 = vshll.u32 %v1968_v54, 16  ;;  %v1969_v24 = vld [vmem:[#allocation3 + $0x4] sm:$0x1]  ;;  %v3789_v53 = vrot.slane %v4712_v32, 9 }
 0x11d   : > { %v1264_v62 = vld [vmem:[#allocation2 + $0x38] sm:$0xff]  ;;  %v1369_v58 = vld [vmem:[#allocation2] sm:$0xff]  ;;  %v4725_v14 = vld [vmem:[%s5162_s3 + $0x10] sm:$0xf] }
 0x11e   : > { %1365 = vst.msk [vmem:[#allocation2 + $0x20] sm:$0xff] %vm226_vm1, %v1357_v25  ;;  %1475 = vst.msk [vmem:[#allocation2 + $0x10] sm:$0xff] %vm226_vm1, %v1467_v34  ;;  %v1360_v33 = vadd.f32 %v4047_v8, %v1264_v62  ;;  %v1465_v40 = vadd.f32 %v1434_v49, %v1369_v58  ;;  %v1562_v28 = vpop.f32.mrf.mxu0  ;;  %v1998_v18 = vrot.slane %v1996_v29, 5  ;;  %v4714_v8 = vld [vmem:[#allocation3 + $0x4] sm:$0x1]  ;;  %v4733_v62 = vsel %vm1883_vm8, %v4628_v63, 0 }
 0x11f   : > { %v1262_v56 = vld [vmem:[#allocation2 + $0x28] sm:$0xff]  ;;  %v1372_v5 = vld [vmem:[#allocation2 + $0x18] sm:$0xff]  ;;  %v2259_v57 = vrot.slane %v4714_v8, 5  ;;  %v4738_v58 = vld [vmem:[%s5162_s3 + $0x14] sm:$0xf]  ;;  %v4771_v54 = vsel %vm1883_vm8, %v4725_v14, 0 }
 0x120   : > { %1368 = vst.msk [vmem:[#allocation2 + $0x38] sm:$0xff] %vm226_vm1, %v1360_v33  ;;  %1473 = vst.msk [vmem:[#allocation2] sm:$0xff] %vm226_vm1, %v1465_v40  ;;  %v1358_v38 = vadd.f32 %v1341_v47, %v1262_v56  ;;  %v1468_v15 = vadd.f32 %v4053_v13, %v1372_v5  ;;  %v4066_v61 = vpop.f32.mrf.mxu0  ;;  %v1999_v44 = vor.u32 %v1998_v18, %v1995_v0  ;;  %v2002_v47 = vshll.u32 %v1969_v24, 16 }
 0x121   : > { %v1370_v16 = vld [vmem:[#allocation2 + $0x8] sm:$0xff] }
 0x122   : > { %1366 = vst.msk [vmem:[#allocation2 + $0x28] sm:$0xff] %vm226_vm1, %v1358_v38  ;;  %1476 = vst.msk [vmem:[#allocation2 + $0x18] sm:$0xff] %vm226_vm1, %v1468_v15  ;;  %v1466_v23 = vadd.f32 %v1437_v45, %v1370_v16  ;;  %v1575_v50 = vpop.f32.mrf.mxu0  ;;  %v4742_v5 = vrot.slane %v1999_v44, 4  ;;  %v4749_v38 = vld [vmem:[%s5162_s3 + $0x18] sm:$0xf] }
 0x123   : > { %v1375_v26 = vld [vmem:[#allocation2 + $0x30] sm:$0xff] }
 0x124   : > { %1474 = vst.msk [vmem:[#allocation2 + $0x8] sm:$0xff] %vm226_vm1, %v1466_v23  ;;  %v1471_v41 = vadd.f32 %v4056_v31, %v1375_v26  ;;  %v4067_v43 = vpop.f32.mrf.mxu0  ;;  %v4740_v31 = vld [vmem:[#allocation3 + $0x48] sm:$0xf]  ;;  %v4758_v23 = vld [vmem:[%s5162_s3 + $0x1c] sm:$0xf] }
 0x125   : > { %v1373_v19 = vld [vmem:[#allocation2 + $0x20] sm:$0xff]  ;;  %v1483_v20 = vld [vmem:[#allocation2 + $0x10] sm:$0xff]  ;;  %v3222_v29 = vshll.u32 %v4740_v31, 16 }
 0x126   : > { %1479 = vst.msk [vmem:[#allocation2 + $0x30] sm:$0xff] %vm226_vm1, %v1471_v41  ;;  %v1469_v55 = vadd.f32 %v1450_v37, %v1373_v19  ;;  %v1592_v59 = vadd.f32 %v4062_v22, %v1483_v20  ;;  %v1578_v56 = vpop.f32.mrf.mxu0  ;;  %v4763_v26 = vld [vmem:[%s5162_s3 + $0x20] sm:$0xf]  ;;  %v4767_v41 = vsel %vm1883_vm8, %v4639_v30, 0  ;;  %v4775_v19 = vsel %vm1883_vm8, %v4738_v58, 0 }
 0x127   : > { %v1376_v42 = vld [vmem:[#allocation2 + $0x38] sm:$0xff]  ;;  %v1481_v60 = vld [vmem:[#allocation2] sm:$0xff]  ;;  %v3219_v20 = vshrl.u32 %v4740_v31, 16  ;;  %v4783_v30 = vsel %vm1883_vm8, %v4749_v38, 0  ;;  %v4792_v1 = vsel %vm1883_vm8, %v4763_v26, 0 }
 0x128   : > { %1477 = vst.msk [vmem:[#allocation2 + $0x20] sm:$0xff] %vm226_vm1, %v1469_v55  ;;  %1600 = vst.msk [vmem:[#allocation2 + $0x10] sm:$0xff] %vm226_vm1, %v1592_v59  ;;  %v1472_v51 = vadd.f32 %v4057_v52, %v1376_v42  ;;  %v1590_v2 = vadd.f32 %v1559_v48, %v1481_v60 }
 0x129   : > { %v1374_v12 = vld [vmem:[#allocation2 + $0x28] sm:$0xff]  ;;  %v1484_v9 = vld [vmem:[#allocation2 + $0x18] sm:$0xff]  ;;  %v4810_v24 = vrot.slane %v3219_v20, 4 }
 0x12a   : > { %1480 = vst.msk [vmem:[#allocation2 + $0x38] sm:$0xff] %vm226_vm1, %v1472_v51  ;;  %1598 = vst.msk [vmem:[#allocation2] sm:$0xff] %vm226_vm1, %v1590_v2  ;;  %v1470_v36 = vadd.f32 %v1453_v3, %v1374_v12  ;;  %v1593_v39 = vadd.f32 %v4063_v46, %v1484_v9  ;;  %v4744_v46 = vrot.slane %v2002_v47, 5  ;;  %v1790_v3 = vld [vmem:[#allocation3 + $0x18] sm:$0xf] }
 0x12b   : > { %v1482_v49 = vld [vmem:[#allocation2 + $0x8] sm:$0xff] }
 0x12c   : > { %1478 = vst.msk [vmem:[#allocation2 + $0x28] sm:$0xff] %vm226_vm1, %v1470_v36  ;;  %1601 = vst.msk [vmem:[#allocation2 + $0x18] sm:$0xff] %vm226_vm1, %v1593_v39  ;;  %v1591_v4 = vadd.f32 %v1562_v28, %v1482_v49  ;;  %v1793_v49 = vld [vmem:[#allocation3 + $0x1c] sm:$0x1] }
 0x12d   : > { %v1487_v11 = vld [vmem:[#allocation2 + $0x30] sm:$0xff] }
 0x12e   : > { %1599 = vst.msk [vmem:[#allocation2 + $0x8] sm:$0xff] %vm226_vm1, %v1591_v4  ;;  %v1596_v27 = vadd.f32 %v4066_v61, %v1487_v11  ;;  %v4788_v61 = vsel %vm1883_vm8, %v4758_v23, 0 }
 0x12f   : > { %v1608_v13 = vld [vmem:[#allocation2 + $0x10] sm:$0xff]  ;;  %v1485_v17 = vld [vmem:[#allocation2 + $0x20] sm:$0xff] }
 0x130   : > { %v1623_v21 = vadd.f32 %v4709_v10, %v1608_v13  ;;  %1828 = vst.msk [vmem:[#allocation2 + $0x10] sm:$0xff] %vm226_vm1, %v4239_v6  ;;  %1604 = vst.msk [vmem:[#allocation2 + $0x30] sm:$0xff] %vm226_vm1, %v1596_v27  ;;  %v1594_v35 = vadd.f32 %v1575_v50, %v1485_v17 }
 0x131   : > { %v1606_v45 = vld [vmem:[#allocation2] sm:$0xff]  ;;  %v1488_v22 = vld [vmem:[#allocation2 + $0x38] sm:$0xff] }
 0x132   : > { %v1631_v48 = vmax.f32 %v1623_v21, 0.0  ;;  %v1621_v25 = vadd.f32 %v4709_v10, %v1606_v45  ;;  %1826 = vst.msk [vmem:[#allocation2] sm:$0xff] %vm226_vm1, %v4239_v6  ;;  %1602 = vst.msk [vmem:[#allocation2 + $0x20] sm:$0xff] %vm226_vm1, %v1594_v35  ;;  %v1597_v34 = vadd.f32 %v4067_v43, %v1488_v22  ;;  %v1775_v45 = vld [vmem:[#allocation3 + $0x8] sm:$0xf] }
 0x133   : > { %v1609_v33 = vld [vmem:[#allocation2 + $0x18] sm:$0xff]  ;;  %v1486_v40 = vld [vmem:[#allocation2 + $0x28] sm:$0xff] }
 0x134   : > { %v3882_v63 = vpack.c.bf16 %v1631_v48, %v1631_v48  ;;  %v1629_v15 = vmax.f32 %v1621_v25, 0.0  ;;  %v1624_v16 = vadd.f32 %v4709_v10, %v1609_v33  ;;  %1829 = vst.msk [vmem:[#allocation2 + $0x18] sm:$0xff] %vm226_vm1, %v4239_v6  ;;  %1605 = vst.msk [vmem:[#allocation2 + $0x38] sm:$0xff] %vm226_vm1, %v1597_v34  ;;  %v1595_v37 = vadd.f32 %v1578_v56, %v1486_v40 }
 0x135   : > { %v1607_v28 = vld [vmem:[#allocation2 + $0x8] sm:$0xff] }
 0x136   : > { %v1708_v52 = vshrl.u32 %v3882_v63, 16  ;;  %v3880_v55 = vpack.c.bf16 %v1629_v15, %v1629_v15  ;;  %v1632_v59 = vmax.f32 %v1624_v16, 0.0  ;;  %1827 = vst.msk [vmem:[#allocation2 + $0x8] sm:$0xff] %vm226_vm1, %v4239_v6  ;;  %1603 = vst.msk [vmem:[#allocation2 + $0x28] sm:$0xff] %vm226_vm1, %v1595_v37  ;;  %v1622_v42 = vadd.f32 %v4709_v10, %v1607_v28 }
 0x137   : > { %v1612_v60 = vld [vmem:[#allocation2 + $0x30] sm:$0xff]  ;;  %v1711_v2 = vshll.u32 %v3882_v63, 16 }
 0x138   : > { %v1710_v51 = vrot.slane %v1708_v52, 7  ;;  %v1692_v9 = vshrl.u32 %v3880_v55, 16  ;;  %v3883_v36 = vpack.c.bf16 %v1632_v59, %v1632_v59  ;;  %1832 = vst.msk [vmem:[#allocation2 + $0x30] sm:$0xff] %vm226_vm1, %v4239_v6  ;;  %v1695_v50 = vshll.u32 %v3880_v55, 16  ;;  %v1796_v52 = vld [vmem:[#allocation3 + $0x20] sm:$0xf] }
 0x139   : > { %v1630_v0 = vmax.f32 %v1622_v42, 0.0  ;;  %v1627_v18 = vadd.f32 %v4709_v10, %v1612_v60  ;;  %v1610_v4 = vld [vmem:[#allocation2 + $0x20] sm:$0xff]  ;;  %v1784_v60 = vld [vmem:[#allocation3 + $0x10] sm:$0xf] }
 0x13a   : > { %v1713_v11 = vor.u32 %v1711_v2, %v1710_v51  ;;  %v1714_v27 = vrot.slane %v1710_v51, 4  ;;  %v4812_v13 = vrot.slane %v1692_v9, 7  ;;  %v1716_v17 = vshrl.u32 %v3883_v36, 16  ;;  %1830 = vst.msk [vmem:[#allocation2 + $0x20] sm:$0xff] %vm226_vm1, %v4239_v6  ;;  %v1787_v2 = vld [vmem:[#allocation3 + $0x14] sm:$0x1] }
 0x13b   : > { %v1719_v43 = vshll.u32 %v3883_v36, 16  ;;  %v3881_v44 = vpack.c.bf16 %v1630_v0, %v1630_v0  ;;  %v1635_v47 = vmax.f32 %v1627_v18, 0.0  ;;  %v1625_v21 = vadd.f32 %v4709_v10, %v1610_v4  ;;  %v1613_v35 = vld [vmem:[#allocation2 + $0x38] sm:$0xff]  ;;  %v1781_v18 = vld [vmem:[#allocation3 + $0xc] sm:$0x1]  ;;  %v1842_v7 = vld [vmem:[#allocation2] sm:$0xff] }
 0x13c   : > { %v1791_v22 = vsel %vm4797_vm11, %v1713_v11, %v1790_v3  ;;  %v1794_v48 = vsel %vm4805_vm12, %v1714_v27, %v1793_v49  ;;  %v1697_v25 = vor.u32 %v1695_v50, %v4812_v13  ;;  %v1698_v34 = vrot.slane %v4812_v13, 4  ;;  %1833 = vst.msk [vmem:[#allocation2 + $0x38] sm:$0xff] %vm226_vm1, %v4239_v6 }
 0x13d   : > { %1792 = vst [vmem:[#allocation3 + $0x18] sm:$0xf] %v1791_v22  ;;  %1795 = vst [vmem:[#allocation3 + $0x1c] sm:$0x1] %v1794_v48  ;;  %v1718_v33 = vrot.slane %v1716_v17, 7  ;;  %v1700_v40 = vshrl.u32 %v3881_v44, 16  ;;  %v3886_v63 = vpack.c.bf16 %v1635_v47, %v1635_v47  ;;  %v1628_v37 = vadd.f32 %v4709_v10, %v1613_v35 }
 0x13e   : > { %v1703_v56 = vshll.u32 %v3881_v44, 16  ;;  %v1611_v15 = vld [vmem:[#allocation2 + $0x28] sm:$0xff]  ;;  %v1633_v16 = vmax.f32 %v1625_v21, 0.0  ;;  %v1776_v20 = vsel %vm4797_vm11, %v1697_v25, %v1775_v45  ;;  %v1814_v17 = vld [vmem:[#allocation3 + $0x38] sm:$0xf] }
 0x13f   : > { %v1626_v28 = vadd.f32 %v4709_v10, %v1611_v15  ;;  %1831 = vst.msk [vmem:[#allocation2 + $0x28] sm:$0xff] %vm226_vm1, %v4239_v6  ;;  %v1721_v55 = vor.u32 %v1719_v43, %v1718_v33  ;;  %v1722_v59 = vrot.slane %v1718_v33, 4  ;;  %v1702_v42 = vrot.slane %v1700_v40, 7  ;;  %1777 = vst [vmem:[#allocation3 + $0x8] sm:$0xf] %v1776_v20 }
 0x140   : > { %v1740_v51 = vshrl.u32 %v3886_v63, 16  ;;  %v1743_v3 = vshll.u32 %v3886_v63, 16  ;;  %v3884_v9 = vpack.c.bf16 %v1633_v16, %v1633_v16  ;;  %v1636_v36 = vmax.f32 %v1628_v37, 0.0  ;;  %v1799_v43 = vld [vmem:[#allocation3 + $0x24] sm:$0x1] }
 0x141   : > { %v1634_v49 = vmax.f32 %v1626_v28, 0.0  ;;  %v1705_v50 = vor.u32 %v1703_v56, %v1702_v42  ;;  %v1706_v10 = vrot.slane %v1702_v42, 4  ;;  %v1797_v6 = vsel %vm4797_vm11, %v1721_v55, %v1796_v52  ;;  %v1817_v45 = vld [vmem:[#allocation3 + $0x3c] sm:$0x1]  ;;  %v1802_v40 = vld [vmem:[#allocation3 + $0x28] sm:$0xf] }
 0x142   : > { %v1742_v0 = vrot.slane %v1740_v51, 7  ;;  %v1724_v4 = vshrl.u32 %v3884_v9, 16  ;;  %v1727_v11 = vshll.u32 %v3884_v9, 16  ;;  %v3887_v27 = vpack.c.bf16 %v1636_v36, %v1636_v36  ;;  %1798 = vst [vmem:[#allocation3 + $0x20] sm:$0xf] %v1797_v6 }
 0x143   : > { %v3885_v13 = vpack.c.bf16 %v1634_v49, %v1634_v49  ;;  %v1785_v44 = vsel %vm4797_vm11, %v1705_v50, %v1784_v60  ;;  %v1788_v47 = vsel %vm4805_vm12, %v1706_v10, %v1787_v2  ;;  %v1782_v63 = vsel %vm4805_vm12, %v1698_v34, %v1781_v18  ;;  %v1808_v15 = vld [vmem:[#allocation3 + $0x30] sm:$0xf]  ;;  %v1805_v34 = vld [vmem:[#allocation3 + $0x2c] sm:$0x1]  ;;  %v1811_v51 = vld [vmem:[#allocation3 + $0x34] sm:$0x1] }
 0x144   : > { %v1745_v21 = vor.u32 %v1743_v3, %v1742_v0  ;;  %v1746_v35 = vrot.slane %v1742_v0, 4  ;;  %1786 = vst [vmem:[#allocation3 + $0x10] sm:$0xf] %v1785_v44  ;;  %1789 = vst [vmem:[#allocation3 + $0x14] sm:$0x1] %v1788_v47  ;;  %v1726_v22 = vrot.slane %v1724_v4, 7  ;;  %v1800_v20 = vsel %vm4805_vm12, %v1722_v59, %v1799_v43 }
 0x145   : > { %v1748_v48 = vshrl.u32 %v3887_v27, 16  ;;  %v1751_v25 = vshll.u32 %v3887_v27, 16  ;;  %v1732_v33 = vshrl.u32 %v3885_v13, 16  ;;  %v1735_v56 = vshll.u32 %v3885_v13, 16  ;;  %v1974_v37 = vld [vmem:[#allocation3 + $0x18] sm:$0xf] }
 0x146   : > { %v1815_v16 = vsel %vm4797_vm11, %v1745_v21, %v1814_v17  ;;  %v4841_v28 = vld [vmem:[#allocation3 + $0x1c] sm:$0x1]  ;;  %v1729_v52 = vor.u32 %v1727_v11, %v1726_v22  ;;  %v1730_v55 = vrot.slane %v1726_v22, 4  ;;  %1783 = vst [vmem:[#allocation3 + $0xc] sm:$0x1] %v1782_v63  ;;  %v2005_v9 = vsel %vm4418_vm5, %v4742_v5, %v4744_v46 }
 0x147   : > { %v1750_v42 = vrot.slane %v1748_v48, 7  ;;  %v1734_v60 = vrot.slane %v1732_v33, 7  ;;  %1816 = vst [vmem:[#allocation3 + $0x38] sm:$0xf] %v1815_v16  ;;  %1801 = vst [vmem:[#allocation3 + $0x24] sm:$0x1] %v1800_v20  ;;  %v1818_v59 = vsel %vm4805_vm12, %v1746_v35, %v1817_v45 }
 0x148   : > { %v4211_v2 = vld [vmem:[#allocation3] ss:$8 sps:$4 sm:$0xff]   ;;  %v2035_v36 = vshrl.u32 %v1974_v37, 16  ;;  %v2038_v49 = vshll.u32 %v1974_v37, 16  ;;  %1819 = vst [vmem:[#allocation3 + $0x3c] sm:$0x1] %v1818_v59  ;;  %v1803_v27 = vsel %vm4797_vm11, %v1729_v52, %v1802_v40  ;;  %v1806_v33 = vsel %vm4805_vm12, %v1730_v55, %v1805_v34 }
 0x149   : > { %v1970_v3 = vld [vmem:[#allocation3 + $0x8] sm:$0xf]  ;;  %v1820_v50 = vld [vmem:[#allocation3 + $0x40] sm:$0xf]  ;;  %v1753_v10 = vor.u32 %v1751_v25, %v1750_v42  ;;  %v1754_v0 = vrot.slane %v1750_v42, 4  ;;  %v1737_v6 = vor.u32 %v1735_v56, %v1734_v60  ;;  %v1738_v18 = vrot.slane %v1734_v60, 4  ;;  %4070 = vmatprep.mubr.msk.bf16.mxu1 %vm226_vm1, %v4211_v2 }
 0x14a   : > { %v2216_v4 = vld [vmem:[#allocation3 + $0x8] sm:$0xe]  ;;  %v1823_v11 = vld [vmem:[#allocation3 + $0x44] sm:$0x1]  ;;  %v2007_v13 = vshrl.u32 %v1970_v3, 16  ;;  %v2010_v17 = vshll.u32 %v1970_v3, 16 }
 0x14b   : > { %v2037_v43 = vrot.slane %v2035_v36, 4  ;;  %1804 = vst [vmem:[#allocation3 + $0x28] sm:$0xf] %v1803_v27  ;;  %v1809_v44 = vsel %vm4797_vm11, %v1737_v6, %v1808_v15  ;;  %v2040_v47 = vrot.slane %v2038_v49, 5  ;;  %v2044_v21 = vshll.u32 %v4841_v28, 16 }
 0x14c   : > { %v1976_v35 = vld [vmem:[#allocation3 + $0x20] sm:$0xf]  ;;  %v4859_v45 = vrot.slane %v3222_v29, 5  ;;  %v4212_v22 = vld [vmem:[#allocation3 + $0x10] ss:$8 sps:$4 sm:$0xff]   ;;  %v2009_v48 = vrot.slane %v2007_v13, 4  ;;  %v1812_v40 = vsel %vm4805_vm12, %v1738_v18, %v1811_v51  ;;  %v1821_v31 = vsel %vm4797_vm11, %v1753_v10, %v1820_v50 }
 0x14d   : > { %v2012_v25 = vrot.slane %v2010_v17, 5  ;;  %1810 = vst [vmem:[#allocation3 + $0x30] sm:$0xf] %v1809_v44  ;;  %v1972_v56 = vld [vmem:[#allocation3 + $0x10] sm:$0xf]  ;;  %v2041_v15 = vor.u32 %v2040_v47, %v2037_v43  ;;  %v3790_v16 = vrot.slane %v2216_v4, 9  ;;  %4071 = vmatmul.mubr.msk.bf16.vlgmr.msra.gmra.mxu1 %vm226_vm1, %v4212_v22  ;;  %v1824_v55 = vsel %vm4805_vm12, %v1754_v0, %v1823_v11 }
 0x14e   : > { %v1973_v63 = vld [vmem:[#allocation3 + $0x14] sm:$0x1]  ;;  %1807 = vst [vmem:[#allocation3 + $0x2c] sm:$0x1] %v1806_v33  ;;  %v2049_v37 = vshrl.u32 %v1976_v35, 16  ;;  %v2021_v20 = vshrl.u32 %v1972_v56, 16  ;;  %4089 = vmatpush3.bf16.msra.mxu1 %v4733_v62 }
 0x14f   : > { %1813 = vst [vmem:[#allocation3 + $0x34] sm:$0x1] %v1812_v40  ;;  %v1971_v29 = vld [vmem:[#allocation3 + $0xc] sm:$0x1]  ;;  %v2013_v28 = vor.u32 %v2012_v25, %v2009_v48  ;;  %v2024_v52 = vshll.u32 %v1972_v56, 16  ;;  %v2030_v60 = vshll.u32 %v1973_v63, 16  ;;  %4171 = vmatprep.subr.msk.bf16.mxu1 %vm1883_vm8, %v4725_v14  ;;  %v2260_v14 = vsel %vm4875_vm15, %v3789_v53, %v2259_v57 }
 0x150   : > { %1822 = vst [vmem:[#allocation3 + $0x40] sm:$0xf] %v1821_v31  ;;  %v2016_v42 = vshll.u32 %v1971_v29, 16  ;;  %v2042_v34 = vrot.slane %v2041_v15, 4  ;;  %v2046_v51 = vrot.slane %v2044_v21, 5  ;;  %v2023_v3 = vrot.slane %v2021_v20, 4 }
 0x151   : > { %v2217_v2 = vld [vmem:[#allocation3 + $0xc] sm:$0x1]  ;;  %1825 = vst [vmem:[#allocation3 + $0x44] sm:$0x1] %v1824_v55  ;;  %v2014_v12 = vrot.slane %v2013_v28, 4  ;;  %v2026_v36 = vrot.slane %v2024_v52, 5 }
 0x152   : > { %v2263_v49 = vrot.slane %v2217_v2, 5  ;;  %v1977_v59 = vld [vmem:[#allocation3 + $0x24] sm:$0x1]  ;;  %v2018_v50 = vrot.slane %v2016_v42, 5  ;;  %v2032_v10 = vrot.slane %v2030_v60, 5  ;;  %v2051_v39 = vrot.slane %v2049_v37, 4 }
 0x153   : > { %v2052_v0 = vshll.u32 %v1976_v35, 16  ;;  %v2218_v6 = vld [vmem:[#allocation3 + $0x10] sm:$0xe]  ;;  %v4213_v18 = vld [vmem:[#allocation3 + $0x20] ss:$8 sps:$4 sm:$0xff]   ;;  %v2027_v4 = vor.u32 %v2026_v36, %v2023_v3  ;;  %v2047_v43 = vsel %vm4418_vm5, %v2042_v34, %v2046_v51  ;;  %v2058_v47 = vshll.u32 %v1977_v59, 16 }
 0x154   : > { %v2264_v11 = vsel %vm4875_vm15, %v3790_v16, %v2263_v49  ;;  %v1978_v27 = vld [vmem:[#allocation3 + $0x28] sm:$0xf]  ;;  %v2019_v13 = vsel %vm4418_vm5, %v2014_v12, %v2018_v50  ;;  %v4214_v17 = vld [vmem:[#allocation3 + $0x30] ss:$8 sps:$4 sm:$0xff]   ;;  %4074 = vmatprep.mubr.msk.bf16.mxu1 %vm226_vm1, %v4213_v18  ;;  %v2219_v40 = vld [vmem:[#allocation3 + $0x14] sm:$0x1] }
 0x155   : > { %v2054_v44 = vrot.slane %v2052_v0, 5  ;;  %v2220_v21 = vld [vmem:[#allocation3 + $0x18] sm:$0xe]  ;;  %v3781_v32 = vcombine.low %v2005_v9, %v2019_v13  ;;  %v2028_v8 = vrot.slane %v2027_v4, 4  ;;  %v1979_v53 = vld [vmem:[#allocation3 + $0x2c] sm:$0x1]  ;;  %v3798_v22 = vcombine.low %v2260_v14, %v2264_v11  ;;  %4075 = vmatmul.mubr.msk.bf16.gmra.mxu1 %vm226_vm1, %v4214_v17 }
 0x156   : > { %v2063_v57 = vshrl.u32 %v1978_v27, 16  ;;  %v2066_v35 = vshll.u32 %v1978_v27, 16  ;;  %v2060_v25 = vrot.slane %v2058_v47, 5  ;;  %v2072_v33 = vshll.u32 %v1979_v53, 16  ;;  %v2221_v56 = vld [vmem:[#allocation3 + $0x1c] sm:$0x1] }
 0x157   : > { %v2055_v48 = vor.u32 %v2054_v44, %v2051_v39  ;;  %4080 = vmatprep.mubr.msk.bf16.mxu0 %vm226_vm1, %v3781_v32  ;;  %v2033_v63 = vsel %vm4418_vm5, %v2028_v8, %v2032_v10  ;;  %v3791_v46 = vrot.slane %v2218_v6, 9  ;;  %v1980_v9 = vld [vmem:[#allocation3 + $0x30] sm:$0xf]  ;;  %4090 = vmatprep.mubr.msk.bf16.mxu1 %vm226_vm1, %v3798_v22  ;;  %v2267_v29 = vrot.slane %v2219_v40, 5  ;;  %v1981_v28 = vld [vmem:[#allocation3 + $0x34] sm:$0x1] }
 0x158   : > { %v2065_v15 = vrot.slane %v2063_v57, 4  ;;  %v2068_v5 = vrot.slane %v2066_v35, 5  ;;  %v3782_v16 = vcombine.low %v2033_v63, %v2047_v43  ;;  %v2074_v31 = vrot.slane %v2072_v33, 5  ;;  %v1982_v42 = vld [vmem:[#allocation3 + $0x38] sm:$0xf]  ;;  %v1848_v62 = vld [vmem:[#allocation2 + $0x30] sm:$0xff] }
 0x159   : > { %v2056_v37 = vrot.slane %v2055_v48, 4  ;;  %v3792_v52 = vrot.slane %v2220_v21, 9  ;;  %v2271_v55 = vrot.slane %v2221_v56, 5  ;;  %v1983_v60 = vld [vmem:[#allocation3 + $0x3c] sm:$0x1]  ;;  %v2268_v51 = vsel %vm4875_vm15, %v3791_v46, %v2267_v29 }
 0x15a   : > { %v2069_v20 = vor.u32 %v2068_v5, %v2065_v15  ;;  %4081 = vmatmul.mubr.msk.bf16.vlgmr.msra.gmra.mxu0 %vm226_vm1, %v3782_v16  ;;  %v2077_v2 = vshrl.u32 %v1980_v9, 16  ;;  %v2080_v12 = vshll.u32 %v1980_v9, 16  ;;  %v2222_v3 = vld [vmem:[#allocation3 + $0x20] sm:$0xe]  ;;  %v2223_v36 = vld [vmem:[#allocation3 + $0x24] sm:$0x1] }
 0x15b   : > { %v2061_v34 = vsel %vm4418_vm5, %v2056_v37, %v2060_v25  ;;  %4099 = vmatpush3.bf16.msra.mxu0 %v4767_v41  ;;  %v2272_v59 = vsel %vm4875_vm15, %v3792_v52, %v2271_v55  ;;  %v2086_v50 = vshll.u32 %v1981_v28, 16  ;;  %v2091_v10 = vshrl.u32 %v1982_v42, 16  ;;  %v2224_v39 = vld [vmem:[#allocation3 + $0x28] sm:$0xe]  ;;  %v2225_v14 = vld [vmem:[#allocation3 + $0x2c] sm:$0x1] }
 0x15c   : > { %v2070_v49 = vrot.slane %v2069_v20, 4  ;;  %v3799_v0 = vcombine.low %v2268_v51, %v2272_v59  ;;  %v2079_v6 = vrot.slane %v2077_v2, 4  ;;  %v2082_v18 = vrot.slane %v2080_v12, 5  ;;  %4172 = vmatprep.subr.msk.bf16.mxu0 %vm1883_vm8, %v4738_v58  ;;  %v2226_v57 = vld [vmem:[#allocation3 + $0x30] sm:$0xe] }
 0x15d   : > { %v2094_v4 = vshll.u32 %v1982_v42, 16  ;;  %v2088_v27 = vrot.slane %v2086_v50, 5  ;;  %v2093_v13 = vrot.slane %v2091_v10, 4  ;;  %v2100_v41 = vshll.u32 %v1983_v60, 16  ;;  %v2227_v22 = vld [vmem:[#allocation3 + $0x34] sm:$0x1] }
 0x15e   : > { %v2075_v11 = vsel %vm4418_vm5, %v2070_v49, %v2074_v31  ;;  %v2083_v43 = vor.u32 %v2082_v18, %v2079_v6  ;;  %v3793_v47 = vrot.slane %v2222_v3, 9  ;;  %4091 = vmatmul.mubr.msk.bf16.vlgmr.msra.gmra.mxu1 %vm226_vm1, %v3799_v0  ;;  %v2275_v32 = vrot.slane %v2223_v36, 5  ;;  %v2228_v48 = vld [vmem:[#allocation3 + $0x38] sm:$0xe]  ;;  %v2229_v56 = vld [vmem:[#allocation3 + $0x3c] sm:$0x1] }
 0x15f   : > { %v3783_v17 = vcombine.low %v2061_v34, %v2075_v11  ;;  %v2096_v44 = vrot.slane %v2094_v4, 5  ;;  %v2102_v21 = vrot.slane %v2100_v41, 5  ;;  %v3794_v8 = vrot.slane %v2224_v39, 9  ;;  %4109 = vmatpush3.bf16.msra.mxu1 %v4771_v54  ;;  %v2533_v37 = vld [vmem:[#allocation3 + $0x8] sm:$0xf] }
 0x160   : > { %v2279_v53 = vrot.slane %v2225_v14, 5  ;;  %v2084_v58 = vrot.slane %v2083_v43, 4  ;;  %v3795_v25 = vrot.slane %v2226_v57, 9  ;;  %v2276_v33 = vsel %vm4875_vm15, %v3793_v47, %v2275_v32  ;;  %4173 = vmatprep.subr.msk.bf16.mxu1 %vm1883_vm8, %v4749_v38  ;;  %v2534_v31 = vld [vmem:[#allocation3 + $0xc] sm:$0x1] }
 0x161   : > { %4084 = vmatprep.mubr.msk.bf16.mxu0 %vm226_vm1, %v3783_v17  ;;  %v2097_v35 = vor.u32 %v2096_v44, %v2093_v13  ;;  %v2283_v63 = vrot.slane %v2227_v22, 5  ;;  %v3796_v15 = vrot.slane %v2228_v48, 9  ;;  %v2287_v16 = vrot.slane %v2229_v56, 5  ;;  %v2535_v29 = vld [vmem:[#allocation3 + $0x10] sm:$0xf] }
 0x162   : > { %v2280_v40 = vsel %vm4875_vm15, %v3794_v8, %v2279_v53  ;;  %v2089_v5 = vsel %vm4418_vm5, %v2084_v58, %v2088_v27  ;;  %v2536_v20 = vld [vmem:[#allocation3 + $0x14] sm:$0x1]  ;;  %v2558_v52 = vshrl.u32 %v2533_v37, 16  ;;  %v2561_v55 = vshll.u32 %v2533_v37, 16  ;;  %v4215_v60 = vld [vmem:[#allocation3 + $0x8] ss:$8 sps:$4 sm:$0xff]  }
 0x163   : > { %v2098_v46 = vrot.slane %v2097_v35, 4  ;;  %v3800_v9 = vcombine.low %v2276_v33, %v2280_v40  ;;  %v2284_v54 = vsel %vm4875_vm15, %v3795_v25, %v2283_v63  ;;  %v2288_v38 = vsel %vm4875_vm15, %v3796_v15, %v2287_v16  ;;  %v2537_v59 = vld [vmem:[#allocation3 + $0x18] sm:$0xf]  ;;  %v2538_v39 = vld [vmem:[#allocation3 + $0x1c] sm:$0x1] }
 0x164   : > { %v3801_v34 = vcombine.low %v2284_v54, %v2288_v38  ;;  %v2567_v51 = vshll.u32 %v2534_v31, 16  ;;  %v2572_v2 = vshrl.u32 %v2535_v29, 16  ;;  %v2560_v12 = vrot.slane %v2558_v52, 4  ;;  %v2539_v0 = vld [vmem:[#allocation3 + $0x20] sm:$0xf] }
 0x165   : > { %v2103_v28 = vsel %vm4418_vm5, %v2098_v46, %v2102_v21  ;;  %4094 = vmatprep.mubr.msk.bf16.mxu1 %vm226_vm1, %v3800_v9  ;;  %v2563_v3 = vrot.slane %v2561_v55, 5  ;;  %v2575_v36 = vshll.u32 %v2535_v29, 16  ;;  %v2581_v49 = vshll.u32 %v2536_v20, 16  ;;  %v2540_v14 = vld [vmem:[#allocation3 + $0x24] sm:$0x1] }
 0x166   : > { %v3784_v42 = vcombine.low %v2089_v5, %v2103_v28  ;;  %4095 = vmatmul.mubr.msk.bf16.gmra.mxu1 %vm226_vm1, %v3801_v34  ;;  %v2569_v50 = vrot.slane %v2567_v51, 5  ;;  %v2574_v10 = vrot.slane %v2572_v2, 4  ;;  %v2586_v11 = vshrl.u32 %v2537_v59, 16  ;;  %v4216_v32 = vld [vmem:[#allocation3 + $0x18] ss:$8 sps:$4 sm:$0xff]  }
 0x167   : > { %v2564_v6 = vor.u32 %v2563_v3, %v2560_v12  ;;  %v2577_v18 = vrot.slane %v2575_v36, 5  ;;  %v2583_v4 = vrot.slane %v2581_v49, 5  ;;  %v2589_v27 = vshll.u32 %v2537_v59, 16  ;;  %v4217_v48 = vld [vmem:[#allocation3 + $0x28] ss:$8 sps:$4 sm:$0xff]  }
 0x168   : > { %4085 = vmatmul.mubr.msk.bf16.gmra.mxu0 %vm226_vm1, %v3784_v42  ;;  %v2595_v13 = vshll.u32 %v2538_v39, 16  ;;  %v2600_v41 = vshrl.u32 %v2539_v0, 16  ;;  %v2603_v17 = vshll.u32 %v2539_v0, 16  ;;  %v2588_v47 = vrot.slane %v2586_v11, 4  ;;  %v2541_v33 = vld [vmem:[#allocation3 + $0x28] sm:$0xf] }
 0x169   : > { %4100 = vmatprep.mubr.msk.bf16.mxu0 %vm226_vm1, %v4215_v60  ;;  %v2565_v43 = vrot.slane %v2564_v6, 4  ;;  %v2578_v44 = vor.u32 %v2577_v18, %v2574_v10  ;;  %v2609_v21 = vshll.u32 %v2540_v14, 16  ;;  %v2591_v8 = vrot.slane %v2589_v27, 5  ;;  %v2542_v40 = vld [vmem:[#allocation3 + $0x2c] sm:$0x1] }
 0x16a   : > { %v2597_v53 = vrot.slane %v2595_v13, 5  ;;  %v2602_v57 = vrot.slane %v2600_v41, 4  ;;  %v2605_v58 = vrot.slane %v2603_v17, 5  ;;  %v2543_v15 = vld [vmem:[#allocation3 + $0x30] sm:$0xf]  ;;  %v2614_v46 = vshrl.u32 %v2541_v33, 16 }
 0x16b   : > { %v2570_v35 = vsel %vm4418_vm5, %v2565_v43, %v2569_v50  ;;  %v2579_v22 = vrot.slane %v2578_v44, 4  ;;  %v2611_v25 = vrot.slane %v2609_v21, 5  ;;  %v2592_v56 = vor.u32 %v2591_v8, %v2588_v47  ;;  %v2544_v5 = vld [vmem:[#allocation3 + $0x34] sm:$0x1]  ;;  %v2779_v29 = vld [vmem:[#allocation3 + $0x8] sm:$0xe] }
 0x16c   : > { %v2606_v63 = vor.u32 %v2605_v58, %v2602_v57  ;;  %v2617_v9 = vshll.u32 %v2541_v33, 16  ;;  %v2623_v54 = vshll.u32 %v2542_v40, 16  ;;  %v2628_v37 = vshrl.u32 %v2543_v15, 16  ;;  %v2780_v55 = vld [vmem:[#allocation3 + $0xc] sm:$0x1] }
 0x16d   : > { %v2584_v16 = vsel %vm4418_vm5, %v2579_v22, %v2583_v4  ;;  %v2631_v31 = vshll.u32 %v2543_v15, 16  ;;  %v2593_v38 = vrot.slane %v2592_v56, 4  ;;  %v2616_v52 = vrot.slane %v2614_v46, 4  ;;  %v2781_v2 = vld [vmem:[#allocation3 + $0x10] sm:$0xe] }
 0x16e   : > { %v3816_v28 = vcombine.low %v2570_v35, %v2584_v16  ;;  %v2607_v20 = vrot.slane %v2606_v63, 4  ;;  %v2619_v42 = vrot.slane %v2617_v9, 5  ;;  %v2625_v60 = vrot.slane %v2623_v54, 5  ;;  %v2782_v49 = vld [vmem:[#allocation3 + $0x14] sm:$0x1] }
 0x16f   : > { %v2630_v34 = vrot.slane %v2628_v37, 4  ;;  %v2633_v51 = vrot.slane %v2631_v31, 5  ;;  %v2598_v12 = vsel %vm4418_vm5, %v2593_v38, %v2597_v53  ;;  %v2637_v36 = vshll.u32 %v2544_v5, 16  ;;  %v2545_v50 = vld [vmem:[#allocation3 + $0x38] sm:$0xf] }
 0x170   : > { %4101 = vmatmul.mubr.msk.bf16.vlgmr.msra.gmra.mxu0 %vm226_vm1, %v4216_v32  ;;  %4110 = vmatprep.mubr.msk.bf16.mxu1 %vm226_vm1, %v3816_v28  ;;  %v2612_v3 = vsel %vm4418_vm5, %v2607_v20, %v2611_v25  ;;  %v3824_v59 = vrot.slane %v2779_v29, 9  ;;  %v2620_v39 = vor.u32 %v2619_v42, %v2616_v52  ;;  %v2546_v6 = vld [vmem:[#allocation3 + $0x3c] sm:$0x1]  ;;  %v2547_v18 = vld [vmem:[#allocation3 + $0x40] sm:$0xf]  ;;  %v3825_v27 = vrot.slane %v2781_v2, 9 }
 0x171   : > { %4104 = vmatprep.mubr.msk.bf16.mxu0 %vm226_vm1, %v4217_v48  ;;  %4119 = vmatpush3.bf16.msra.mxu0 %v4775_v19  ;;  %v3817_v10 = vcombine.low %v2598_v12, %v2612_v3  ;;  %v2634_v0 = vor.u32 %v2633_v51, %v2630_v34  ;;  %v2821_v19 = vrot.slane %v2780_v55, 5  ;;  %v3111_v4 = vld [vmem:[#allocation3 + $0x4c] sm:$0x1]  ;;  %v4218_v14 = vld [vmem:[#allocation3 + $0x38] ss:$8 sps:$4 sm:$0xff]   ;;  %v2639_v11 = vrot.slane %v2637_v36, 5 }
 0x172   : > { %4174 = vmatprep.subr.msk.bf16.mxu0 %vm1883_vm8, %v4758_v23  ;;  %v2825_v13 = vrot.slane %v2782_v49, 5  ;;  %v2642_v41 = vshrl.u32 %v2545_v50, 16  ;;  %v4949_v17 = vld [vmem:[#allocation3 + $0x48] sm:$0xe]  ;;  %v2621_v43 = vrot.slane %v2620_v39, 4  ;;  %v2645_v21 = vshll.u32 %v2545_v50, 16 }
 0x173   : > { %4111 = vmatmul.mubr.msk.bf16.vlgmr.msra.gmra.mxu1 %vm226_vm1, %v3817_v10  ;;  %v2635_v44 = vrot.slane %v2634_v0, 4  ;;  %v2822_v23 = vsel %vm4875_vm15, %v3824_v59, %v2821_v19  ;;  %v2548_v47 = vld [vmem:[#allocation3 + $0x44] sm:$0x1]  ;;  %v2783_v32 = vld [vmem:[#allocation3 + $0x18] sm:$0xe]  ;;  %v2651_v57 = vshll.u32 %v2546_v6, 16 }
 0x174   : > { %v2826_v8 = vsel %vm4875_vm15, %v3825_v27, %v2825_v13  ;;  %v2644_v53 = vrot.slane %v2642_v41, 4  ;;  %v2656_v58 = vshrl.u32 %v2547_v18, 16  ;;  %v2784_v35 = vld [vmem:[#allocation3 + $0x1c] sm:$0x1]  ;;  %4129 = vmatpush3.bf16.msra.mxu1 %v4783_v30  ;;  %v2626_v22 = vsel %vm4418_vm5, %v2621_v43, %v2625_v60  ;;  %v2785_v40 = vld [vmem:[#allocation3 + $0x20] sm:$0xe] }
 0x175   : > { %v2640_v48 = vsel %vm4418_vm5, %v2635_v44, %v2639_v11  ;;  %v3833_v25 = vcombine.low %v2822_v23, %v2826_v8  ;;  %v2647_v33 = vrot.slane %v2645_v21, 5  ;;  %v2786_v56 = vld [vmem:[#allocation3 + $0x24] sm:$0x1]  ;;  %4175 = vmatprep.subr.msk.bf16.mxu1 %vm1883_vm8, %v4763_v26  ;;  %v2659_v5 = vshll.u32 %v2547_v18, 16  ;;  %v2787_v20 = vld [vmem:[#allocation3 + $0x28] sm:$0xe] }
 0x176   : > { %v3818_v63 = vcombine.low %v2626_v22, %v2640_v48  ;;  %v2658_v15 = vrot.slane %v2656_v58, 4  ;;  %v3228_v46 = vshll.u32 %v3111_v4, 16  ;;  %v3826_v9 = vrot.slane %v2783_v32, 9  ;;  %v2788_v52 = vld [vmem:[#allocation3 + $0x2c] sm:$0x1] }
 0x177   : > { %v2648_v30 = vor.u32 %v2647_v33, %v2644_v53  ;;  %v2829_v16 = vrot.slane %v2784_v35, 5  ;;  %v3866_v54 = vrot.slane %v4949_v17, 9  ;;  %v2661_v37 = vrot.slane %v2659_v5, 5  ;;  %v2789_v60 = vld [vmem:[#allocation3 + $0x30] sm:$0xe] }
 0x178   : > { %4105 = vmatmul.mubr.msk.bf16.gmra.mxu0 %vm226_vm1, %v4218_v14  ;;  %4114 = vmatprep.mubr.msk.bf16.mxu1 %vm226_vm1, %v3818_v63  ;;  %v2665_v31 = vshll.u32 %v2548_v47, 16  ;;  %v3827_v29 = vrot.slane %v2785_v40, 9  ;;  %v2833_v28 = vrot.slane %v2786_v56, 5  ;;  %v2653_v38 = vrot.slane %v2651_v57, 5  ;;  %v2790_v34 = vld [vmem:[#allocation3 + $0x34] sm:$0x1] }
 0x179   : > { %4120 = vmatprep.mubr.msk.bf16.mxu0 %vm226_vm1, %v3833_v25  ;;  %v2649_v26 = vrot.slane %v2648_v30, 4  ;;  %v2662_v55 = vor.u32 %v2661_v37, %v2658_v15  ;;  %v3828_v51 = vrot.slane %v2787_v20, 9  ;;  %v2837_v2 = vrot.slane %v2788_v52, 5  ;;  %v2791_v10 = vld [vmem:[#allocation3 + $0x38] sm:$0xe] }
 0x17a   : > { %v2834_v42 = vsel %vm4875_vm15, %v3827_v29, %v2833_v28  ;;  %v2830_v12 = vsel %vm4875_vm15, %v3826_v9, %v2829_v16  ;;  %v3829_v3 = vrot.slane %v2789_v60, 9  ;;  %v2841_v36 = vrot.slane %v2790_v34, 5  ;;  %v2792_v18 = vld [vmem:[#allocation3 + $0x3c] sm:$0x1]  ;;  %v2793_v4 = vld [vmem:[#allocation3 + $0x40] sm:$0xe] }
 0x17b   : > { %v2663_v49 = vrot.slane %v2662_v55, 4  ;;  %v2667_v59 = vrot.slane %v2665_v31, 5  ;;  %v3834_v50 = vcombine.low %v2830_v12, %v2834_v42  ;;  %v4971_v39 = vrot.slane %v3228_v46, 5  ;;  %v2794_v14 = vld [vmem:[#allocation3 + $0x44] sm:$0x1] }
 0x17c   : > { %v2654_v0 = vsel %vm4418_vm5, %v2649_v26, %v2653_v38  ;;  %v2838_v19 = vsel %vm4875_vm15, %v3828_v51, %v2837_v2  ;;  %v2842_v6 = vsel %vm4875_vm15, %v3829_v3, %v2841_v36  ;;  %v3225_v11 = vor.u32 %v4859_v45, %v4810_v24  ;;  %v4219_v23 = vld [vmem:[#allocation3 + $0x10] ss:$8 sps:$4 sm:$0xff]   ;;  %v3097_v8 = vld [vmem:[#allocation3 + $0x14] sm:$0x1]  ;;  %v3099_v24 = vld [vmem:[#allocation3 + $0x1c] sm:$0x1] }
 0x17d   : > { %v2668_v27 = vsel %vm4418_vm5, %v2663_v49, %v2667_v59  ;;  %v3835_v13 = vcombine.low %v2838_v19, %v2842_v6  ;;  %v3830_v41 = vrot.slane %v2791_v10, 9  ;;  %v2845_v43 = vrot.slane %v2792_v18, 5  ;;  %v3096_v32 = vld [vmem:[#allocation3 + $0x10] sm:$0xf]  ;;  %v3098_v53 = vld [vmem:[#allocation3 + $0x18] sm:$0xf] }
 0x17e   : > { %v3819_v44 = vcombine.low %v2654_v0, %v2668_v27  ;;  %v3831_v47 = vrot.slane %v2793_v4, 9  ;;  %v2849_v21 = vrot.slane %v2794_v14, 5  ;;  %v3121_v57 = vshrl.u32 %v3096_v32, 16  ;;  %v3100_v15 = vld [vmem:[#allocation3 + $0x20] sm:$0xf] }
 0x17f   : > { %v3124_v58 = vshll.u32 %v3096_v32, 16  ;;  %v3130_v35 = vshll.u32 %v3097_v8, 16  ;;  %v2846_v22 = vsel %vm4875_vm15, %v3830_v41, %v2845_v43  ;;  %v3135_v48 = vshrl.u32 %v3098_v53, 16  ;;  %v3101_v9 = vld [vmem:[#allocation3 + $0x24] sm:$0x1] }
 0x180   : > { %4121 = vmatmul.mubr.msk.bf16.vlgmr.msra.gmra.mxu0 %vm226_vm1, %v3834_v50  ;;  %4115 = vmatmul.mubr.msk.bf16.gmra.mxu1 %vm226_vm1, %v3819_v44  ;;  %v2850_v45 = vsel %vm4875_vm15, %v3831_v47, %v2849_v21  ;;  %v4992_v25 = vrot.slane %v3225_v11, 4  ;;  %v3123_v40 = vrot.slane %v3121_v57, 4  ;;  %v3144_v63 = vshll.u32 %v3099_v24, 16  ;;  %v4220_v37 = vld [vmem:[#allocation3 + $0x20] ss:$8 sps:$4 sm:$0xff]  }
 0x181   : > { %4139 = vmatpush3.bf16.msra.mxu0 %v4788_v61  ;;  %4124 = vmatprep.mubr.msk.bf16.mxu0 %vm226_vm1, %v3835_v13  ;;  %v3138_v61 = vshll.u32 %v3098_v53, 16  ;;  %v3836_v33 = vcombine.low %v2846_v22, %v2850_v45  ;;  %v3126_v56 = vrot.slane %v3124_v58, 5  ;;  %v3132_v5 = vrot.slane %v3130_v35, 5  ;;  %v3102_v29 = vld [vmem:[#allocation3 + $0x28] sm:$0xf] }
 0x182   : > { %4130 = vmatprep.mubr.msk.bf16.mxu1 %vm226_vm1, %v4219_v23  ;;  %v3137_v46 = vrot.slane %v3135_v48, 4  ;;  %v3149_v16 = vshrl.u32 %v3100_v15, 16  ;;  %v3103_v28 = vld [vmem:[#allocation3 + $0x2c] sm:$0x1]  ;;  %v3152_v26 = vshll.u32 %v3100_v15, 16  ;;  %v3158_v38 = vshll.u32 %v3101_v9, 16 }
 0x183   : > { %v3140_v30 = vrot.slane %v3138_v61, 5  ;;  %v3127_v31 = vor.u32 %v3126_v56, %v3123_v40  ;;  %v4221_v20 = vld [vmem:[#allocation3 + $0x30] ss:$8 sps:$4 sm:$0xff]   ;;  %v3163_v42 = vshrl.u32 %v3102_v29, 16  ;;  %v3166_v60 = vshll.u32 %v3102_v29, 16 }
 0x184   : > { %v3151_v55 = vrot.slane %v3149_v16, 4  ;;  %v3342_v34 = vld [vmem:[#allocation3 + $0x10] sm:$0xe]  ;;  %v3146_v2 = vrot.slane %v3144_v63, 5  ;;  %v3154_v12 = vrot.slane %v3152_v26, 5  ;;  %v3172_v3 = vshll.u32 %v3103_v28, 16 }
 0x185   : > { %v3141_v52 = vor.u32 %v3140_v30, %v3137_v46  ;;  %v3128_v51 = vrot.slane %v3127_v31, 4  ;;  %v3343_v36 = vld [vmem:[#allocation3 + $0x14] sm:$0x1]  ;;  %v3165_v59 = vrot.slane %v3163_v42, 4  ;;  %v3168_v50 = vrot.slane %v3166_v60, 5 }
 0x186   : > { %v3344_v10 = vld [vmem:[#allocation3 + $0x18] sm:$0xe]  ;;  %v3859_v0 = vrot.slane %v3342_v34, 9  ;;  %v3155_v6 = vor.u32 %v3154_v12, %v3151_v55  ;;  %v3160_v18 = vrot.slane %v3158_v38, 5  ;;  %v3345_v4 = vld [vmem:[#allocation3 + $0x1c] sm:$0x1] }
 0x187   : > { %v3142_v49 = vrot.slane %v3141_v52, 4  ;;  %v3133_v19 = vsel %vm4418_vm5, %v3128_v51, %v3132_v5  ;;  %v3384_v14 = vrot.slane %v3343_v36, 5  ;;  %v3104_v11 = vld [vmem:[#allocation3 + $0x30] sm:$0xf]  ;;  %v3169_v13 = vor.u32 %v3168_v50, %v3165_v59  ;;  %v3105_v44 = vld [vmem:[#allocation3 + $0x34] sm:$0x1] }
 0x188   : > { %4125 = vmatmul.mubr.msk.bf16.gmra.mxu0 %vm226_vm1, %v3836_v33  ;;  %4131 = vmatmul.mubr.msk.bf16.vlgmr.msra.gmra.mxu1 %vm226_vm1, %v4220_v37  ;;  %v3860_v41 = vrot.slane %v3344_v10, 9  ;;  %v3388_v43 = vrot.slane %v3345_v4, 5  ;;  %v3106_v23 = vld [vmem:[#allocation3 + $0x38] sm:$0xf]  ;;  %v3156_v21 = vrot.slane %v3155_v6, 4  ;;  %v3177_v53 = vshrl.u32 %v3104_v11, 16 }
 0x189   : > { %4134 = vmatprep.mubr.msk.bf16.mxu1 %vm226_vm1, %v4221_v20  ;;  %v3147_v27 = vsel %vm4418_vm5, %v3142_v49, %v3146_v2  ;;  %4149 = vmatpush3.bf16.msra.mxu1 %v4792_v1  ;;  %v3385_v32 = vsel %vm4875_vm15, %v3859_v0, %v3384_v14  ;;  %v3107_v8 = vld [vmem:[#allocation3 + $0x3c] sm:$0x1]  ;;  %v3170_v24 = vrot.slane %v3169_v13, 4  ;;  %v3174_v45 = vrot.slane %v3172_v3, 5  ;;  %v3346_v35 = vld [vmem:[#allocation3 + $0x20] sm:$0xe] }
 0x18a   : > { %v3851_v47 = vcombine.low %v3133_v19, %v3147_v27  ;;  %v3180_v57 = vshll.u32 %v3104_v11, 16  ;;  %v3186_v58 = vshll.u32 %v3105_v44, 16  ;;  %v4222_v22 = vld [vmem:[#allocation3 + $0x40] ss:$8 sps:$4 sm:$0xff]   ;;  %v3161_v48 = vsel %vm4418_vm5, %v3156_v21, %v3160_v18  ;;  %v3347_v40 = vld [vmem:[#allocation3 + $0x24] sm:$0x1] }
 0x18b   : > { %v3389_v1 = vsel %vm4875_vm15, %v3860_v41, %v3388_v43  ;;  %v3179_v61 = vrot.slane %v3177_v53, 4  ;;  %v3191_v33 = vshrl.u32 %v3106_v23, 16  ;;  %v3348_v56 = vld [vmem:[#allocation3 + $0x28] sm:$0xe]  ;;  %v3175_v63 = vsel %vm4418_vm5, %v3170_v24, %v3174_v45  ;;  %v3349_v30 = vld [vmem:[#allocation3 + $0x2c] sm:$0x1] }
 0x18c   : > { %4140 = vmatprep.mubr.msk.bf16.mxu0 %vm226_vm1, %v3851_v47  ;;  %v3868_v15 = vcombine.low %v3385_v32, %v3389_v1  ;;  %v3182_v5 = vrot.slane %v3180_v57, 5  ;;  %v3194_v46 = vshll.u32 %v3106_v23, 16  ;;  %v3108_v9 = vld [vmem:[#allocation3 + $0x40] sm:$0xf]  ;;  %v3852_v16 = vcombine.low %v3161_v48, %v3175_v63  ;;  %v3109_v28 = vld [vmem:[#allocation3 + $0x44] sm:$0x1] }
 0x18d   : > { %v3193_v37 = vrot.slane %v3191_v33, 4  ;;  %v3200_v31 = vshll.u32 %v3107_v8, 16  ;;  %v3861_v29 = vrot.slane %v3346_v35, 9  ;;  %v3392_v20 = vrot.slane %v3347_v40, 5  ;;  %v3350_v55 = vld [vmem:[#allocation3 + $0x30] sm:$0xe] }
 0x18e   : > { %v3183_v26 = vor.u32 %v3182_v5, %v3179_v61  ;;  %v3196_v38 = vrot.slane %v3194_v46, 5  ;;  %v3862_v52 = vrot.slane %v3348_v56, 9  ;;  %v3188_v42 = vrot.slane %v3186_v58, 5  ;;  %v3351_v2 = vld [vmem:[#allocation3 + $0x34] sm:$0x1]  ;;  %v1845_v5 = vld [vmem:[#allocation2 + $0x18] sm:$0xff] }
 0x18f   : > { %v3396_v60 = vrot.slane %v3349_v30, 5  ;;  %v3205_v34 = vshrl.u32 %v3108_v9, 16  ;;  %v3208_v51 = vshll.u32 %v3108_v9, 16  ;;  %v3214_v36 = vshll.u32 %v3109_v28, 16  ;;  %v3352_v49 = vld [vmem:[#allocation3 + $0x38] sm:$0xe] }
 0x190   : > { %4135 = vmatmul.mubr.msk.bf16.gmra.mxu1 %vm226_vm1, %v4222_v22  ;;  %4141 = vmatmul.mubr.msk.bf16.vlgmr.msra.gmra.mxu0 %vm226_vm1, %v3852_v16  ;;  %v3184_v12 = vrot.slane %v3183_v26, 4  ;;  %v3197_v3 = vor.u32 %v3196_v38, %v3193_v37  ;;  %v3353_v59 = vld [vmem:[#allocation3 + $0x3c] sm:$0x1]  ;;  %v3863_v19 = vrot.slane %v3350_v55, 9  ;;  %v3202_v4 = vrot.slane %v3200_v31, 5  ;;  %v1844_v40 = vld [vmem:[#allocation2 + $0x10] sm:$0xff] }
 0x191   : > { %4150 = vmatprep.mubr.msk.bf16.mxu1 %vm226_vm1, %v3868_v15  ;;  %v3397_v50 = vsel %vm4875_vm15, %v3862_v52, %v3396_v60  ;;  %v3207_v10 = vrot.slane %v3205_v34, 4  ;;  %v3210_v0 = vrot.slane %v3208_v51, 5  ;;  %v3393_v14 = vsel %vm4875_vm15, %v3861_v29, %v3392_v20  ;;  %v3354_v11 = vld [vmem:[#allocation3 + $0x40] sm:$0xe]  ;;  %v3357_v27 = vld [vmem:[#allocation3 + $0x4c] sm:$0x1] }
 0x192   : > { %v3189_v6 = vsel %vm4418_vm5, %v3184_v12, %v3188_v42  ;;  %v3198_v18 = vrot.slane %v3197_v3, 4  ;;  %v3400_v41 = vrot.slane %v3351_v2, 5  ;;  %v3864_v43 = vrot.slane %v3352_v49, 9  ;;  %v3355_v23 = vld [vmem:[#allocation3 + $0x44] sm:$0x1]  ;;  %v1843_v9 = vld [vmem:[#allocation2 + $0x8] sm:$0xff] }
 0x193   : > { %v3211_v13 = vor.u32 %v3210_v0, %v3207_v10  ;;  %v3404_v44 = vrot.slane %v3353_v59, 5  ;;  %v3869_v21 = vcombine.low %v3393_v14, %v3397_v50  ;;  %v3216_v32 = vrot.slane %v3214_v36, 5  ;;  %v1846_v31 = vld [vmem:[#allocation2 + $0x20] sm:$0xff]  ;;  %v1849_v38 = vld [vmem:[#allocation2 + $0x38] sm:$0xff]  ;;  %v1847_v34 = vld [vmem:[#allocation2 + $0x28] sm:$0xff] }
 0x194   : > { %v3203_v47 = vsel %vm4418_vm5, %v3198_v18, %v3202_v4  ;;  %v3231_v8 = vsel %vm4418_vm5, %v4992_v25, %v4971_v39  ;;  %v3401_v45 = vsel %vm4875_vm15, %v3863_v19, %v3400_v41  ;;  %v3865_v35 = vrot.slane %v3354_v11, 9 }
 0x195   : > { %v3853_v53 = vcombine.low %v3189_v6, %v3203_v47  ;;  %v3212_v24 = vrot.slane %v3211_v13, 4  ;;  %v3405_v57 = vsel %vm4875_vm15, %v3864_v43, %v3404_v44  ;;  %v3408_v22 = vrot.slane %v3355_v23, 5 }
 0x196   : > { %v3870_v58 = vcombine.low %v3401_v45, %v3405_v57  ;;  %v3412_v48 = vrot.slane %v3357_v27, 5 }
 0x197   : > { %4144 = vmatprep.mubr.msk.bf16.mxu0 %vm226_vm1, %v3853_v53  ;;  %v3217_v1 = vsel %vm4418_vm5, %v3212_v24, %v3216_v32  ;;  %v3409_v25 = vsel %vm4875_vm15, %v3865_v35, %v3408_v22 }
 0x198   : > { %4151 = vmatmul.mubr.msk.bf16.vlgmr.msra.gmra.mxu1 %vm226_vm1, %v3869_v21  ;;  %v3854_v39 = vcombine.low %v3217_v1, %v3231_v8  ;;  %v3413_v61 = vsel %vm4875_vm15, %v3866_v54, %v3412_v48 }
 0x199   : > { %4154 = vmatprep.mubr.msk.bf16.mxu1 %vm226_vm1, %v3870_v58  ;;  %v3871_v33 = vcombine.low %v3409_v25, %v3413_v61 }
 0x19a   : > { %4145 = vmatmul.mubr.msk.bf16.gmra.mxu0 %vm226_vm1, %v3854_v39 }
 0x1a0   : > { %4155 = vmatmul.mubr.msk.bf16.gmra.mxu1 %vm226_vm1, %v3871_v33 }
 0x20d   : > { %v4072_v56 = vpop.f32.mrf.mxu1 }
 0x20e   : > { %v1954_v63 = vadd.f32 %v4072_v56, %v1844_v40 }
 0x20f   : > { %v1921_v15 = vpop.f32.mrf.mxu1 }
 0x210   : > { %1962 = vst.msk [vmem:[#allocation2 + $0x10] sm:$0xff] %vm226_vm1, %v1954_v63  ;;  %v1952_v46 = vadd.f32 %v1921_v15, %v1842_v7 }
 0x211   : > { %v4073_v30 = vpop.f32.mrf.mxu1 }
 0x212   : > { %1960 = vst.msk [vmem:[#allocation2] sm:$0xff] %vm226_vm1, %v1952_v46  ;;  %v1955_v17 = vadd.f32 %v4073_v30, %v1845_v5 }
 0x213   : > { %v1924_v16 = vpop.f32.mrf.mxu1 }
 0x214   : > { %1963 = vst.msk [vmem:[#allocation2 + $0x18] sm:$0xff] %vm226_vm1, %v1955_v17  ;;  %v1953_v54 = vadd.f32 %v1924_v16, %v1843_v9 }
 0x215   : > { %v4076_v37 = vpop.f32.mrf.mxu1 }
 0x216   : > { %1961 = vst.msk [vmem:[#allocation2 + $0x8] sm:$0xff] %vm226_vm1, %v1953_v54  ;;  %v1958_v29 = vadd.f32 %v4076_v37, %v1848_v62 }
 0x217   : > { %v1986_v28 = vld [vmem:[#allocation2 + $0x10] sm:$0xff]  ;;  %v1937_v26 = vpop.f32.mrf.mxu1 }
 0x218   : > { %1966 = vst.msk [vmem:[#allocation2 + $0x30] sm:$0xff] %vm226_vm1, %v1958_v29  ;;  %v1956_v52 = vadd.f32 %v1937_v26, %v1846_v31 }
 0x219   : > { %v1984_v42 = vld [vmem:[#allocation2] sm:$0xff]  ;;  %v4077_v60 = vpop.f32.mrf.mxu1 }
 0x21a   : > { %v4082_v20 = vpop.f32.mrf.mxu0  ;;  %1964 = vst.msk [vmem:[#allocation2 + $0x20] sm:$0xff] %vm226_vm1, %v1956_v52  ;;  %v1959_v2 = vadd.f32 %v4077_v60, %v1849_v38 }
 0x21b   : > { %v2200_v55 = vadd.f32 %v4082_v20, %v1986_v28  ;;  %v1987_v3 = vld [vmem:[#allocation2 + $0x18] sm:$0xff]  ;;  %v1940_v36 = vpop.f32.mrf.mxu1 }
 0x21c   : > { %v2167_v51 = vpop.f32.mrf.mxu0  ;;  %1967 = vst.msk [vmem:[#allocation2 + $0x38] sm:$0xff] %vm226_vm1, %v1959_v2  ;;  %v1957_v59 = vadd.f32 %v1940_v36, %v1847_v34 }
 0x21d   : > { %2208 = vst.msk [vmem:[#allocation2 + $0x10] sm:$0xff] %vm226_vm1, %v2200_v55  ;;  %v2198_v12 = vadd.f32 %v2167_v51, %v1984_v42  ;;  %v1985_v10 = vld [vmem:[#allocation2 + $0x8] sm:$0xff] }
 0x21e   : > { %v4083_v49 = vpop.f32.mrf.mxu0  ;;  %v4092_v0 = vpop.f32.mrf.mxu1  ;;  %1965 = vst.msk [vmem:[#allocation2 + $0x28] sm:$0xff] %vm226_vm1, %v1957_v59 }
 0x21f   : > { %2206 = vst.msk [vmem:[#allocation2] sm:$0xff] %vm226_vm1, %v2198_v12  ;;  %v2201_v50 = vadd.f32 %v4083_v49, %v1987_v3  ;;  %v1990_v27 = vld [vmem:[#allocation2 + $0x30] sm:$0xff] }
 0x220   : > { %v2170_v19 = vpop.f32.mrf.mxu0  ;;  %v2352_v18 = vpop.f32.mrf.mxu1 }
 0x221   : > { %2209 = vst.msk [vmem:[#allocation2 + $0x18] sm:$0xff] %vm226_vm1, %v2201_v50  ;;  %v2199_v6 = vadd.f32 %v2170_v19, %v1985_v10  ;;  %v1988_v23 = vld [vmem:[#allocation2 + $0x20] sm:$0xff] }
 0x222   : > { %v4093_v4 = vpop.f32.mrf.mxu1 }
 0x223   : > { %2207 = vst.msk [vmem:[#allocation2 + $0x8] sm:$0xff] %vm226_vm1, %v2199_v6  ;;  %v1991_v24 = vld [vmem:[#allocation2 + $0x38] sm:$0xff] }
 0x224   : > { %v2232_v14 = vld [vmem:[#allocation2 + $0x10] sm:$0xff]  ;;  %v2355_v13 = vpop.f32.mrf.mxu1 }
 0x225   : > { %v2385_v11 = vadd.f32 %v4092_v0, %v2232_v14  ;;  %v1989_v48 = vld [vmem:[#allocation2 + $0x28] sm:$0xff] }
 0x226   : > { %v2230_v41 = vld [vmem:[#allocation2] sm:$0xff]  ;;  %v4096_v47 = vpop.f32.mrf.mxu1 }
 0x227   : > { %2393 = vst.msk [vmem:[#allocation2 + $0x10] sm:$0xff] %vm226_vm1, %v2385_v11  ;;  %v2383_v44 = vadd.f32 %v2352_v18, %v2230_v41 }
 0x228   : > { %v4086_v43 = vpop.f32.mrf.mxu0  ;;  %v2233_v32 = vld [vmem:[#allocation2 + $0x18] sm:$0xff]  ;;  %v2368_v45 = vpop.f32.mrf.mxu1 }
 0x229   : > { %v2204_v21 = vadd.f32 %v4086_v43, %v1990_v27  ;;  %2391 = vst.msk [vmem:[#allocation2] sm:$0xff] %vm226_vm1, %v2383_v44  ;;  %v2386_v53 = vadd.f32 %v4093_v4, %v2233_v32 }
 0x22a   : > { %v2183_v8 = vpop.f32.mrf.mxu0  ;;  %v2231_v58 = vld [vmem:[#allocation2 + $0x8] sm:$0xff]  ;;  %v4097_v39 = vpop.f32.mrf.mxu1 }
 0x22b   : > { %2212 = vst.msk [vmem:[#allocation2 + $0x30] sm:$0xff] %vm226_vm1, %v2204_v21  ;;  %v2202_v57 = vadd.f32 %v2183_v8, %v1988_v23  ;;  %2394 = vst.msk [vmem:[#allocation2 + $0x18] sm:$0xff] %vm226_vm1, %v2386_v53  ;;  %v2384_v22 = vadd.f32 %v2355_v13, %v2231_v58 }
 0x22c   : > { %v4087_v35 = vpop.f32.mrf.mxu0  ;;  %v2371_v63 = vpop.f32.mrf.mxu1 }
 0x22d   : > { %2210 = vst.msk [vmem:[#allocation2 + $0x20] sm:$0xff] %vm226_vm1, %v2202_v57  ;;  %v2205_v1 = vadd.f32 %v4087_v35, %v1991_v24  ;;  %2392 = vst.msk [vmem:[#allocation2 + $0x8] sm:$0xff] %vm226_vm1, %v2384_v22 }
 0x22e   : > { %v2186_v25 = vpop.f32.mrf.mxu0  ;;  %v2409_v33 = vld [vmem:[#allocation2 + $0x10] sm:$0xff] }
 0x22f   : > { %2213 = vst.msk [vmem:[#allocation2 + $0x38] sm:$0xff] %vm226_vm1, %v2205_v1  ;;  %v2203_v61 = vadd.f32 %v2186_v25, %v1989_v48 }
 0x230   : > { %v4102_v40 = vpop.f32.mrf.mxu0  ;;  %v2407_v7 = vld [vmem:[#allocation2] sm:$0xff] }
 0x231   : > { %2211 = vst.msk [vmem:[#allocation2 + $0x28] sm:$0xff] %vm226_vm1, %v2203_v61  ;;  %v2519_v56 = vadd.f32 %v4102_v40, %v2409_v33 }
 0x232   : > { %v2236_v15 = vld [vmem:[#allocation2 + $0x30] sm:$0xff]  ;;  %v2486_v5 = vpop.f32.mrf.mxu0  ;;  %v2410_v9 = vld [vmem:[#allocation2 + $0x18] sm:$0xff] }
 0x233   : > { %v2389_v46 = vadd.f32 %v4096_v47, %v2236_v15  ;;  %2527 = vst.msk [vmem:[#allocation2 + $0x10] sm:$0xff] %vm226_vm1, %v2519_v56  ;;  %v2517_v30 = vadd.f32 %v2486_v5, %v2407_v7  ;;  %v4112_v31 = vpop.f32.mrf.mxu1 }
 0x234   : > { %v2234_v17 = vld [vmem:[#allocation2 + $0x20] sm:$0xff]  ;;  %v4103_v16 = vpop.f32.mrf.mxu0  ;;  %v2408_v37 = vld [vmem:[#allocation2 + $0x8] sm:$0xff] }
 0x235   : > { %2397 = vst.msk [vmem:[#allocation2 + $0x30] sm:$0xff] %vm226_vm1, %v2389_v46  ;;  %v2387_v62 = vadd.f32 %v2368_v45, %v2234_v17  ;;  %2525 = vst.msk [vmem:[#allocation2] sm:$0xff] %vm226_vm1, %v2517_v30  ;;  %v2520_v54 = vadd.f32 %v4103_v16, %v2410_v9  ;;  %v2732_v20 = vpop.f32.mrf.mxu1 }
 0x236   : > { %v2237_v29 = vld [vmem:[#allocation2 + $0x38] sm:$0xff]  ;;  %v2489_v28 = vpop.f32.mrf.mxu0 }
 0x237   : > { %2395 = vst.msk [vmem:[#allocation2 + $0x20] sm:$0xff] %vm226_vm1, %v2387_v62  ;;  %v2390_v26 = vadd.f32 %v4097_v39, %v2237_v29  ;;  %2528 = vst.msk [vmem:[#allocation2 + $0x18] sm:$0xff] %vm226_vm1, %v2520_v54  ;;  %v2518_v38 = vadd.f32 %v2489_v28, %v2408_v37  ;;  %v4113_v2 = vpop.f32.mrf.mxu1 }
 0x238   : > { %v2235_v52 = vld [vmem:[#allocation2 + $0x28] sm:$0xff]  ;;  %v4106_v55 = vpop.f32.mrf.mxu0 }
 0x239   : > { %2398 = vst.msk [vmem:[#allocation2 + $0x38] sm:$0xff] %vm226_vm1, %v2390_v26  ;;  %v2388_v42 = vadd.f32 %v2371_v63, %v2235_v52  ;;  %2526 = vst.msk [vmem:[#allocation2 + $0x8] sm:$0xff] %vm226_vm1, %v2518_v38  ;;  %v2735_v18 = vpop.f32.mrf.mxu1 }
 0x23a   : > { %v2551_v60 = vld [vmem:[#allocation2 + $0x10] sm:$0xff]  ;;  %v2502_v34 = vpop.f32.mrf.mxu0 }
 0x23b   : > { %2396 = vst.msk [vmem:[#allocation2 + $0x28] sm:$0xff] %vm226_vm1, %v2388_v42  ;;  %v2765_v51 = vadd.f32 %v4112_v31, %v2551_v60 }
 0x23c   : > { %v2413_v12 = vld [vmem:[#allocation2 + $0x30] sm:$0xff]  ;;  %v2549_v3 = vld [vmem:[#allocation2] sm:$0xff]  ;;  %v4107_v36 = vpop.f32.mrf.mxu0 }
 0x23d   : > { %2773 = vst.msk [vmem:[#allocation2 + $0x10] sm:$0xff] %vm226_vm1, %v2765_v51  ;;  %v2523_v49 = vadd.f32 %v4106_v55, %v2413_v12  ;;  %v2763_v59 = vadd.f32 %v2732_v20, %v2549_v3 }
 0x23e   : > { %v2411_v50 = vld [vmem:[#allocation2 + $0x20] sm:$0xff]  ;;  %v2552_v10 = vld [vmem:[#allocation2 + $0x18] sm:$0xff]  ;;  %v2505_v0 = vpop.f32.mrf.mxu0 }
 0x23f   : > { %2531 = vst.msk [vmem:[#allocation2 + $0x30] sm:$0xff] %vm226_vm1, %v2523_v49  ;;  %2771 = vst.msk [vmem:[#allocation2] sm:$0xff] %vm226_vm1, %v2763_v59  ;;  %v2521_v19 = vadd.f32 %v2502_v34, %v2411_v50  ;;  %v2766_v6 = vadd.f32 %v4113_v2, %v2552_v10 }
 0x240   : > { %v2414_v4 = vld [vmem:[#allocation2 + $0x38] sm:$0xff]  ;;  %v2550_v14 = vld [vmem:[#allocation2 + $0x8] sm:$0xff]  ;;  %v4122_v11 = vpop.f32.mrf.mxu0  ;;  %v4116_v23 = vpop.f32.mrf.mxu1 }
 0x241   : > { %2529 = vst.msk [vmem:[#allocation2 + $0x20] sm:$0xff] %vm226_vm1, %v2521_v19  ;;  %2774 = vst.msk [vmem:[#allocation2 + $0x18] sm:$0xff] %vm226_vm1, %v2766_v6  ;;  %v2524_v27 = vadd.f32 %v4107_v36, %v2414_v4  ;;  %v2764_v13 = vadd.f32 %v2735_v18, %v2550_v14 }
 0x242   : > { %v2412_v41 = vld [vmem:[#allocation2 + $0x28] sm:$0xff]  ;;  %v2914_v43 = vpop.f32.mrf.mxu0  ;;  %v2748_v8 = vpop.f32.mrf.mxu1 }
 0x243   : > { %2532 = vst.msk [vmem:[#allocation2 + $0x38] sm:$0xff] %vm226_vm1, %v2524_v27  ;;  %2772 = vst.msk [vmem:[#allocation2 + $0x8] sm:$0xff] %vm226_vm1, %v2764_v13  ;;  %v2522_v44 = vadd.f32 %v2505_v0, %v2412_v41 }
 0x244   : > { %v2797_v47 = vld [vmem:[#allocation2 + $0x10] sm:$0xff]  ;;  %v4123_v21 = vpop.f32.mrf.mxu0  ;;  %v4117_v35 = vpop.f32.mrf.mxu1 }
 0x245   : > { %2530 = vst.msk [vmem:[#allocation2 + $0x28] sm:$0xff] %vm226_vm1, %v2522_v44  ;;  %v2947_v32 = vadd.f32 %v4122_v11, %v2797_v47 }
 0x246   : > { %v2555_v53 = vld [vmem:[#allocation2 + $0x30] sm:$0xff]  ;;  %v2795_v24 = vld [vmem:[#allocation2] sm:$0xff]  ;;  %v2917_v45 = vpop.f32.mrf.mxu0  ;;  %v2751_v61 = vpop.f32.mrf.mxu1 }
 0x247   : > { %v2769_v57 = vadd.f32 %v4116_v23, %v2555_v53  ;;  %2955 = vst.msk [vmem:[#allocation2 + $0x10] sm:$0xff] %vm226_vm1, %v2947_v32  ;;  %v2945_v58 = vadd.f32 %v2914_v43, %v2795_v24 }
 0x248   : > { %v2553_v22 = vld [vmem:[#allocation2 + $0x20] sm:$0xff]  ;;  %v2798_v48 = vld [vmem:[#allocation2 + $0x18] sm:$0xff]  ;;  %v4126_v1 = vpop.f32.mrf.mxu0  ;;  %v4132_v15 = vpop.f32.mrf.mxu1 }
 0x249   : > { %2777 = vst.msk [vmem:[#allocation2 + $0x30] sm:$0xff] %vm226_vm1, %v2769_v57  ;;  %v2767_v39 = vadd.f32 %v2748_v8, %v2553_v22  ;;  %2953 = vst.msk [vmem:[#allocation2] sm:$0xff] %vm226_vm1, %v2945_v58  ;;  %v2948_v25 = vadd.f32 %v4123_v21, %v2798_v48 }
 0x24a   : > { %v2556_v33 = vld [vmem:[#allocation2 + $0x38] sm:$0xff]  ;;  %v2796_v40 = vld [vmem:[#allocation2 + $0x8] sm:$0xff]  ;;  %v2930_v56 = vpop.f32.mrf.mxu0  ;;  %v3049_v9 = vpop.f32.mrf.mxu1 }
 0x24b   : > { %2775 = vst.msk [vmem:[#allocation2 + $0x20] sm:$0xff] %vm226_vm1, %v2767_v39  ;;  %v2770_v7 = vadd.f32 %v4117_v35, %v2556_v33  ;;  %2956 = vst.msk [vmem:[#allocation2 + $0x18] sm:$0xff] %vm226_vm1, %v2948_v25  ;;  %v2946_v63 = vadd.f32 %v2917_v45, %v2796_v40 }
 0x24c   : > { %v2554_v5 = vld [vmem:[#allocation2 + $0x28] sm:$0xff]  ;;  %v4127_v46 = vpop.f32.mrf.mxu0  ;;  %v4133_v62 = vpop.f32.mrf.mxu1 }
 0x24d   : > { %2778 = vst.msk [vmem:[#allocation2 + $0x38] sm:$0xff] %vm226_vm1, %v2770_v7  ;;  %v2768_v30 = vadd.f32 %v2751_v61, %v2554_v5  ;;  %2954 = vst.msk [vmem:[#allocation2 + $0x8] sm:$0xff] %vm226_vm1, %v2946_v63 }
 0x24e   : > { %v2972_v17 = vld [vmem:[#allocation2 + $0x10] sm:$0xff]  ;;  %v2933_v54 = vpop.f32.mrf.mxu0  ;;  %v3052_v26 = vpop.f32.mrf.mxu1 }
 0x24f   : > { %2776 = vst.msk [vmem:[#allocation2 + $0x28] sm:$0xff] %vm226_vm1, %v2768_v30  ;;  %v3082_v16 = vadd.f32 %v4132_v15, %v2972_v17 }
 0x250   : > { %v2801_v37 = vld [vmem:[#allocation2 + $0x30] sm:$0xff]  ;;  %v2970_v31 = vld [vmem:[#allocation2] sm:$0xff]  ;;  %v4136_v42 = vpop.f32.mrf.mxu1  ;;  %v4142_v60 = vpop.f32.mrf.mxu0 }
 0x251   : > { %3090 = vst.msk [vmem:[#allocation2 + $0x10] sm:$0xff] %vm226_vm1, %v3082_v16  ;;  %v2951_v29 = vadd.f32 %v4126_v1, %v2801_v37  ;;  %v3080_v28 = vadd.f32 %v3049_v9, %v2970_v31  ;;  %v4223_v9 = vld [vmem:[%s4319_s6 + $0xe8] sm:$0xf]  ;;  %v4224_v31 = vld [vmem:[%s4319_s6 + $0xd8] sm:$0xf] }
 0x252   : > { %v2799_v38 = vld [vmem:[#allocation2 + $0x20] sm:$0xff]  ;;  %v2973_v20 = vld [vmem:[#allocation2 + $0x18] sm:$0xff]  ;;  %v3065_v3 = vpop.f32.mrf.mxu1  ;;  %v3295_v36 = vpop.f32.mrf.mxu0  ;;  %v3534_v17 = vunpack.c.l.bf16 %v4223_v9 }
 0x253   : > { %2959 = vst.msk [vmem:[#allocation2 + $0x30] sm:$0xff] %vm226_vm1, %v2951_v29  ;;  %3088 = vst.msk [vmem:[#allocation2] sm:$0xff] %vm226_vm1, %v3080_v28  ;;  %v2949_v52 = vadd.f32 %v2930_v56, %v2799_v38  ;;  %v3083_v55 = vadd.f32 %v4133_v62, %v2973_v20  ;;  %v3532_v29 = vunpack.c.l.bf16 %v4224_v31 }
 0x254   : > { %v2802_v34 = vld [vmem:[#allocation2 + $0x38] sm:$0xff]  ;;  %v2971_v51 = vld [vmem:[#allocation2 + $0x8] sm:$0xff]  ;;  %v4137_v50 = vpop.f32.mrf.mxu1  ;;  %v4143_v10 = vpop.f32.mrf.mxu0 }
 0x255   : > { %2957 = vst.msk [vmem:[#allocation2 + $0x20] sm:$0xff] %vm226_vm1, %v2949_v52  ;;  %3091 = vst.msk [vmem:[#allocation2 + $0x18] sm:$0xff] %vm226_vm1, %v3083_v55  ;;  %v2952_v2 = vadd.f32 %v4127_v46, %v2802_v34  ;;  %v3081_v12 = vadd.f32 %v3052_v26, %v2971_v51  ;;  %v4225_v52 = vld [vmem:[%s4319_s6 + $0xf0] sm:$0xf]  ;;  %v4226_v34 = vld [vmem:[%s4319_s6 + $0xe0] sm:$0xf] }
 0x256   : > { %v2800_v49 = vld [vmem:[#allocation2 + $0x28] sm:$0xff]  ;;  %v3068_v6 = vpop.f32.mrf.mxu1  ;;  %v3298_v14 = vpop.f32.mrf.mxu0  ;;  %v3535_v55 = vunpack.c.l.bf16 %v4225_v52  ;;  %v3533_v51 = vunpack.c.l.bf16 %v4226_v34 }
 0x257   : > { %2960 = vst.msk [vmem:[#allocation2 + $0x38] sm:$0xff] %vm226_vm1, %v2952_v2  ;;  %3089 = vst.msk [vmem:[#allocation2 + $0x8] sm:$0xff] %vm226_vm1, %v3081_v12  ;;  %v2950_v59 = vadd.f32 %v2933_v54, %v2800_v49 }
 0x258   : > { %v3114_v0 = vld [vmem:[#allocation2 + $0x10] sm:$0xff]  ;;  %v4152_v13 = vpop.f32.mrf.mxu1 }
 0x259   : > { %2958 = vst.msk [vmem:[#allocation2 + $0x28] sm:$0xff] %vm226_vm1, %v2950_v59  ;;  %v3328_v19 = vadd.f32 %v4142_v60, %v3114_v0 }
 0x25a   : > { %v2976_v18 = vld [vmem:[#allocation2 + $0x30] sm:$0xff]  ;;  %v3112_v4 = vld [vmem:[#allocation2] sm:$0xff]  ;;  %v3477_v47 = vpop.f32.mrf.mxu1  ;;  %v4146_v8 = vpop.f32.mrf.mxu0 }
 0x25b   : > { %v3086_v11 = vadd.f32 %v4136_v42, %v2976_v18  ;;  %3336 = vst.msk [vmem:[#allocation2 + $0x10] sm:$0xff] %vm226_vm1, %v3328_v19  ;;  %v3326_v27 = vadd.f32 %v3295_v36, %v3112_v4  ;;  %v3876_v18 = vld [vmem:[%s5163_s4] ss:$0 sm:$0xff] }
 0x25c   : > { %v2974_v41 = vld [vmem:[#allocation2 + $0x20] sm:$0xff]  ;;  %v3115_v43 = vld [vmem:[#allocation2 + $0x18] sm:$0xff]  ;;  %v4153_v57 = vpop.f32.mrf.mxu1  ;;  %v3311_v22 = vpop.f32.mrf.mxu0 }
 0x25d   : > { %3094 = vst.msk [vmem:[#allocation2 + $0x30] sm:$0xff] %vm226_vm1, %v3086_v11  ;;  %v3084_v44 = vadd.f32 %v3065_v3, %v2974_v41  ;;  %3334 = vst.msk [vmem:[#allocation2] sm:$0xff] %vm226_vm1, %v3326_v27  ;;  %v3329_v23 = vadd.f32 %v4143_v10, %v3115_v43  ;;  %v4227_v11 = vld [vmem:[%s4319_s6 + $0x108] sm:$0xf]  ;;  %v4228_v43 = vld [vmem:[%s4319_s6 + $0xf8] sm:$0xf] }
 0x25e   : > { %v2977_v21 = vld [vmem:[#allocation2 + $0x38] sm:$0xff]  ;;  %v3113_v32 = vld [vmem:[#allocation2 + $0x8] sm:$0xff]  ;;  %v3480_v25 = vpop.f32.mrf.mxu1  ;;  %v4147_v7 = vpop.f32.mrf.mxu0  ;;  %v3538_v27 = vunpack.c.l.bf16 %v4227_v11 }
 0x25f   : > { %3092 = vst.msk [vmem:[#allocation2 + $0x20] sm:$0xff] %vm226_vm1, %v3084_v44  ;;  %v3087_v53 = vadd.f32 %v4137_v50, %v2977_v21  ;;  %3337 = vst.msk [vmem:[#allocation2 + $0x18] sm:$0xff] %vm226_vm1, %v3329_v23  ;;  %v3327_v24 = vadd.f32 %v3298_v14, %v3113_v32  ;;  %v3536_v44 = vunpack.c.l.bf16 %v4228_v43  ;;  %v4229_v32 = vld [vmem:[%s4319_s6 + $0x110] sm:$0xf] }
 0x260   : > { %v2975_v45 = vld [vmem:[#allocation2 + $0x28] sm:$0xff]  ;;  %v4156_v30 = vpop.f32.mrf.mxu1  ;;  %v3314_v37 = vpop.f32.mrf.mxu0 }
 0x261   : > { %3095 = vst.msk [vmem:[#allocation2 + $0x38] sm:$0xff] %vm226_vm1, %v3087_v53  ;;  %v3085_v58 = vadd.f32 %v3068_v6, %v2975_v45  ;;  %3335 = vst.msk [vmem:[#allocation2 + $0x8] sm:$0xff] %vm226_vm1, %v3327_v24 }
 0x262   : > { %v3360_v35 = vld [vmem:[#allocation2 + $0x10] sm:$0xff]  ;;  %v3493_v38 = vpop.f32.mrf.mxu1 }
 0x263   : > { %3093 = vst.msk [vmem:[#allocation2 + $0x28] sm:$0xff] %vm226_vm1, %v3085_v58  ;;  %v3510_v48 = vadd.f32 %v4152_v13, %v3360_v35  ;;  %v4230_v58 = vld [vmem:[%s4319_s6 + $0x100] sm:$0xf] }
 0x264   : > { %v3118_v1 = vld [vmem:[#allocation2 + $0x30] sm:$0xff]  ;;  %v3358_v39 = vld [vmem:[#allocation2] sm:$0xff]  ;;  %v4157_v49 = vpop.f32.mrf.mxu1  ;;  %v3537_v35 = vunpack.c.l.bf16 %v4230_v58 }
 0x265   : > { %3518 = vst.msk [vmem:[#allocation2 + $0x10] sm:$0xff] %vm226_vm1, %v3510_v48  ;;  %v3332_v61 = vadd.f32 %v4146_v8, %v3118_v1  ;;  %v3508_v33 = vadd.f32 %v3477_v47, %v3358_v39  ;;  %v3539_v8 = vunpack.c.l.bf16 %v4229_v32 }
 0x266   : > { %v3116_v40 = vld [vmem:[#allocation2 + $0x20] sm:$0xff]  ;;  %v3361_v56 = vld [vmem:[#allocation2 + $0x18] sm:$0xff]  ;;  %v3496_v14 = vpop.f32.mrf.mxu1 }
 0x267   : > { %3340 = vst.msk [vmem:[#allocation2 + $0x30] sm:$0xff] %vm226_vm1, %v3332_v61  ;;  %3516 = vst.msk [vmem:[#allocation2] sm:$0xff] %vm226_vm1, %v3508_v33  ;;  %v3330_v63 = vadd.f32 %v3311_v22, %v3116_v40  ;;  %v3511_v15 = vadd.f32 %v4153_v57, %v3361_v56 }
 0x268   : > { %v3119_v5 = vld [vmem:[#allocation2 + $0x38] sm:$0xff]  ;;  %v3359_v46 = vld [vmem:[#allocation2 + $0x8] sm:$0xff] }
 0x269   : > { %3338 = vst.msk [vmem:[#allocation2 + $0x20] sm:$0xff] %vm226_vm1, %v3330_v63  ;;  %3519 = vst.msk [vmem:[#allocation2 + $0x18] sm:$0xff] %vm226_vm1, %v3511_v15  ;;  %v3333_v16 = vadd.f32 %v4147_v7, %v3119_v5  ;;  %v3509_v62 = vadd.f32 %v3480_v25, %v3359_v46 }
 0x26a   : > { %v3117_v54 = vld [vmem:[#allocation2 + $0x28] sm:$0xff] }
 0x26b   : > { %3341 = vst.msk [vmem:[#allocation2 + $0x38] sm:$0xff] %vm226_vm1, %v3333_v16  ;;  %3517 = vst.msk [vmem:[#allocation2 + $0x8] sm:$0xff] %vm226_vm1, %v3509_v62  ;;  %v3331_v28 = vadd.f32 %v3314_v37, %v3117_v54 }
 0x26c   : > { %v3526_v26 = vld [vmem:[#allocation2 + $0x10] sm:$0xff] }
 0x26d   : > { %v3542_v20 = vadd.f32 %v3534_v17, %v3526_v26  ;;  %3339 = vst.msk [vmem:[#allocation2 + $0x28] sm:$0xff] %vm226_vm1, %v3331_v28 }
 0x26e   : > { %v3524_v42 = vld [vmem:[#allocation2] sm:$0xff]  ;;  %v3364_v60 = vld [vmem:[#allocation2 + $0x30] sm:$0xff] }
 0x26f   : > { %3550 = vst.msk [vmem:[#allocation2 + $0x10] sm:$0xff] %vm282_vm2, %v3542_v20  ;;  %v3540_v2 = vadd.f32 %v3532_v29, %v3524_v42  ;;  %v3514_v12 = vadd.f32 %v4156_v30, %v3364_v60 }
 0x270   : > { %v3527_v3 = vld [vmem:[#allocation2 + $0x18] sm:$0xff]  ;;  %v3362_v36 = vld [vmem:[#allocation2 + $0x20] sm:$0xff] }
 0x271   : > { %3548 = vst.msk [vmem:[#allocation2] sm:$0xff] %vm282_vm2, %v3540_v2  ;;  %v3543_v59 = vadd.f32 %v3535_v55, %v3527_v3  ;;  %v3512_v50 = vadd.f32 %v3493_v38, %v3362_v36 }
 0x272   : > { %3522 = vst.msk [vmem:[#allocation2 + $0x30] sm:$0xff] %vm226_vm1, %v3514_v12  ;;  %v3525_v10 = vld [vmem:[#allocation2 + $0x8] sm:$0xff]  ;;  %v3365_v0 = vld [vmem:[#allocation2 + $0x38] sm:$0xff] }
 0x273   : > { %3551 = vst.msk [vmem:[#allocation2 + $0x18] sm:$0xff] %vm282_vm2, %v3543_v59  ;;  %v3541_v19 = vadd.f32 %v3533_v51, %v3525_v10  ;;  %v3515_v6 = vadd.f32 %v4157_v49, %v3365_v0 }
 0x274   : > { %3520 = vst.msk [vmem:[#allocation2 + $0x20] sm:$0xff] %vm226_vm1, %v3512_v50  ;;  %v3363_v4 = vld [vmem:[#allocation2 + $0x28] sm:$0xff] }
 0x275   : > { %3549 = vst.msk [vmem:[#allocation2 + $0x8] sm:$0xff] %vm282_vm2, %v3541_v19  ;;  %v3513_v13 = vadd.f32 %v3496_v14, %v3363_v4 }
 0x276   : > { %3523 = vst.msk [vmem:[#allocation2 + $0x38] sm:$0xff] %vm226_vm1, %v3515_v6  ;;  %v3558_v41 = vld [vmem:[#allocation2 + $0x10] sm:$0xff] }
 0x277   : > { %v3573_v23 = vadd.f32 %v3876_v18, %v3558_v41  ;;  %3521 = vst.msk [vmem:[#allocation2 + $0x28] sm:$0xff] %vm226_vm1, %v3513_v13 }
 0x278   : > { %v3556_v47 = vld [vmem:[#allocation2] sm:$0xff] }
 0x279   : > { %v3530_v21 = vld [vmem:[#allocation2 + $0x30] sm:$0xff]  ;;  %3581 = vst.msk [vmem:[%s5130_s21 + $0x10] sm:$0xff] %vm226_vm1, %v3573_v23  ;;  %v3571_v53 = vadd.f32 %v3876_v18, %v3556_v47 }
 0x27a   : > { %v3546_v24 = vadd.f32 %v3538_v27, %v3530_v21  ;;  %v3559_v45 = vld [vmem:[#allocation2 + $0x18] sm:$0xff] }
 0x27b   : > { %v3528_v57 = vld [vmem:[#allocation2 + $0x20] sm:$0xff]  ;;  %3579 = vst.msk [vmem:[%s5130_s21] sm:$0xff] %vm226_vm1, %v3571_v53  ;;  %v3574_v22 = vadd.f32 %v3876_v18, %v3559_v45 }
 0x27c   : > { %3554 = vst.msk [vmem:[#allocation2 + $0x30] sm:$0xff] %vm282_vm2, %v3546_v24  ;;  %v3544_v48 = vadd.f32 %v3536_v44, %v3528_v57  ;;  %v3557_v1 = vld [vmem:[#allocation2 + $0x8] sm:$0xff] }
 0x27d   : > { %v3531_v39 = vld [vmem:[#allocation2 + $0x38] sm:$0xff]  ;;  %3582 = vst.msk [vmem:[%s5130_s21 + $0x18] sm:$0xff] %vm226_vm1, %v3574_v22  ;;  %v3572_v25 = vadd.f32 %v3876_v18, %v3557_v1 }
 0x27e   : > { %3552 = vst.msk [vmem:[#allocation2 + $0x20] sm:$0xff] %vm282_vm2, %v3544_v48  ;;  %v3547_v61 = vadd.f32 %v3539_v8, %v3531_v39  ;;  %v3529_v33 = vld [vmem:[#allocation2 + $0x28] sm:$0xff] }
 0x27f   : > { %3580 = vst.msk [vmem:[%s5130_s21 + $0x8] sm:$0xff] %vm226_vm1, %v3572_v25  ;;  %v3545_v40 = vadd.f32 %v3537_v35, %v3529_v33 }
 0x280   : > { %3555 = vst.msk [vmem:[#allocation2 + $0x38] sm:$0xff] %vm282_vm2, %v3547_v61 }
 0x281   : > { %3553 = vst.msk [vmem:[#allocation2 + $0x28] sm:$0xff] %vm282_vm2, %v3545_v40 }
 0x283   : > { %v3562_v56 = vld [vmem:[#allocation2 + $0x30] sm:$0xff] }
 0x284   : > { %v3577_v7 = vadd.f32 %v3876_v18, %v3562_v56 }
 0x285   : > { %v3560_v63 = vld [vmem:[#allocation2 + $0x20] sm:$0xff] }
 0x286   : > { %3585 = vst.msk [vmem:[%s5130_s21 + $0x30] sm:$0xff] %vm226_vm1, %v3577_v7  ;;  %v3575_v15 = vadd.f32 %v3876_v18, %v3560_v63 }
 0x287   : > { %v3563_v5 = vld [vmem:[#allocation2 + $0x38] sm:$0xff] }
 0x288   : > { %3583 = vst.msk [vmem:[%s5130_s21 + $0x20] sm:$0xff] %vm226_vm1, %v3575_v15  ;;  %v3578_v46 = vadd.f32 %v3876_v18, %v3563_v5  ;;  %v3561_v30 = vld [vmem:[#allocation2 + $0x28] sm:$0xff] }
 0x289   : > { %v3576_v9 = vadd.f32 %v3876_v18, %v3561_v30 }
 0x28a   : > { %3586 = vst.msk [vmem:[%s5130_s21 + $0x38] sm:$0xff] %vm226_vm1, %v3578_v46 }
 0x28b   : > { %3584 = vst.msk [vmem:[%s5130_s21 + $0x28] sm:$0xff] %vm226_vm1, %v3576_v9 }
 0x28c PF: > { %s15_s18 = sadd.s32 1, %s4237_s18  }
 0x28d   : > { %p12_p4 = scmp.ge.s32.totalorder %s15_s18, 4  }
 0x28f   :  { %14 = sbr.rel (!%p12_p4) target bundleno = 1 (0x1), region = 91 }

</bundles_post_ra>
